<compile_context>
chip_gen: v7x
topology: tpu7x:2x2x1
jax: 0.10.0
libtpu: 0.0.40
codegen_flags: <defaults>
</compile_context>

<pallas_src>
from functools import partial

import jax
import jax.numpy as jnp
from jax import lax
from jax.experimental import pallas as pl
from jax.experimental.pallas import tpu as pltpu

NEG_SLOPE = 0.28507218

H_IN = W_IN = 16
C1, C2, C3 = 142, 12, 5          # real channel counts
C1P, C2P, C3P = 256, 128, 128    # lane-dense padded channel counts
K1P = 32                         # 16 conv1 window taps + 1 bias feature, padded to 32
NPOS = 9 * 64                    # conv1 positions per batch (one 8x8 group per conv2 tap)


def _fused_kernel(p1_ref, w1_ref, w2_ref, b2_ref, w3_ref, b3_ref,
                  o_ref, p2_ref, *, slope):
    """conv1 -> lrelu -> conv2 -> lrelu -> conv3 -> lrelu for ONE batch element.

    p1_ref : (1, 576, 32) bf16  conv1 patches; rows [t*64 + r*8 + c] = patch at image
                                position (2r-1+i, 2c-1+j) for conv2 tap t=(i,j);
                                feature 16 is a constant 1 (bias), zero rows at padding.
    w1_ref : (32, 256)    bf16  conv1 weights, row 16 = bias, Cout 142 -> 256
    w2_ref : (9, 256, 128) bf16 conv2 per-tap weights (Cin 142->256, Cout 12->128)
    b2_ref : (1, 128)     f32
    w3_ref : (9, 128, 128) bf16 conv3 per-tap weights (Cin 12->128, Cout 5->128)
    b3_ref : (1, 128)     f32
    o_ref  : (1, 64, 128) f32   conv3 output (8*8 positions, Cout padded)
    p2_ref : (10, 16, 128) f32  scratch: conv2 output with 1-px zero border for conv3
    """
    def lrelu(y):
        return jnp.where(y > 0, y, y * slope)

    # ---- conv1 + conv2, fused per conv2 tap: two MXU matmuls per tap, M = 64 ----
    acc2 = None
    for t in range(9):
        patches = p1_ref[0, t * 64:(t + 1) * 64, :]                    # (64, 32) bf16
        y1 = jnp.dot(patches, w1_ref[...],
                     preferred_element_type=jnp.float32)               # (64, 256) f32
        a1 = lrelu(y1).astype(jnp.bfloat16)                            # conv1 act, tap t
        d = jnp.dot(a1, w2_ref[t], preferred_element_type=jnp.float32)  # (64, 128) f32
        acc2 = d if acc2 is None else acc2 + d
    y2 = lrelu(acc2 + b2_ref[...])                                     # (64, 128) f32

    # ---- stage conv2 activations in a small zero-padded map for conv3's taps ----
    p2_ref[...] = jnp.zeros_like(p2_ref)
    p2_ref[1:9, 1:9, :] = y2.reshape(8, 8, C2P)

    # ---- conv3: 9 tap-accumulated (64,128)x(128,128) matmuls ----
    acc3 = None
    for t in range(9):
        i, j = divmod(t, 3)
        lhs = p2_ref[i:i + 8, j:j + 8, :].reshape(64, C2P).astype(jnp.bfloat16)
        d = jnp.dot(lhs, w3_ref[t], preferred_element_type=jnp.float32)
        acc3 = d if acc3 is None else acc3 + d
    o_ref[0] = lrelu(acc3 + b3_ref[...])


def _build_conv1_patches(x_nchw):
    """Glue only (no FLOPs): (N,1,16,16) -> (N, 576, 32) bf16 tap-grouped patches."""
    n = x_nchw.shape[0]
    x = x_nchw[:, 0, :, :]                                     # (N, 16, 16)
    xp = jnp.pad(x, ((0, 0), (1, 1), (1, 1)))                  # conv1's own padding=1
    win = [xp[:, i:i + 15, j:j + 15] for i in range(4) for j in range(4)]
    p = jnp.stack(win, axis=-1)                                # (N, 15, 15, 16)
    p = jnp.concatenate([p, jnp.ones_like(p[..., :1])], axis=-1)   # bias feature -> 17
    pp = jnp.pad(p, ((0, 0), (1, 1), (1, 1), (0, 0)))          # conv2 pad positions -> 0
    groups = [pp[:, i:i + 16:2, j:j + 16:2, :].reshape(n, 64, 17)
              for i in range(3) for j in range(3)]             # one group per conv2 tap
    pbig = jnp.concatenate(groups, axis=1)                     # (N, 576, 17)
    pbig = jnp.pad(pbig, ((0, 0), (0, 0), (0, K1P - 17)))
    return pbig.astype(jnp.bfloat16)


def prep_weights(params):
    """OIHW conv weights -> MXU-ready padded bf16 operands. Call ONCE, outside jit."""
    w1 = jnp.transpose(params["w1"].reshape(C1, 16))           # (16, 142)
    W1 = jnp.zeros((K1P, C1P), jnp.float32)
    W1 = W1.at[:16, :C1].set(w1)
    W1 = W1.at[16, :C1].set(params["b1"])                      # bias folded as feature 16

    w2 = jnp.transpose(params["w2"], (2, 3, 1, 0)).reshape(9, C1, C2)
    W2 = jnp.zeros((9, C1P, C2P), jnp.float32).at[:, :C1, :C2].set(w2)
    b2 = jnp.zeros((1, C2P), jnp.float32).at[0, :C2].set(params["b2"])

    w3 = jnp.transpose(params["w3"], (2, 3, 1, 0)).reshape(9, C2, C3)
    W3 = jnp.zeros((9, C2P, C3P), jnp.float32).at[:, :C2, :C3].set(w3)
    b3 = jnp.zeros((1, C3P), jnp.float32).at[0, :C3].set(params["b3"])

    return {"W1": W1.astype(jnp.bfloat16), "W2": W2.astype(jnp.bfloat16), "b2": b2,
            "W3": W3.astype(jnp.bfloat16), "b3": b3}


def conv_stack(x_nchw, prepped):
    """v12 = lrelu(conv3(lrelu(conv2(lrelu(conv1(x)))))) via one fused Pallas call."""
    n = x_nchw.shape[0]
    assert x_nchw.shape[1:] == (1, H_IN, W_IN), x_nchw.shape
    pbig = _build_conv1_patches(x_nchw)

    out = pl.pallas_call(
        partial(_fused_kernel, slope=NEG_SLOPE),
        out_shape=jax.ShapeDtypeStruct((n, 64, C3P), jnp.float32),
        grid=(n,),
        in_specs=[
            pl.BlockSpec((1, NPOS, K1P), lambda b: (b, 0, 0)),
            pl.BlockSpec((K1P, C1P), lambda b: (0, 0)),
            pl.BlockSpec((9, C1P, C2P), lambda b: (0, 0, 0)),
            pl.BlockSpec((1, C2P), lambda b: (0, 0)),
            pl.BlockSpec((9, C2P, C3P), lambda b: (0, 0, 0)),
            pl.BlockSpec((1, C3P), lambda b: (0, 0)),
        ],
        out_specs=pl.BlockSpec((1, 64, C3P), lambda b: (b, 0, 0)),
        scratch_shapes=[pltpu.VMEM((10, 16, C2P), jnp.float32)],
        compiler_params=pltpu.CompilerParams(dimension_semantics=("parallel",)),
    )(pbig, prepped["W1"], prepped["W2"], prepped["b2"], prepped["W3"], prepped["b3"])

    y = out.reshape(n, 8, 8, C3P)[..., :C3]      # drop channel padding (NHWC)
    return jnp.transpose(y, (0, 3, 1, 2))        # NCHW (N, 5, 8, 8)


def model_forward(x_nchw, prepped):
    """Full module forward (returns v16). conv4 has 0 output channels, so the module's
    output is an empty, input-independent tensor; the conv1-3 Pallas compute is
    validated separately in __main__."""
    v12 = conv_stack(x_nchw, prepped)
    n, _, h3, w3 = v12.shape
    # TODO(synk): conv4 = Conv2d(5, 0, 3, padding=2) has zero output channels — there is
    # no compute to express; only its (empty) output shape is emitted.
    h4, w4 = h3 + 2 * 2 - 3 + 1, w3 + 2 * 2 - 3 + 1
    return jnp.zeros((n, 0, h4, w4), jnp.float32)


def _ref_conv_stack(x_nchw, params):
    """Pure-JAX reference for conv1..conv3 + leaky-relu (f32, highest precision)."""
    def conv(x, w, b, stride, pad):
        y = lax.conv_general_dilated(
            x, w, (stride, stride), ((pad, pad), (pad, pad)),
            dimension_numbers=("NCHW", "OIHW", "NCHW"),
            precision=lax.Precision.HIGHEST)
        return y + b.reshape(1, -1, 1, 1)

    def lrelu(y):
        return jnp.where(y > 0, y, y * NEG_SLOPE)

    y = lrelu(conv(x_nchw, params["w1"], params["b1"], 1, 1))
    y = lrelu(conv(y, params["w2"], params["b2"], 2, 1))
    y = lrelu(conv(y, params["w3"], params["b3"], 1, 1))
    return y


def init_params(key):
    ks = jax.random.split(key, 8)

    def w(k, shape, scale=0.05):
        return (scale * jax.random.normal(k, shape)).astype(jnp.float32)

    return {
        "w1": w(ks[0], (C1, 1, 4, 4)),  "b1": w(ks[1], (C1,)),
        "w2": w(ks[2], (C2, C1, 3, 3)), "b2": w(ks[3], (C2,)),
        "w3": w(ks[4], (C3, C2, 3, 3)), "b3": w(ks[5], (C3,)),
        "w4": w(ks[6], (0, C3, 3, 3)),  "b4": w(ks[7], (0,)),
    }


if __name__ == "__main__":
    key = jax.random.PRNGKey(0)
    pkey, xkey = jax.random.split(key)
    params = init_params(pkey)
    prepped = prep_weights(params)          # hoisted out of the per-forward jitted path

    # Input consistent with conv1 (in_channels=1): NCHW = (2, 1, 16, 16)
    x = jax.random.normal(xkey, (2, 1, H_IN, W_IN), dtype=jnp.float32)

    # Run the fused Pallas conv stack (the observable compute) and validate it.
    v12 = jax.block_until_ready(jax.jit(conv_stack)(x, prepped))
    ref = jax.block_until_ready(_ref_conv_stack(x, params))
    assert v12.shape == ref.shape == (2, C3, 8, 8), (v12.shape, ref.shape)
    max_err = float(jnp.max(jnp.abs(v12 - ref)))
    assert max_err < 2e-2, f"max abs err {max_err}"

    # Full module forward: conv1 15x15 -> conv2 8x8 -> conv3 8x8 -> conv4 (0, 10, 10)
    out = jax.block_until_ready(jax.jit(model_forward)(x, prepped))
    assert out.shape == (2, 0, 10, 10), out.shape
    print("KERNEL_OK")
</pallas_src>

<mosaic_0001>
module attributes {stable_mosaic.version = 11 : i64} {
  func.func @_fused_kernel(%arg0: i32, %arg1: memref<1x576x32xbf16, #tpu.memory_space<vmem>>, %arg2: memref<32x256xbf16, #tpu.memory_space<vmem>>, %arg3: memref<9x256x128xbf16, #tpu.memory_space<vmem>>, %arg4: memref<1x128xf32, #tpu.memory_space<vmem>>, %arg5: memref<9x128x128xbf16, #tpu.memory_space<vmem>>, %arg6: memref<1x128xf32, #tpu.memory_space<vmem>>, %arg7: memref<1x64x128xf32, #tpu.memory_space<vmem>>, %arg8: memref<10x16x128xf32, #tpu.memory_space<vmem>>) attributes {dimension_semantics = [#tpu.dimension_semantics<parallel>], iteration_bounds = array<i64: 2>, scalar_prefetch = 0 : i64, scratch_operands = 1 : i64, tpu.core_type = #tpu.core_type<tc>, window_params = [{transform_indices = @transform_0, window_bounds = array<i64: 1, 576, 32>}, {pipeline_mode = #tpu.pipeline_mode<synchronous>, transform_indices = @transform_1, window_bounds = array<i64: 32, 256>}, {pipeline_mode = #tpu.pipeline_mode<synchronous>, transform_indices = @transform_2, window_bounds = array<i64: 9, 256, 128>}, {pipeline_mode = #tpu.pipeline_mode<synchronous>, transform_indices = @transform_3, window_bounds = array<i64: 1, 128>}, {pipeline_mode = #tpu.pipeline_mode<synchronous>, transform_indices = @transform_4, window_bounds = array<i64: 9, 128, 128>}, {pipeline_mode = #tpu.pipeline_mode<synchronous>, transform_indices = @transform_5, window_bounds = array<i64: 1, 128>}, {transform_indices = @transform_6, window_bounds = array<i64: 1, 64, 128>}]} {
    %c0 = arith.constant 0 : index
    %c0_0 = arith.constant 0 : index
    %c0_1 = arith.constant 0 : index
    %0 = vector.load %arg1[%c0, %c0_0, %c0_1] : memref<1x576x32xbf16, #tpu.memory_space<vmem>>, vector<1x64x32xbf16>
    %1 = vector.shape_cast %0 : vector<1x64x32xbf16> to vector<64x32xbf16>
    %c0_2 = arith.constant 0 : index
    %c0_3 = arith.constant 0 : index
    %2 = vector.load %arg2[%c0_2, %c0_3] : memref<32x256xbf16, #tpu.memory_space<vmem>>, vector<32x256xbf16>
    %cst = arith.constant dense<0.000000e+00> : vector<64x256xf32>
    %3 = tpu.matmul %1, %2, %cst {dimension_numbers = #tpu.dot_dimension_numbers<[1], [0], [0], [1], [0, 0, 1, 1], [], []>} : vector<64x32xbf16>, vector<32x256xbf16>, vector<64x256xf32> -> vector<64x256xf32>
    %cst_4 = arith.constant 0.000000e+00 : f32
    %4 = vector.broadcast %cst_4 : f32 to vector<64x256xf32>
    %5 = arith.cmpf ogt, %3, %4 : vector<64x256xf32>
    %cst_5 = arith.constant 0.285072178 : f32
    %6 = vector.broadcast %cst_5 : f32 to vector<64x256xf32>
    %7 = arith.mulf %3, %6 : vector<64x256xf32>
    %8 = arith.select %5, %3, %7 : vector<64x256xi1>, vector<64x256xf32>
    %9 = arith.truncf %8 : vector<64x256xf32> to vector<64x256xbf16>
    %c0_6 = arith.constant 0 : index
    %c0_7 = arith.constant 0 : index
    %c0_8 = arith.constant 0 : index
    %10 = vector.load %arg3[%c0_6, %c0_7, %c0_8] : memref<9x256x128xbf16, #tpu.memory_space<vmem>>, vector<1x256x128xbf16>
    %11 = vector.shape_cast %10 : vector<1x256x128xbf16> to vector<256x128xbf16>
    %cst_9 = arith.constant dense<0.000000e+00> : vector<64x128xf32>
    %12 = tpu.matmul %9, %11, %cst_9 {dimension_numbers = #tpu.dot_dimension_numbers<[1], [0], [0], [1], [0, 0, 1, 1], [], []>} : vector<64x256xbf16>, vector<256x128xbf16>, vector<64x128xf32> -> vector<64x128xf32>
    %c0_10 = arith.constant 0 : index
    %c64 = arith.constant 64 : index
    %c0_11 = arith.constant 0 : index
    %13 = vector.load %arg1[%c0_10, %c64, %c0_11] : memref<1x576x32xbf16, #tpu.memory_space<vmem>>, vector<1x64x32xbf16>
    %14 = vector.shape_cast %13 : vector<1x64x32xbf16> to vector<64x32xbf16>
    %c0_12 = arith.constant 0 : index
    %c0_13 = arith.constant 0 : index
    %15 = vector.load %arg2[%c0_12, %c0_13] : memref<32x256xbf16, #tpu.memory_space<vmem>>, vector<32x256xbf16>
    %cst_14 = arith.constant dense<0.000000e+00> : vector<64x256xf32>
    %16 = tpu.matmul %14, %15, %cst_14 {dimension_numbers = #tpu.dot_dimension_numbers<[1], [0], [0], [1], [0, 0, 1, 1], [], []>} : vector<64x32xbf16>, vector<32x256xbf16>, vector<64x256xf32> -> vector<64x256xf32>
    %cst_15 = arith.constant 0.000000e+00 : f32
    %17 = vector.broadcast %cst_15 : f32 to vector<64x256xf32>
    %18 = arith.cmpf ogt, %16, %17 : vector<64x256xf32>
    %cst_16 = arith.constant 0.285072178 : f32
    %19 = vector.broadcast %cst_16 : f32 to vector<64x256xf32>
    %20 = arith.mulf %16, %19 : vector<64x256xf32>
    %21 = arith.select %18, %16, %20 : vector<64x256xi1>, vector<64x256xf32>
    %22 = arith.truncf %21 : vector<64x256xf32> to vector<64x256xbf16>
    %c1 = arith.constant 1 : index
    %c0_17 = arith.constant 0 : index
    %c0_18 = arith.constant 0 : index
    %23 = vector.load %arg3[%c1, %c0_17, %c0_18] : memref<9x256x128xbf16, #tpu.memory_space<vmem>>, vector<1x256x128xbf16>
    %24 = vector.shape_cast %23 : vector<1x256x128xbf16> to vector<256x128xbf16>
    %cst_19 = arith.constant dense<0.000000e+00> : vector<64x128xf32>
    %25 = tpu.matmul %22, %24, %cst_19 {dimension_numbers = #tpu.dot_dimension_numbers<[1], [0], [0], [1], [0, 0, 1, 1], [], []>} : vector<64x256xbf16>, vector<256x128xbf16>, vector<64x128xf32> -> vector<64x128xf32>
    %26 = arith.addf %12, %25 : vector<64x128xf32>
    %c0_20 = arith.constant 0 : index
    %c128 = arith.constant 128 : index
    %c0_21 = arith.constant 0 : index
    %27 = vector.load %arg1[%c0_20, %c128, %c0_21] : memref<1x576x32xbf16, #tpu.memory_space<vmem>>, vector<1x64x32xbf16>
    %28 = vector.shape_cast %27 : vector<1x64x32xbf16> to vector<64x32xbf16>
    %c0_22 = arith.constant 0 : index
    %c0_23 = arith.constant 0 : index
    %29 = vector.load %arg2[%c0_22, %c0_23] : memref<32x256xbf16, #tpu.memory_space<vmem>>, vector<32x256xbf16>
    %cst_24 = arith.constant dense<0.000000e+00> : vector<64x256xf32>
    %30 = tpu.matmul %28, %29, %cst_24 {dimension_numbers = #tpu.dot_dimension_numbers<[1], [0], [0], [1], [0, 0, 1, 1], [], []>} : vector<64x32xbf16>, vector<32x256xbf16>, vector<64x256xf32> -> vector<64x256xf32>
    %cst_25 = arith.constant 0.000000e+00 : f32
    %31 = vector.broadcast %cst_25 : f32 to vector<64x256xf32>
    %32 = arith.cmpf ogt, %30, %31 : vector<64x256xf32>
    %cst_26 = arith.constant 0.285072178 : f32
    %33 = vector.broadcast %cst_26 : f32 to vector<64x256xf32>
    %34 = arith.mulf %30, %33 : vector<64x256xf32>
    %35 = arith.select %32, %30, %34 : vector<64x256xi1>, vector<64x256xf32>
    %36 = arith.truncf %35 : vector<64x256xf32> to vector<64x256xbf16>
    %c2 = arith.constant 2 : index
    %c0_27 = arith.constant 0 : index
    %c0_28 = arith.constant 0 : index
    %37 = vector.load %arg3[%c2, %c0_27, %c0_28] : memref<9x256x128xbf16, #tpu.memory_space<vmem>>, vector<1x256x128xbf16>
    %38 = vector.shape_cast %37 : vector<1x256x128xbf16> to vector<256x128xbf16>
    %cst_29 = arith.constant dense<0.000000e+00> : vector<64x128xf32>
    %39 = tpu.matmul %36, %38, %cst_29 {dimension_numbers = #tpu.dot_dimension_numbers<[1], [0], [0], [1], [0, 0, 1, 1], [], []>} : vector<64x256xbf16>, vector<256x128xbf16>, vector<64x128xf32> -> vector<64x128xf32>
    %40 = arith.addf %26, %39 : vector<64x128xf32>
    %c0_30 = arith.constant 0 : index
    %c192 = arith.constant 192 : index
    %c0_31 = arith.constant 0 : index
    %41 = vector.load %arg1[%c0_30, %c192, %c0_31] : memref<1x576x32xbf16, #tpu.memory_space<vmem>>, vector<1x64x32xbf16>
    %42 = vector.shape_cast %41 : vector<1x64x32xbf16> to vector<64x32xbf16>
    %c0_32 = arith.constant 0 : index
    %c0_33 = arith.constant 0 : index
    %43 = vector.load %arg2[%c0_32, %c0_33] : memref<32x256xbf16, #tpu.memory_space<vmem>>, vector<32x256xbf16>
    %cst_34 = arith.constant dense<0.000000e+00> : vector<64x256xf32>
    %44 = tpu.matmul %42, %43, %cst_34 {dimension_numbers = #tpu.dot_dimension_numbers<[1], [0], [0], [1], [0, 0, 1, 1], [], []>} : vector<64x32xbf16>, vector<32x256xbf16>, vector<64x256xf32> -> vector<64x256xf32>
    %cst_35 = arith.constant 0.000000e+00 : f32
    %45 = vector.broadcast %cst_35 : f32 to vector<64x256xf32>
    %46 = arith.cmpf ogt, %44, %45 : vector<64x256xf32>
    %cst_36 = arith.constant 0.285072178 : f32
    %47 = vector.broadcast %cst_36 : f32 to vector<64x256xf32>
    %48 = arith.mulf %44, %47 : vector<64x256xf32>
    %49 = arith.select %46, %44, %48 : vector<64x256xi1>, vector<64x256xf32>
    %50 = arith.truncf %49 : vector<64x256xf32> to vector<64x256xbf16>
    %c3 = arith.constant 3 : index
    %c0_37 = arith.constant 0 : index
    %c0_38 = arith.constant 0 : index
    %51 = vector.load %arg3[%c3, %c0_37, %c0_38] : memref<9x256x128xbf16, #tpu.memory_space<vmem>>, vector<1x256x128xbf16>
    %52 = vector.shape_cast %51 : vector<1x256x128xbf16> to vector<256x128xbf16>
    %cst_39 = arith.constant dense<0.000000e+00> : vector<64x128xf32>
    %53 = tpu.matmul %50, %52, %cst_39 {dimension_numbers = #tpu.dot_dimension_numbers<[1], [0], [0], [1], [0, 0, 1, 1], [], []>} : vector<64x256xbf16>, vector<256x128xbf16>, vector<64x128xf32> -> vector<64x128xf32>
    %54 = arith.addf %40, %53 : vector<64x128xf32>
    %c0_40 = arith.constant 0 : index
    %c256 = arith.constant 256 : index
    %c0_41 = arith.constant 0 : index
    %55 = vector.load %arg1[%c0_40, %c256, %c0_41] : memref<1x576x32xbf16, #tpu.memory_space<vmem>>, vector<1x64x32xbf16>
    %56 = vector.shape_cast %55 : vector<1x64x32xbf16> to vector<64x32xbf16>
    %c0_42 = arith.constant 0 : index
    %c0_43 = arith.constant 0 : index
    %57 = vector.load %arg2[%c0_42, %c0_43] : memref<32x256xbf16, #tpu.memory_space<vmem>>, vector<32x256xbf16>
    %cst_44 = arith.constant dense<0.000000e+00> : vector<64x256xf32>
    %58 = tpu.matmul %56, %57, %cst_44 {dimension_numbers = #tpu.dot_dimension_numbers<[1], [0], [0], [1], [0, 0, 1, 1], [], []>} : vector<64x32xbf16>, vector<32x256xbf16>, vector<64x256xf32> -> vector<64x256xf32>
    %cst_45 = arith.constant 0.000000e+00 : f32
    %59 = vector.broadcast %cst_45 : f32 to vector<64x256xf32>
    %60 = arith.cmpf ogt, %58, %59 : vector<64x256xf32>
    %cst_46 = arith.constant 0.285072178 : f32
    %61 = vector.broadcast %cst_46 : f32 to vector<64x256xf32>
    %62 = arith.mulf %58, %61 : vector<64x256xf32>
    %63 = arith.select %60, %58, %62 : vector<64x256xi1>, vector<64x256xf32>
    %64 = arith.truncf %63 : vector<64x256xf32> to vector<64x256xbf16>
    %c4 = arith.constant 4 : index
    %c0_47 = arith.constant 0 : index
    %c0_48 = arith.constant 0 : index
    %65 = vector.load %arg3[%c4, %c0_47, %c0_48] : memref<9x256x128xbf16, #tpu.memory_space<vmem>>, vector<1x256x128xbf16>
    %66 = vector.shape_cast %65 : vector<1x256x128xbf16> to vector<256x128xbf16>
    %cst_49 = arith.constant dense<0.000000e+00> : vector<64x128xf32>
    %67 = tpu.matmul %64, %66, %cst_49 {dimension_numbers = #tpu.dot_dimension_numbers<[1], [0], [0], [1], [0, 0, 1, 1], [], []>} : vector<64x256xbf16>, vector<256x128xbf16>, vector<64x128xf32> -> vector<64x128xf32>
    %68 = arith.addf %54, %67 : vector<64x128xf32>
    %c0_50 = arith.constant 0 : index
    %c320 = arith.constant 320 : index
    %c0_51 = arith.constant 0 : index
    %69 = vector.load %arg1[%c0_50, %c320, %c0_51] : memref<1x576x32xbf16, #tpu.memory_space<vmem>>, vector<1x64x32xbf16>
    %70 = vector.shape_cast %69 : vector<1x64x32xbf16> to vector<64x32xbf16>
    %c0_52 = arith.constant 0 : index
    %c0_53 = arith.constant 0 : index
    %71 = vector.load %arg2[%c0_52, %c0_53] : memref<32x256xbf16, #tpu.memory_space<vmem>>, vector<32x256xbf16>
    %cst_54 = arith.constant dense<0.000000e+00> : vector<64x256xf32>
    %72 = tpu.matmul %70, %71, %cst_54 {dimension_numbers = #tpu.dot_dimension_numbers<[1], [0], [0], [1], [0, 0, 1, 1], [], []>} : vector<64x32xbf16>, vector<32x256xbf16>, vector<64x256xf32> -> vector<64x256xf32>
    %cst_55 = arith.constant 0.000000e+00 : f32
    %73 = vector.broadcast %cst_55 : f32 to vector<64x256xf32>
    %74 = arith.cmpf ogt, %72, %73 : vector<64x256xf32>
    %cst_56 = arith.constant 0.285072178 : f32
    %75 = vector.broadcast %cst_56 : f32 to vector<64x256xf32>
    %76 = arith.mulf %72, %75 : vector<64x256xf32>
    %77 = arith.select %74, %72, %76 : vector<64x256xi1>, vector<64x256xf32>
    %78 = arith.truncf %77 : vector<64x256xf32> to vector<64x256xbf16>
    %c5 = arith.constant 5 : index
    %c0_57 = arith.constant 0 : index
    %c0_58 = arith.constant 0 : index
    %79 = vector.load %arg3[%c5, %c0_57, %c0_58] : memref<9x256x128xbf16, #tpu.memory_space<vmem>>, vector<1x256x128xbf16>
    %80 = vector.shape_cast %79 : vector<1x256x128xbf16> to vector<256x128xbf16>
    %cst_59 = arith.constant dense<0.000000e+00> : vector<64x128xf32>
    %81 = tpu.matmul %78, %80, %cst_59 {dimension_numbers = #tpu.dot_dimension_numbers<[1], [0], [0], [1], [0, 0, 1, 1], [], []>} : vector<64x256xbf16>, vector<256x128xbf16>, vector<64x128xf32> -> vector<64x128xf32>
    %82 = arith.addf %68, %81 : vector<64x128xf32>
    %c0_60 = arith.constant 0 : index
    %c384 = arith.constant 384 : index
    %c0_61 = arith.constant 0 : index
    %83 = vector.load %arg1[%c0_60, %c384, %c0_61] : memref<1x576x32xbf16, #tpu.memory_space<vmem>>, vector<1x64x32xbf16>
    %84 = vector.shape_cast %83 : vector<1x64x32xbf16> to vector<64x32xbf16>
    %c0_62 = arith.constant 0 : index
    %c0_63 = arith.constant 0 : index
    %85 = vector.load %arg2[%c0_62, %c0_63] : memref<32x256xbf16, #tpu.memory_space<vmem>>, vector<32x256xbf16>
    %cst_64 = arith.constant dense<0.000000e+00> : vector<64x256xf32>
    %86 = tpu.matmul %84, %85, %cst_64 {dimension_numbers = #tpu.dot_dimension_numbers<[1], [0], [0], [1], [0, 0, 1, 1], [], []>} : vector<64x32xbf16>, vector<32x256xbf16>, vector<64x256xf32> -> vector<64x256xf32>
    %cst_65 = arith.constant 0.000000e+00 : f32
    %87 = vector.broadcast %cst_65 : f32 to vector<64x256xf32>
    %88 = arith.cmpf ogt, %86, %87 : vector<64x256xf32>
    %cst_66 = arith.constant 0.285072178 : f32
    %89 = vector.broadcast %cst_66 : f32 to vector<64x256xf32>
    %90 = arith.mulf %86, %89 : vector<64x256xf32>
    %91 = arith.select %88, %86, %90 : vector<64x256xi1>, vector<64x256xf32>
    %92 = arith.truncf %91 : vector<64x256xf32> to vector<64x256xbf16>
    %c6 = arith.constant 6 : index
    %c0_67 = arith.constant 0 : index
    %c0_68 = arith.constant 0 : index
    %93 = vector.load %arg3[%c6, %c0_67, %c0_68] : memref<9x256x128xbf16, #tpu.memory_space<vmem>>, vector<1x256x128xbf16>
    %94 = vector.shape_cast %93 : vector<1x256x128xbf16> to vector<256x128xbf16>
    %cst_69 = arith.constant dense<0.000000e+00> : vector<64x128xf32>
    %95 = tpu.matmul %92, %94, %cst_69 {dimension_numbers = #tpu.dot_dimension_numbers<[1], [0], [0], [1], [0, 0, 1, 1], [], []>} : vector<64x256xbf16>, vector<256x128xbf16>, vector<64x128xf32> -> vector<64x128xf32>
    %96 = arith.addf %82, %95 : vector<64x128xf32>
    %c0_70 = arith.constant 0 : index
    %c448 = arith.constant 448 : index
    %c0_71 = arith.constant 0 : index
    %97 = vector.load %arg1[%c0_70, %c448, %c0_71] : memref<1x576x32xbf16, #tpu.memory_space<vmem>>, vector<1x64x32xbf16>
    %98 = vector.shape_cast %97 : vector<1x64x32xbf16> to vector<64x32xbf16>
    %c0_72 = arith.constant 0 : index
    %c0_73 = arith.constant 0 : index
    %99 = vector.load %arg2[%c0_72, %c0_73] : memref<32x256xbf16, #tpu.memory_space<vmem>>, vector<32x256xbf16>
    %cst_74 = arith.constant dense<0.000000e+00> : vector<64x256xf32>
    %100 = tpu.matmul %98, %99, %cst_74 {dimension_numbers = #tpu.dot_dimension_numbers<[1], [0], [0], [1], [0, 0, 1, 1], [], []>} : vector<64x32xbf16>, vector<32x256xbf16>, vector<64x256xf32> -> vector<64x256xf32>
    %cst_75 = arith.constant 0.000000e+00 : f32
    %101 = vector.broadcast %cst_75 : f32 to vector<64x256xf32>
    %102 = arith.cmpf ogt, %100, %101 : vector<64x256xf32>
    %cst_76 = arith.constant 0.285072178 : f32
    %103 = vector.broadcast %cst_76 : f32 to vector<64x256xf32>
    %104 = arith.mulf %100, %103 : vector<64x256xf32>
    %105 = arith.select %102, %100, %104 : vector<64x256xi1>, vector<64x256xf32>
    %106 = arith.truncf %105 : vector<64x256xf32> to vector<64x256xbf16>
    %c7 = arith.constant 7 : index
    %c0_77 = arith.constant 0 : index
    %c0_78 = arith.constant 0 : index
    %107 = vector.load %arg3[%c7, %c0_77, %c0_78] : memref<9x256x128xbf16, #tpu.memory_space<vmem>>, vector<1x256x128xbf16>
    %108 = vector.shape_cast %107 : vector<1x256x128xbf16> to vector<256x128xbf16>
    %cst_79 = arith.constant dense<0.000000e+00> : vector<64x128xf32>
    %109 = tpu.matmul %106, %108, %cst_79 {dimension_numbers = #tpu.dot_dimension_numbers<[1], [0], [0], [1], [0, 0, 1, 1], [], []>} : vector<64x256xbf16>, vector<256x128xbf16>, vector<64x128xf32> -> vector<64x128xf32>
    %110 = arith.addf %96, %109 : vector<64x128xf32>
    %c0_80 = arith.constant 0 : index
    %c512 = arith.constant 512 : index
    %c0_81 = arith.constant 0 : index
    %111 = vector.load %arg1[%c0_80, %c512, %c0_81] : memref<1x576x32xbf16, #tpu.memory_space<vmem>>, vector<1x64x32xbf16>
    %112 = vector.shape_cast %111 : vector<1x64x32xbf16> to vector<64x32xbf16>
    %c0_82 = arith.constant 0 : index
    %c0_83 = arith.constant 0 : index
    %113 = vector.load %arg2[%c0_82, %c0_83] : memref<32x256xbf16, #tpu.memory_space<vmem>>, vector<32x256xbf16>
    %cst_84 = arith.constant dense<0.000000e+00> : vector<64x256xf32>
    %114 = tpu.matmul %112, %113, %cst_84 {dimension_numbers = #tpu.dot_dimension_numbers<[1], [0], [0], [1], [0, 0, 1, 1], [], []>} : vector<64x32xbf16>, vector<32x256xbf16>, vector<64x256xf32> -> vector<64x256xf32>
    %cst_85 = arith.constant 0.000000e+00 : f32
    %115 = vector.broadcast %cst_85 : f32 to vector<64x256xf32>
    %116 = arith.cmpf ogt, %114, %115 : vector<64x256xf32>
    %cst_86 = arith.constant 0.285072178 : f32
    %117 = vector.broadcast %cst_86 : f32 to vector<64x256xf32>
    %118 = arith.mulf %114, %117 : vector<64x256xf32>
    %119 = arith.select %116, %114, %118 : vector<64x256xi1>, vector<64x256xf32>
    %120 = arith.truncf %119 : vector<64x256xf32> to vector<64x256xbf16>
    %c8 = arith.constant 8 : index
    %c0_87 = arith.constant 0 : index
    %c0_88 = arith.constant 0 : index
    %121 = vector.load %arg3[%c8, %c0_87, %c0_88] : memref<9x256x128xbf16, #tpu.memory_space<vmem>>, vector<1x256x128xbf16>
    %122 = vector.shape_cast %121 : vector<1x256x128xbf16> to vector<256x128xbf16>
    %cst_89 = arith.constant dense<0.000000e+00> : vector<64x128xf32>
    %123 = tpu.matmul %120, %122, %cst_89 {dimension_numbers = #tpu.dot_dimension_numbers<[1], [0], [0], [1], [0, 0, 1, 1], [], []>} : vector<64x256xbf16>, vector<256x128xbf16>, vector<64x128xf32> -> vector<64x128xf32>
    %124 = arith.addf %110, %123 : vector<64x128xf32>
    %c0_90 = arith.constant 0 : index
    %c0_91 = arith.constant 0 : index
    %125 = vector.load %arg4[%c0_90, %c0_91] : memref<1x128xf32, #tpu.memory_space<vmem>>, vector<1x128xf32>
    %126 = vector.broadcast %125 : vector<1x128xf32> to vector<64x128xf32>
    %127 = arith.addf %124, %126 : vector<64x128xf32>
    %cst_92 = arith.constant 0.000000e+00 : f32
    %128 = vector.broadcast %cst_92 : f32 to vector<64x128xf32>
    %129 = arith.cmpf ogt, %127, %128 : vector<64x128xf32>
    %cst_93 = arith.constant 0.285072178 : f32
    %130 = vector.broadcast %cst_93 : f32 to vector<64x128xf32>
    %131 = arith.mulf %127, %130 : vector<64x128xf32>
    %132 = arith.select %129, %127, %131 : vector<64x128xi1>, vector<64x128xf32>
    %cst_94 = arith.constant 0.000000e+00 : f32
    %133 = vector.broadcast %cst_94 : f32 to vector<10x16x128xf32>
    %c0_95 = arith.constant 0 : index
    %c0_96 = arith.constant 0 : index
    %c0_97 = arith.constant 0 : index
    %134 = vector.load %arg8[%c0_95, %c0_96, %c0_97] : memref<10x16x128xf32, #tpu.memory_space<vmem>>, vector<10x16x128xf32>
    tpu.vector_store %arg8[%c0_95, %c0_96, %c0_97], %133 {strides = array<i32>} : memref<10x16x128xf32, #tpu.memory_space<vmem>>, vector<10x16x128xf32>,
    %135 = vector.shape_cast %132 : vector<64x128xf32> to vector<8x8x128xf32>
    %c1_98 = arith.constant 1 : index
    %c1_99 = arith.constant 1 : index
    %c0_100 = arith.constant 0 : index
    %136 = vector.load %arg8[%c1_98, %c1_99, %c0_100] : memref<10x16x128xf32, #tpu.memory_space<vmem>>, vector<8x8x128xf32>
    tpu.vector_store %arg8[%c1_98, %c1_99, %c0_100], %135 {strides = array<i32>} : memref<10x16x128xf32, #tpu.memory_space<vmem>>, vector<8x8x128xf32>,
    %c0_101 = arith.constant 0 : index
    %c0_102 = arith.constant 0 : index
    %c0_103 = arith.constant 0 : index
    %137 = vector.load %arg8[%c0_101, %c0_102, %c0_103] : memref<10x16x128xf32, #tpu.memory_space<vmem>>, vector<8x8x128xf32>
    %138 = vector.shape_cast %137 : vector<8x8x128xf32> to vector<64x128xf32>
    %139 = arith.truncf %138 : vector<64x128xf32> to vector<64x128xbf16>
    %c0_104 = arith.constant 0 : index
    %c0_105 = arith.constant 0 : index
    %c0_106 = arith.constant 0 : index
    %140 = vector.load %arg5[%c0_104, %c0_105, %c0_106] : memref<9x128x128xbf16, #tpu.memory_space<vmem>>, vector<1x128x128xbf16>
    %141 = vector.shape_cast %140 : vector<1x128x128xbf16> to vector<128x128xbf16>
    %cst_107 = arith.constant dense<0.000000e+00> : vector<64x128xf32>
    %142 = tpu.matmul %139, %141, %cst_107 {dimension_numbers = #tpu.dot_dimension_numbers<[1], [0], [0], [1], [0, 0, 1, 1], [], []>} : vector<64x128xbf16>, vector<128x128xbf16>, vector<64x128xf32> -> vector<64x128xf32>
    %c0_108 = arith.constant 0 : index
    %c1_109 = arith.constant 1 : index
    %c0_110 = arith.constant 0 : index
    %143 = vector.load %arg8[%c0_108, %c1_109, %c0_110] : memref<10x16x128xf32, #tpu.memory_space<vmem>>, vector<8x8x128xf32>
    %144 = vector.shape_cast %143 : vector<8x8x128xf32> to vector<64x128xf32>
    %145 = arith.truncf %144 : vector<64x128xf32> to vector<64x128xbf16>
    %c1_111 = arith.constant 1 : index
    %c0_112 = arith.constant 0 : index
    %c0_113 = arith.constant 0 : index
    %146 = vector.load %arg5[%c1_111, %c0_112, %c0_113] : memref<9x128x128xbf16, #tpu.memory_space<vmem>>, vector<1x128x128xbf16>
    %147 = vector.shape_cast %146 : vector<1x128x128xbf16> to vector<128x128xbf16>
    %cst_114 = arith.constant dense<0.000000e+00> : vector<64x128xf32>
    %148 = tpu.matmul %145, %147, %cst_114 {dimension_numbers = #tpu.dot_dimension_numbers<[1], [0], [0], [1], [0, 0, 1, 1], [], []>} : vector<64x128xbf16>, vector<128x128xbf16>, vector<64x128xf32> -> vector<64x128xf32>
    %149 = arith.addf %142, %148 : vector<64x128xf32>
    %c0_115 = arith.constant 0 : index
    %c2_116 = arith.constant 2 : index
    %c0_117 = arith.constant 0 : index
    %150 = vector.load %arg8[%c0_115, %c2_116, %c0_117] : memref<10x16x128xf32, #tpu.memory_space<vmem>>, vector<8x8x128xf32>
    %151 = vector.shape_cast %150 : vector<8x8x128xf32> to vector<64x128xf32>
    %152 = arith.truncf %151 : vector<64x128xf32> to vector<64x128xbf16>
    %c2_118 = arith.constant 2 : index
    %c0_119 = arith.constant 0 : index
    %c0_120 = arith.constant 0 : index
    %153 = vector.load %arg5[%c2_118, %c0_119, %c0_120] : memref<9x128x128xbf16, #tpu.memory_space<vmem>>, vector<1x128x128xbf16>
    %154 = vector.shape_cast %153 : vector<1x128x128xbf16> to vector<128x128xbf16>
    %cst_121 = arith.constant dense<0.000000e+00> : vector<64x128xf32>
    %155 = tpu.matmul %152, %154, %cst_121 {dimension_numbers = #tpu.dot_dimension_numbers<[1], [0], [0], [1], [0, 0, 1, 1], [], []>} : vector<64x128xbf16>, vector<128x128xbf16>, vector<64x128xf32> -> vector<64x128xf32>
    %156 = arith.addf %149, %155 : vector<64x128xf32>
    %c1_122 = arith.constant 1 : index
    %c0_123 = arith.constant 0 : index
    %c0_124 = arith.constant 0 : index
    %157 = vector.load %arg8[%c1_122, %c0_123, %c0_124] : memref<10x16x128xf32, #tpu.memory_space<vmem>>, vector<8x8x128xf32>
    %158 = vector.shape_cast %157 : vector<8x8x128xf32> to vector<64x128xf32>
    %159 = arith.truncf %158 : vector<64x128xf32> to vector<64x128xbf16>
    %c3_125 = arith.constant 3 : index
    %c0_126 = arith.constant 0 : index
    %c0_127 = arith.constant 0 : index
    %160 = vector.load %arg5[%c3_125, %c0_126, %c0_127] : memref<9x128x128xbf16, #tpu.memory_space<vmem>>, vector<1x128x128xbf16>
    %161 = vector.shape_cast %160 : vector<1x128x128xbf16> to vector<128x128xbf16>
    %cst_128 = arith.constant dense<0.000000e+00> : vector<64x128xf32>
    %162 = tpu.matmul %159, %161, %cst_128 {dimension_numbers = #tpu.dot_dimension_numbers<[1], [0], [0], [1], [0, 0, 1, 1], [], []>} : vector<64x128xbf16>, vector<128x128xbf16>, vector<64x128xf32> -> vector<64x128xf32>
    %163 = arith.addf %156, %162 : vector<64x128xf32>
    %c1_129 = arith.constant 1 : index
    %c1_130 = arith.constant 1 : index
    %c0_131 = arith.constant 0 : index
    %164 = vector.load %arg8[%c1_129, %c1_130, %c0_131] : memref<10x16x128xf32, #tpu.memory_space<vmem>>, vector<8x8x128xf32>
    %165 = vector.shape_cast %164 : vector<8x8x128xf32> to vector<64x128xf32>
    %166 = arith.truncf %165 : vector<64x128xf32> to vector<64x128xbf16>
    %c4_132 = arith.constant 4 : index
    %c0_133 = arith.constant 0 : index
    %c0_134 = arith.constant 0 : index
    %167 = vector.load %arg5[%c4_132, %c0_133, %c0_134] : memref<9x128x128xbf16, #tpu.memory_space<vmem>>, vector<1x128x128xbf16>
    %168 = vector.shape_cast %167 : vector<1x128x128xbf16> to vector<128x128xbf16>
    %cst_135 = arith.constant dense<0.000000e+00> : vector<64x128xf32>
    %169 = tpu.matmul %166, %168, %cst_135 {dimension_numbers = #tpu.dot_dimension_numbers<[1], [0], [0], [1], [0, 0, 1, 1], [], []>} : vector<64x128xbf16>, vector<128x128xbf16>, vector<64x128xf32> -> vector<64x128xf32>
    %170 = arith.addf %163, %169 : vector<64x128xf32>
    %c1_136 = arith.constant 1 : index
    %c2_137 = arith.constant 2 : index
    %c0_138 = arith.constant 0 : index
    %171 = vector.load %arg8[%c1_136, %c2_137, %c0_138] : memref<10x16x128xf32, #tpu.memory_space<vmem>>, vector<8x8x128xf32>
    %172 = vector.shape_cast %171 : vector<8x8x128xf32> to vector<64x128xf32>
    %173 = arith.truncf %172 : vector<64x128xf32> to vector<64x128xbf16>
    %c5_139 = arith.constant 5 : index
    %c0_140 = arith.constant 0 : index
    %c0_141 = arith.constant 0 : index
    %174 = vector.load %arg5[%c5_139, %c0_140, %c0_141] : memref<9x128x128xbf16, #tpu.memory_space<vmem>>, vector<1x128x128xbf16>
    %175 = vector.shape_cast %174 : vector<1x128x128xbf16> to vector<128x128xbf16>
    %cst_142 = arith.constant dense<0.000000e+00> : vector<64x128xf32>
    %176 = tpu.matmul %173, %175, %cst_142 {dimension_numbers = #tpu.dot_dimension_numbers<[1], [0], [0], [1], [0, 0, 1, 1], [], []>} : vector<64x128xbf16>, vector<128x128xbf16>, vector<64x128xf32> -> vector<64x128xf32>
    %177 = arith.addf %170, %176 : vector<64x128xf32>
    %c2_143 = arith.constant 2 : index
    %c0_144 = arith.constant 0 : index
    %c0_145 = arith.constant 0 : index
    %178 = vector.load %arg8[%c2_143, %c0_144, %c0_145] : memref<10x16x128xf32, #tpu.memory_space<vmem>>, vector<8x8x128xf32>
    %179 = vector.shape_cast %178 : vector<8x8x128xf32> to vector<64x128xf32>
    %180 = arith.truncf %179 : vector<64x128xf32> to vector<64x128xbf16>
    %c6_146 = arith.constant 6 : index
    %c0_147 = arith.constant 0 : index
    %c0_148 = arith.constant 0 : index
    %181 = vector.load %arg5[%c6_146, %c0_147, %c0_148] : memref<9x128x128xbf16, #tpu.memory_space<vmem>>, vector<1x128x128xbf16>
    %182 = vector.shape_cast %181 : vector<1x128x128xbf16> to vector<128x128xbf16>
    %cst_149 = arith.constant dense<0.000000e+00> : vector<64x128xf32>
    %183 = tpu.matmul %180, %182, %cst_149 {dimension_numbers = #tpu.dot_dimension_numbers<[1], [0], [0], [1], [0, 0, 1, 1], [], []>} : vector<64x128xbf16>, vector<128x128xbf16>, vector<64x128xf32> -> vector<64x128xf32>
    %184 = arith.addf %177, %183 : vector<64x128xf32>
    %c2_150 = arith.constant 2 : index
    %c1_151 = arith.constant 1 : index
    %c0_152 = arith.constant 0 : index
    %185 = vector.load %arg8[%c2_150, %c1_151, %c0_152] : memref<10x16x128xf32, #tpu.memory_space<vmem>>, vector<8x8x128xf32>
    %186 = vector.shape_cast %185 : vector<8x8x128xf32> to vector<64x128xf32>
    %187 = arith.truncf %186 : vector<64x128xf32> to vector<64x128xbf16>
    %c7_153 = arith.constant 7 : index
    %c0_154 = arith.constant 0 : index
    %c0_155 = arith.constant 0 : index
    %188 = vector.load %arg5[%c7_153, %c0_154, %c0_155] : memref<9x128x128xbf16, #tpu.memory_space<vmem>>, vector<1x128x128xbf16>
    %189 = vector.shape_cast %188 : vector<1x128x128xbf16> to vector<128x128xbf16>
    %cst_156 = arith.constant dense<0.000000e+00> : vector<64x128xf32>
    %190 = tpu.matmul %187, %189, %cst_156 {dimension_numbers = #tpu.dot_dimension_numbers<[1], [0], [0], [1], [0, 0, 1, 1], [], []>} : vector<64x128xbf16>, vector<128x128xbf16>, vector<64x128xf32> -> vector<64x128xf32>
    %191 = arith.addf %184, %190 : vector<64x128xf32>
    %c2_157 = arith.constant 2 : index
    %c2_158 = arith.constant 2 : index
    %c0_159 = arith.constant 0 : index
    %192 = vector.load %arg8[%c2_157, %c2_158, %c0_159] : memref<10x16x128xf32, #tpu.memory_space<vmem>>, vector<8x8x128xf32>
    %193 = vector.shape_cast %192 : vector<8x8x128xf32> to vector<64x128xf32>
    %194 = arith.truncf %193 : vector<64x128xf32> to vector<64x128xbf16>
    %c8_160 = arith.constant 8 : index
    %c0_161 = arith.constant 0 : index
    %c0_162 = arith.constant 0 : index
    %195 = vector.load %arg5[%c8_160, %c0_161, %c0_162] : memref<9x128x128xbf16, #tpu.memory_space<vmem>>, vector<1x128x128xbf16>
    %196 = vector.shape_cast %195 : vector<1x128x128xbf16> to vector<128x128xbf16>
    %cst_163 = arith.constant dense<0.000000e+00> : vector<64x128xf32>
    %197 = tpu.matmul %194, %196, %cst_163 {dimension_numbers = #tpu.dot_dimension_numbers<[1], [0], [0], [1], [0, 0, 1, 1], [], []>} : vector<64x128xbf16>, vector<128x128xbf16>, vector<64x128xf32> -> vector<64x128xf32>
    %198 = arith.addf %191, %197 : vector<64x128xf32>
    %c0_164 = arith.constant 0 : index
    %c0_165 = arith.constant 0 : index
    %199 = vector.load %arg6[%c0_164, %c0_165] : memref<1x128xf32, #tpu.memory_space<vmem>>, vector<1x128xf32>
    %200 = vector.broadcast %199 : vector<1x128xf32> to vector<64x128xf32>
    %201 = arith.addf %198, %200 : vector<64x128xf32>
    %cst_166 = arith.constant 0.000000e+00 : f32
    %202 = vector.broadcast %cst_166 : f32 to vector<64x128xf32>
    %203 = arith.cmpf ogt, %201, %202 : vector<64x128xf32>
    %cst_167 = arith.constant 0.285072178 : f32
    %204 = vector.broadcast %cst_167 : f32 to vector<64x128xf32>
    %205 = arith.mulf %201, %204 : vector<64x128xf32>
    %206 = arith.select %203, %201, %205 : vector<64x128xi1>, vector<64x128xf32>
    %c0_168 = arith.constant 0 : index
    %c0_169 = arith.constant 0 : index
    %c0_170 = arith.constant 0 : index
    %207 = vector.load %arg7[%c0_168, %c0_169, %c0_170] : memref<1x64x128xf32, #tpu.memory_space<vmem>>, vector<1x64x128xf32>
    %208 = vector.shape_cast %207 : vector<1x64x128xf32> to vector<64x128xf32>
    %209 = vector.shape_cast %206 : vector<64x128xf32> to vector<1x64x128xf32>
    tpu.vector_store %arg7[%c0_168, %c0_169, %c0_170], %209 {strides = array<i32>} : memref<1x64x128xf32, #tpu.memory_space<vmem>>, vector<1x64x128xf32>,
    return
  }
  func.func @transform_0(%arg0: i32) -> (i32, i32, i32) {
    %c0_i32 = arith.constant 0 : i32
    %c0_i32_0 = arith.constant 0 : i32
    %c0_i32_1 = arith.constant 0 : i32
    return %arg0, %c0_i32, %c0_i32_0 : i32, i32, i32
  }
  func.func @transform_1(%arg0: i32) -> (i32, i32) {
    %c0_i32 = arith.constant 0 : i32
    %c0_i32_0 = arith.constant 0 : i32
    %c0_i32_1 = arith.constant 0 : i32
    return %c0_i32, %c0_i32_0 : i32, i32
  }
  func.func @transform_2(%arg0: i32) -> (i32, i32, i32) {
    %c0_i32 = arith.constant 0 : i32
    %c0_i32_0 = arith.constant 0 : i32
    %c0_i32_1 = arith.constant 0 : i32
    %c0_i32_2 = arith.constant 0 : i32
    return %c0_i32, %c0_i32_0, %c0_i32_1 : i32, i32, i32
  }
  func.func @transform_3(%arg0: i32) -> (i32, i32) {
    %c0_i32 = arith.constant 0 : i32
    %c0_i32_0 = arith.constant 0 : i32
    %c0_i32_1 = arith.constant 0 : i32
    return %c0_i32, %c0_i32_0 : i32, i32
  }
  func.func @transform_4(%arg0: i32) -> (i32, i32, i32) {
    %c0_i32 = arith.constant 0 : i32
    %c0_i32_0 = arith.constant 0 : i32
    %c0_i32_1 = arith.constant 0 : i32
    %c0_i32_2 = arith.constant 0 : i32
    return %c0_i32, %c0_i32_0, %c0_i32_1 : i32, i32, i32
  }
  func.func @transform_5(%arg0: i32) -> (i32, i32) {
    %c0_i32 = arith.constant 0 : i32
    %c0_i32_0 = arith.constant 0 : i32
    %c0_i32_1 = arith.constant 0 : i32
    return %c0_i32, %c0_i32_0 : i32, i32
  }
  func.func @transform_6(%arg0: i32) -> (i32, i32, i32) {
    %c0_i32 = arith.constant 0 : i32
    %c0_i32_0 = arith.constant 0 : i32
    %c0_i32_1 = arith.constant 0 : i32
    return %arg0, %c0_i32, %c0_i32_0 : i32, i32, i32
  }
}

</mosaic_0001>

<bundles_post_ra>
// kernel: conv_stack.1
= control target key start
LH: loop header
LB: loop body
LE: loop exit
PB: predicated region body
PF: predicated region fallthrough
CT: control target
= control target key end

     0   :  { %s6875_s21 = smov 0   ;;  %s8480_s0 = inlined_call_operand.vmem [shape: bf16[2,576,32], index: 0, kind: input, shape index: {}]   ;;  %s8481_s1 = inlined_call_operand.vmem [shape: bf16[32,256], index: 1, kind: input, shape index: {}]   ;;  %s8482_s2 = inlined_call_operand.vmem [shape: bf16[9,256,128], index: 2, kind: input, shape index: {}]   ;;  %s8483_s3 = inlined_call_operand.vmem [shape: f32[1,128], index: 3, kind: input, shape index: {}]   ;;  %s8484_s4 = inlined_call_operand.vmem [shape: bf16[9,128,128], index: 4, kind: input, shape index: {}]   ;;  %s8485_s5 = inlined_call_operand.vmem [shape: f32[1,128], index: 5, kind: input, shape index: {}]   ;;  %s8486_s6 = inlined_call_operand.vmem [shape: f32[2,64,128], index: 6, kind: output, shape index: {}]  }
   0x1 LB: > { %s5104_s22 = sadd.s32 4294967295, %s6836_s21   ;;  %p5108_p0 = scmp.ge.s32.totalorder %s6836_s21, 1  ;;  %s6836_s21 = sphi %s6875_s21, %s16_s21  }
   0x2   : > { %p212_p1 = scmp.lt.s32.totalorder %s6836_s21, 3 }
   0x4   : > { %p213_p2 = pnand %p5108_p0, %p212_p1 }
   0x6   : > { %216 = sbr.rel (%p213_p2) target bundleno = 1683 (0x693), region = 44 }
   0xd   : > { %v6568_v0 = vld [vmem:[%s8481_s1 + $0x4] ss:$8 sps:$4 sm:$0xff]   ;;  %p242_p3 = scmp.lt.s32.totalorder %s5104_s22, 1  ;;  %v6570_v1 = vld [vmem:[%s8481_s1] ss:$8 sps:$4 sm:$0xff]   ;;  %v6838_v2 = vmov 0  }
   0xe   : > { %350 = vmatprep.mubr.bf16.mxu1 %v6838_v2  ;;  %1817 = vmatprep.mubr.bf16.mxu0 %v6838_v2  ;;  %v6571_v3 = vld [vmem:[%s8481_s1 + $0x14] ss:$8 sps:$4 sm:$0xff]   ;;  %v6573_v4 = vld [vmem:[%s8481_s1 + $0x10] ss:$8 sps:$4 sm:$0xff]   ;;  %vm305_vm0 = vcmask 261120   ;;  %v6582_v13 = vld [vmem:[%s8482_s2 + $0xc0] sm:$0xff]  }
   0xf   : > { %318 = vmatprep.subr.bf16.mxu1 %v6568_v0  ;;  %s8599_s22 = smov (!%p242_p3, %s5104_s22), 1  ;;  %1785 = vmatprep.subr.bf16.mxu0 %v6568_v0  ;;  %v6583_v14 = vld [vmem:[%s8482_s2 + $0x80] sm:$0xff]   ;;  %v6584_v15 = vld [vmem:[%s8482_s2 + $0xc8] sm:$0xff]   ;;  %v6586_v17 = vld [vmem:[%s8482_s2 + $0xd0] sm:$0xff]  }
  0x10   : > { %319 = vmatpush1.bf16.msra.mxu1 %v6570_v1  ;;  %1786 = vmatpush1.bf16.msra.mxu0 %v6570_v1  ;;  %s6557_s7 = smul.u32 288, %s8599_s22  ;;  %v6585_v16 = vld [vmem:[%s8482_s2 + $0x88] sm:$0xff]   ;;  %v6587_v18 = vld [vmem:[%s8482_s2 + $0x90] sm:$0xff]   ;;  %v6588_v19 = vld [vmem:[%s8482_s2 + $0xd8] sm:$0xff]   ;;  %s5792_s19 = sshll.u32 %s8599_s22, 6 }
  0x11   : > { %320 = vmatprep.subr.bf16.mxu1 %v6571_v3  ;;  %1787 = vmatprep.subr.bf16.mxu0 %v6571_v3  ;;  %v6589_v20 = vld [vmem:[%s8482_s2 + $0x98] sm:$0xff]   ;;  %v6590_v21 = vld [vmem:[%s8482_s2 + $0xe0] sm:$0xff]   ;;  %v6592_v23 = vld [vmem:[%s8482_s2 + $0xe8] sm:$0xff]   ;;  %s8467_s24 = scalar_lea.vmem %s8486_s6, %s5792_s19 }
  0x12   : > { %s6903_s10 = scalar_lea.vmem %s8480_s0, %s6557_s7  ;;  %v6591_v22 = vld [vmem:[%s8482_s2 + $0xa0] sm:$0xff]   ;;  %v6593_v24 = vld [vmem:[%s8482_s2 + $0xa8] sm:$0xff]   ;;  %v6594_v25 = vld [vmem:[%s8482_s2 + $0xf0] sm:$0xff]  }
  0x13   : > { %v6574_v5 = vld [vmem:[%s6903_s10] sm:$0xff]   ;;  %v6575_v6 = vld [vmem:[%s6903_s10 + $0x8] sm:$0xff]   ;;  %v6576_v7 = vld [vmem:[%s6903_s10 + $0x10] sm:$0xff]  }
  0x14   : > { %321 = vmatpush1.bf16.msra.mxu1 %v6573_v4  ;;  %1788 = vmatpush1.bf16.msra.mxu0 %v6573_v4  ;;  %v6577_v8 = vld [vmem:[%s6903_s10 + $0x18] sm:$0xff]   ;;  %v6578_v9 = vld [vmem:[%s6903_s10 + $0x20] sm:$0xff]   ;;  %v6579_v10 = vld [vmem:[%s6903_s10 + $0x28] sm:$0xff]  }
  0x15   : > { %519 = vmatprep.subr.bf16.mxu1 %v6568_v0  ;;  %2156 = vmatprep.subr.bf16.mxu0 %v6568_v0  ;;  %v6580_v11 = vld [vmem:[%s6903_s10 + $0x30] sm:$0xff]   ;;  %v6581_v12 = vld [vmem:[%s6903_s10 + $0x38] sm:$0xff]   ;;  %v6598_v29 = vld [vmem:[%s8482_s2 + $0x40] sm:$0xff]  }
  0x16   : > { %v6595_v26 = vld [vmem:[%s8482_s2 + $0xb0] sm:$0xff]   ;;  %v6596_v27 = vld [vmem:[%s8482_s2 + $0xf8] sm:$0xff]  }
  0x17   : > { %5120 = vmatmul.mubr.msk.bf16.vlgmr.msra.gmra.mrb[0].mxu1 %vm305_vm0, %v6574_v5  ;;  %v6597_v28 = vld [vmem:[%s8482_s2 + $0xb8] sm:$0xff]  }
  0x18   : > { %520 = vmatpush1.bf16.msra.mxu1 %v6570_v1  ;;  %360 = vmatprep.mubr.bf16.mxu1 %v6838_v2 }
  0x19   : > { %521 = vmatprep.subr.bf16.mxu1 %v6571_v3 }
  0x1c   : > { %522 = vmatpush1.bf16.msra.mxu1 %v6573_v4 }
  0x1d   : > { %5793 = vmatprep.subr.bf16.mxu1 %v6582_v13 }
  0x1f   : > { %5121 = vmatmul.mubr.msk.bf16.gmra.mrb[4].mxu1 %vm305_vm0, %v6575_v6 }
  0x20   : > { %370 = vmatprep.mubr.bf16.mxu1 %v6838_v2 }
  0x27   : > { %5122 = vmatmul.mubr.msk.bf16.gmra.mrb[8].mxu1 %vm305_vm0, %v6576_v7 }
  0x28   : > { %380 = vmatprep.mubr.bf16.mxu1 %v6838_v2 }
  0x2f   : > { %5123 = vmatmul.mubr.msk.bf16.gmra.mrb[12].mxu1 %vm305_vm0, %v6577_v8 }
  0x30   : > { %551 = vmatprep.mubr.bf16.mxu1 %v6838_v2 }
  0x37   : > { %5128 = vmatmul.mubr.msk.bf16.vlgmr.msra.gmra.mrb[16].mxu1 %vm305_vm0, %v6578_v9 }
  0x38   : > { %561 = vmatprep.mubr.bf16.mxu1 %v6838_v2  ;;  %5794 = vmatpush3.bf16.msra.mxu1 %v6583_v14 }
  0x39   : > { %5795 = vmatprep.subr.bf16.mxu1 %v6584_v15 }
  0x3c   : > { %5796 = vmatpush3.bf16.msra.mxu1 %v6585_v16 }
  0x3d   : > { %5797 = vmatprep.subr.bf16.mxu1 %v6586_v17 }
  0x3f   : > { %5129 = vmatmul.mubr.msk.bf16.gmra.mrb[20].mxu1 %vm305_vm0, %v6579_v10 }
  0x40   : > { %571 = vmatprep.mubr.bf16.mxu1 %v6838_v2  ;;  %5798 = vmatpush3.bf16.msra.mxu1 %v6587_v18 }
  0x41   : > { %5799 = vmatprep.subr.bf16.mxu1 %v6588_v19 }
  0x44   : > { %5800 = vmatpush3.bf16.msra.mxu1 %v6589_v20 }
  0x45   : > { %5801 = vmatprep.subr.bf16.mxu1 %v6590_v21 }
  0x47   : > { %5130 = vmatmul.mubr.msk.bf16.gmra.mrb[24].mxu1 %vm305_vm0, %v6580_v11 }
  0x48   : > { %581 = vmatprep.mubr.bf16.mxu1 %v6838_v2  ;;  %5802 = vmatpush3.bf16.msra.mxu1 %v6591_v22 }
  0x49   : > { %5803 = vmatprep.subr.bf16.mxu1 %v6592_v23 }
  0x4c   : > { %5804 = vmatpush3.bf16.msra.mxu1 %v6593_v24 }
  0x4d   : > { %5805 = vmatprep.subr.bf16.mxu1 %v6594_v25 }
  0x4f   : > { %5131 = vmatmul.mubr.msk.bf16.gmra.mrb[28].mxu1 %vm305_vm0, %v6581_v12 }
  0x50   : > { %5806 = vmatpush3.bf16.msra.mxu1 %v6595_v26 }
  0x51   : > { %5807 = vmatprep.subr.bf16.mxu1 %v6596_v27 }
  0x54   : > { %5808 = vmatpush3.bf16.msra.mxu1 %v6597_v28 }
  0x55   : > { %5833 = vmatprep.subr.bf16.mxu1 %v6598_v29 }
  0xea   : > { %v352_v30 = vpop.f32.mrb[0].mxu1 }
  0xeb   : > { %v407_v31 = vmul.f32 0.28507218, %v352_v30  ;;  %v354_v32 = vpop.f32.mrb[1].mxu1  ;;  %vm391_vm1 = vcmp.gt.f32.partialorder %v352_v30, 0.0 }
  0xec   : > { %v408_v33 = vmul.f32 0.28507218, %v354_v32  ;;  %v356_v34 = vpop.f32.mrb[2].mxu1  ;;  %vm392_vm2 = vcmp.gt.f32.partialorder %v354_v32, 0.0 }
  0xed   : > { %vm393_vm3 = vcmp.gt.f32.partialorder %v356_v34, 0.0  ;;  %v409_v35 = vmul.f32 0.28507218, %v356_v34  ;;  %v358_v36 = vpop.f32.mrb[3].mxu1  ;;  %v6979_v38 = vsel %vm391_vm1, %v352_v30, %v407_v31 }
  0xee   : > { %vm394_vm4 = vcmp.gt.f32.partialorder %v358_v36, 0.0  ;;  %v410_v37 = vmul.f32 0.28507218, %v358_v36  ;;  %v6983_v40 = vsel %vm392_vm2, %v354_v32, %v408_v33 }
  0xef   : > { %v6981_v39 = vsel %vm393_vm3, %v356_v34, %v409_v35 }
  0xf0   : > { %v439_v41 = vpack.c.bf16 %v6981_v39, %v6979_v38  ;;  %v6987_v42 = vsel %vm394_vm4, %v358_v36, %v410_v37  ;;  %v6599_v37 = vld [vmem:[%s8482_s2] sm:$0xff]   ;;  %v7102_v38 = vld [vmem:[%s8481_s1 + $0x10] ss:$8 sps:$4 sm:$0xff]  }
  0xf1   : > { %v440_v43 = vpack.c.bf16 %v6987_v42, %v6983_v40  ;;  %v7090_v40 = vld [vmem:[%s8481_s1] ss:$8 sps:$4 sm:$0xff]   ;;  %v7096_v42 = vld [vmem:[%s8481_s1 + $0x14] ss:$8 sps:$4 sm:$0xff]  }
  0xf2   : > { %v362_v44 = vpop.f32.mrb[4].mxu1  ;;  %v6614_v39 = vld [vmem:[%s6903_s10 + $0x40] sm:$0xff]  }
  0xf3   : > { %v411_v45 = vmul.f32 0.28507218, %v362_v44  ;;  %v364_v46 = vpop.f32.mrb[5].mxu1  ;;  %vm395_vm5 = vcmp.gt.f32.partialorder %v362_v44, 0.0 }
  0xf4   : > { %v412_v47 = vmul.f32 0.28507218, %v364_v46  ;;  %v366_v48 = vpop.f32.mrb[6].mxu1  ;;  %vm396_vm6 = vcmp.gt.f32.partialorder %v364_v46, 0.0 }
  0xf5   : > { %vm397_vm7 = vcmp.gt.f32.partialorder %v366_v48, 0.0  ;;  %v413_v49 = vmul.f32 0.28507218, %v366_v48  ;;  %v368_v50 = vpop.f32.mrb[7].mxu1  ;;  %v6991_v52 = vsel %vm395_vm5, %v362_v44, %v411_v45  ;;  %v6600_v45 = vld [vmem:[%s8482_s2 + $0x48] sm:$0xff]  }
  0xf6   : > { %vm398_vm8 = vcmp.gt.f32.partialorder %v368_v50, 0.0  ;;  %v414_v51 = vmul.f32 0.28507218, %v368_v50  ;;  %v6995_v54 = vsel %vm396_vm6, %v364_v46, %v412_v47 }
  0xf7   : > { %v6993_v53 = vsel %vm397_vm7, %v366_v48, %v413_v49 }
  0xf8   : > { %v6997_v55 = vsel %vm398_vm8, %v368_v50, %v414_v51  ;;  %v441_v56 = vpack.c.bf16 %v6993_v53, %v6991_v52  ;;  %v6617_v52 = vld [vmem:[%s6903_s10 + $0x58] sm:$0xff]   ;;  %v6618_v53 = vld [vmem:[%s8482_s2 + $0x140] sm:$0xff]  }
  0xf9   : > { %v442_v57 = vpack.c.bf16 %v6997_v55, %v6995_v54  ;;  %v6619_v54 = vld [vmem:[%s8482_s2 + $0x100] sm:$0xff]   ;;  %v6620_v55 = vld [vmem:[%s8482_s2 + $0x148] sm:$0xff]  }
  0xfa   : > { %v372_v58 = vpop.f32.mrb[8].mxu1 }
  0xfb   : > { %v415_v59 = vmul.f32 0.28507218, %v372_v58  ;;  %v374_v60 = vpop.f32.mrb[9].mxu1  ;;  %vm399_vm9 = vcmp.gt.f32.partialorder %v372_v58, 0.0 }
  0xfc   : > { %v416_v61 = vmul.f32 0.28507218, %v374_v60  ;;  %v376_v62 = vpop.f32.mrb[10].mxu1  ;;  %vm400_vm10 = vcmp.gt.f32.partialorder %v374_v60, 0.0 }
  0xfd   : > { %vm401_vm11 = vcmp.gt.f32.partialorder %v376_v62, 0.0  ;;  %v417_v63 = vmul.f32 0.28507218, %v376_v62  ;;  %v378_v0 = vpop.f32.mrb[11].mxu1  ;;  %v7003_v3 = vsel %vm399_vm9, %v372_v58, %v415_v59  ;;  %v6601_v58 = vld [vmem:[%s8482_s2 + $0x8] sm:$0xff]  }
  0xfe   : > { %vm402_vm12 = vcmp.gt.f32.partialorder %v378_v0, 0.0  ;;  %v418_v1 = vmul.f32 0.28507218, %v378_v0  ;;  %v7007_v5 = vsel %vm400_vm10, %v374_v60, %v416_v61  ;;  %v6602_v60 = vld [vmem:[%s8482_s2 + $0x50] sm:$0xff]  }
  0xff   : > { %v7005_v4 = vsel %vm401_vm11, %v376_v62, %v417_v63 }
 0x100   : > { %v7009_v6 = vsel %vm402_vm12, %v378_v0, %v418_v1  ;;  %v443_v7 = vpack.c.bf16 %v7005_v4, %v7003_v3  ;;  %v6623_v3 = vld [vmem:[%s8482_s2 + $0x110] sm:$0xff]   ;;  %v6624_v4 = vld [vmem:[%s8482_s2 + $0x158] sm:$0xff]  }
 0x101   : > { %v444_v8 = vpack.c.bf16 %v7009_v6, %v7007_v5  ;;  %v6625_v5 = vld [vmem:[%s8482_s2 + $0x118] sm:$0xff]   ;;  %v6626_v6 = vld [vmem:[%s8482_s2 + $0x160] sm:$0xff]  }
 0x102   : > { %v382_v9 = vpop.f32.mrb[12].mxu1 }
 0x103   : > { %v419_v10 = vmul.f32 0.28507218, %v382_v9  ;;  %v384_v11 = vpop.f32.mrb[13].mxu1  ;;  %vm403_vm13 = vcmp.gt.f32.partialorder %v382_v9, 0.0 }
 0x104   : > { %v420_v12 = vmul.f32 0.28507218, %v384_v11  ;;  %v386_v13 = vpop.f32.mrb[14].mxu1  ;;  %vm404_vm14 = vcmp.gt.f32.partialorder %v384_v11, 0.0 }
 0x105   : > { %vm405_vm15 = vcmp.gt.f32.partialorder %v386_v13, 0.0  ;;  %v421_v14 = vmul.f32 0.28507218, %v386_v13  ;;  %v388_v15 = vpop.f32.mrb[15].mxu1  ;;  %v7015_v17 = vsel %vm403_vm13, %v382_v9, %v419_v10  ;;  %v6603_v10 = vld [vmem:[%s8482_s2 + $0x10] sm:$0xff]  }
 0x106   : > { %vm406_vm1 = vcmp.gt.f32.partialorder %v388_v15, 0.0  ;;  %v422_v16 = vmul.f32 0.28507218, %v388_v15  ;;  %v7019_v19 = vsel %vm404_vm14, %v384_v11, %v420_v12  ;;  %v6604_v12 = vld [vmem:[%s8482_s2 + $0x58] sm:$0xff]  }
 0x107   : > { %v7017_v18 = vsel %vm405_vm15, %v386_v13, %v421_v14 }
 0x108   : > { %v7021_v20 = vsel %vm406_vm1, %v388_v15, %v422_v16  ;;  %v445_v21 = vpack.c.bf16 %v7017_v18, %v7015_v17  ;;  %v6629_v17 = vld [vmem:[%s8482_s2 + $0x128] sm:$0xff]   ;;  %v6630_v18 = vld [vmem:[%s8482_s2 + $0x170] sm:$0xff]  }
 0x109   : > { %v446_v22 = vpack.c.bf16 %v7021_v20, %v7019_v19  ;;  %v6631_v19 = vld [vmem:[%s8482_s2 + $0x130] sm:$0xff]   ;;  %v6632_v20 = vld [vmem:[%s8482_s2 + $0x178] sm:$0xff]  }
 0x10a   : > { %v553_v23 = vpop.f32.mrb[16].mxu1 }
 0x10b   : > { %v608_v24 = vmul.f32 0.28507218, %v553_v23  ;;  %v555_v25 = vpop.f32.mrb[17].mxu1  ;;  %vm592_vm2 = vcmp.gt.f32.partialorder %v553_v23, 0.0 }
 0x10c   : > { %v609_v26 = vmul.f32 0.28507218, %v555_v25  ;;  %v557_v27 = vpop.f32.mrb[18].mxu1  ;;  %vm593_vm3 = vcmp.gt.f32.partialorder %v555_v25, 0.0 }
 0x10d   : > { %vm594_vm4 = vcmp.gt.f32.partialorder %v557_v27, 0.0  ;;  %v610_v28 = vmul.f32 0.28507218, %v557_v27  ;;  %v559_v29 = vpop.f32.mrb[19].mxu1  ;;  %v624_v31 = vsel %vm592_vm2, %v553_v23, %v608_v24 }
 0x10e   : > { %vm595_vm5 = vcmp.gt.f32.partialorder %v559_v29, 0.0  ;;  %v611_v30 = vmul.f32 0.28507218, %v559_v29  ;;  %v625_v33 = vsel %vm593_vm3, %v555_v25, %v609_v26  ;;  %v6605_v25 = vld [vmem:[%s8482_s2 + $0x18] sm:$0xff]  }
 0x10f   : > { %v626_v32 = vsel %vm594_vm4, %v557_v27, %v610_v28  ;;  %v6606_v27 = vld [vmem:[%s8482_s2 + $0x60] sm:$0xff]  }
 0x110   : > { %v640_v34 = vpack.c.bf16 %v626_v32, %v624_v31  ;;  %v627_v35 = vsel %vm595_vm5, %v559_v29, %v611_v30 }
 0x111   : > { %v641_v36 = vpack.c.bf16 %v627_v35, %v625_v33 }
 0x112   : > { %v563_v44 = vpop.f32.mrb[20].mxu1 }
 0x113   : > { %v612_v46 = vmul.f32 0.28507218, %v563_v44  ;;  %v565_v47 = vpop.f32.mrb[21].mxu1  ;;  %809 = vmatprep.mubr.bf16.mxu1 %v641_v36  ;;  %vm596_vm6 = vcmp.gt.f32.partialorder %v563_v44, 0.0  ;;  %v6608_v36 = vld [vmem:[%s8482_s2 + $0x68] sm:$0xff]  }
 0x114   : > { %v613_v48 = vmul.f32 0.28507218, %v565_v47  ;;  %v567_v49 = vpop.f32.mrb[22].mxu1  ;;  %810 = vmatmul.mubr.bf16.vlgmr.msra.gmra.mrb[32].mxu1 %v640_v34  ;;  %vm597_vm7 = vcmp.gt.f32.partialorder %v565_v47, 0.0  ;;  %v6607_v34 = vld [vmem:[%s8482_s2 + $0x20] sm:$0xff]  }
 0x115   : > { %vm598_vm8 = vcmp.gt.f32.partialorder %v567_v49, 0.0  ;;  %v614_v50 = vmul.f32 0.28507218, %v567_v49  ;;  %v569_v51 = vpop.f32.mrb[23].mxu1  ;;  %5834 = vmatpush3.bf16.msra.mxu1 %v6599_v37  ;;  %v628_v61 = vsel %vm596_vm6, %v563_v44, %v612_v46 }
 0x116   : > { %vm599_vm9 = vcmp.gt.f32.partialorder %v569_v51, 0.0  ;;  %v615_v59 = vmul.f32 0.28507218, %v569_v51  ;;  %5835 = vmatprep.subr.bf16.mxu1 %v6600_v45  ;;  %v629_v63 = vsel %vm597_vm7, %v565_v47, %v613_v48 }
 0x117   : > { %v630_v62 = vsel %vm598_vm8, %v567_v49, %v614_v50  ;;  %v6609_v49 = vld [vmem:[%s8482_s2 + $0x28] sm:$0xff]  }
 0x118   : > { %v631_v0 = vsel %vm599_vm9, %v569_v51, %v615_v59  ;;  %v642_v1 = vpack.c.bf16 %v630_v62, %v628_v61  ;;  %v6610_v51 = vld [vmem:[%s8482_s2 + $0x70] sm:$0xff]  }
 0x119   : > { %5836 = vmatpush3.bf16.msra.mxu1 %v6601_v58  ;;  %v643_v9 = vpack.c.bf16 %v631_v0, %v629_v63  ;;  %v6611_v0 = vld [vmem:[%s8482_s2 + $0x30] sm:$0xff]  }
 0x11a   : > { %v573_v11 = vpop.f32.mrb[24].mxu1  ;;  %5837 = vmatprep.subr.bf16.mxu1 %v6602_v60 }
 0x11b   : > { %v616_v13 = vmul.f32 0.28507218, %v573_v11  ;;  %v575_v14 = vpop.f32.mrb[25].mxu1  ;;  %817 = vmatprep.mubr.bf16.mxu1 %v643_v9  ;;  %vm600_vm10 = vcmp.gt.f32.partialorder %v573_v11, 0.0  ;;  %v6613_v9 = vld [vmem:[%s8482_s2 + $0x38] sm:$0xff]  }
 0x11c   : > { %v617_v15 = vmul.f32 0.28507218, %v575_v14  ;;  %v577_v16 = vpop.f32.mrb[26].mxu1  ;;  %818 = vmatmul.mubr.bf16.gmra.mrb[36].mxu1 %v642_v1  ;;  %vm601_vm11 = vcmp.gt.f32.partialorder %v575_v14, 0.0  ;;  %v6612_v1 = vld [vmem:[%s8482_s2 + $0x78] sm:$0xff]  }
 0x11d   : > { %vm602_vm12 = vcmp.gt.f32.partialorder %v577_v16, 0.0  ;;  %v618_v23 = vmul.f32 0.28507218, %v577_v16  ;;  %v579_v24 = vpop.f32.mrb[27].mxu1  ;;  %5838 = vmatpush3.bf16.msra.mxu1 %v6603_v10  ;;  %v632_v28 = vsel %vm600_vm10, %v573_v11, %v616_v13  ;;  %v7078_v10 = vld [vmem:[%s8481_s1 + $0x4] ss:$8 sps:$4 sm:$0xff]  }
 0x11e   : > { %vm603_vm13 = vcmp.gt.f32.partialorder %v579_v24, 0.0  ;;  %v619_v26 = vmul.f32 0.28507218, %v579_v24  ;;  %5839 = vmatprep.subr.bf16.mxu1 %v6604_v12  ;;  %v633_v30 = vsel %vm601_vm11, %v575_v14, %v617_v15  ;;  %v6638_v14 = vld [vmem:[%s6903_s10 + $0x80] sm:$0xff]  }
 0x11f   : > { %v634_v29 = vsel %vm602_vm12, %v577_v16, %v618_v23  ;;  %5312 = vmatmul.mubr.msk.bf16.vlgmr.msra.gmra.mrb[0].mxu0 %vm305_vm0, %v6638_v14 }
 0x120   : > { %v635_v31 = vsel %vm603_vm13, %v579_v24, %v619_v26  ;;  %v644_v32 = vpack.c.bf16 %v634_v29, %v632_v28  ;;  %2157 = vmatpush1.bf16.msra.mxu0 %v7090_v40  ;;  %1827 = vmatprep.mubr.bf16.mxu0 %v6838_v2  ;;  %v6639_v24 = vld [vmem:[%s6903_s10 + $0x88] sm:$0xff]  }
 0x121   : > { %5840 = vmatpush3.bf16.msra.mxu1 %v6605_v25  ;;  %v645_v33 = vpack.c.bf16 %v635_v31, %v633_v30  ;;  %2158 = vmatprep.subr.bf16.mxu0 %v7096_v42  ;;  %v6640_v31 = vld [vmem:[%s6903_s10 + $0x90] sm:$0xff]  }
 0x122   : > { %v583_v35 = vpop.f32.mrb[28].mxu1  ;;  %5841 = vmatprep.subr.bf16.mxu1 %v6606_v27 }
 0x123   : > { %v620_v37 = vmul.f32 0.28507218, %v583_v35  ;;  %v585_v44 = vpop.f32.mrb[29].mxu1  ;;  %825 = vmatprep.mubr.bf16.mxu1 %v645_v33  ;;  %vm604_vm14 = vcmp.gt.f32.partialorder %v583_v35, 0.0 }
 0x124   : > { %v621_v45 = vmul.f32 0.28507218, %v585_v44  ;;  %v587_v46 = vpop.f32.mrb[30].mxu1  ;;  %826 = vmatmul.mubr.bf16.gmra.mrb[40].mxu1 %v644_v32  ;;  %vm605_vm15 = vcmp.gt.f32.partialorder %v585_v44, 0.0  ;;  %2159 = vmatpush1.bf16.msra.mxu0 %v7102_v38 }
 0x125   : > { %vm606_vm1 = vcmp.gt.f32.partialorder %v587_v46, 0.0  ;;  %v622_v47 = vmul.f32 0.28507218, %v587_v46  ;;  %v589_v48 = vpop.f32.mrb[31].mxu1  ;;  %5842 = vmatpush3.bf16.msra.mxu1 %v6607_v34  ;;  %v636_v58 = vsel %vm604_vm14, %v583_v35, %v620_v37  ;;  %2527 = vmatprep.subr.bf16.mxu0 %v7078_v10 }
 0x126   : > { %vm607_vm2 = vcmp.gt.f32.partialorder %v589_v48, 0.0  ;;  %v623_v50 = vmul.f32 0.28507218, %v589_v48  ;;  %5843 = vmatprep.subr.bf16.mxu1 %v6608_v36  ;;  %v637_v60 = vsel %vm605_vm15, %v585_v44, %v621_v45  ;;  %v6641_v44 = vld [vmem:[%s6903_s10 + $0x98] sm:$0xff]  }
 0x127   : > { %v638_v59 = vsel %vm606_vm1, %v587_v46, %v622_v47  ;;  %5313 = vmatmul.mubr.msk.bf16.gmra.mrb[4].mxu0 %vm305_vm0, %v6639_v24 }
 0x128   : > { %v639_v61 = vsel %vm607_vm2, %v589_v48, %v623_v50  ;;  %v646_v62 = vpack.c.bf16 %v638_v59, %v636_v58  ;;  %1837 = vmatprep.mubr.bf16.mxu0 %v6838_v2 }
 0x129   : > { %5844 = vmatpush3.bf16.msra.mxu1 %v6609_v49  ;;  %v647_v63 = vpack.c.bf16 %v639_v61, %v637_v60 }
 0x12a   : > { %5845 = vmatprep.subr.bf16.mxu1 %v6610_v51  ;;  %v6642_v51 = vld [vmem:[%s6903_s10 + $0xa0] sm:$0xff]  }
 0x12b   : > { %833 = vmatprep.mubr.bf16.mxu1 %v647_v63 }
 0x12c   : > { %834 = vmatmul.mubr.bf16.gmra.mrb[44].mxu1 %v646_v62 }
 0x12d   : > { %5846 = vmatpush3.bf16.msra.mxu1 %v6611_v0  ;;  %970 = vmatprep.mubr.bf16.mxu1 %v440_v43  ;;  %v6616_v43 = vld [vmem:[%s6903_s10 + $0x50] sm:$0xff]  }
 0x12e   : > { %5847 = vmatprep.subr.bf16.mxu1 %v6612_v1 }
 0x12f   : > { %5314 = vmatmul.mubr.msk.bf16.gmra.mrb[8].mxu0 %vm305_vm0, %v6640_v31 }
 0x130   : > { %1847 = vmatprep.mubr.bf16.mxu0 %v6838_v2 }
 0x131   : > { %5848 = vmatpush3.bf16.msra.mxu1 %v6613_v9  ;;  %v6643_v9 = vld [vmem:[%s6903_s10 + $0xa8] sm:$0xff]  }
 0x132   : > { %1043 = vmatprep.subr.bf16.mxu1 %v7078_v10 }
 0x134   : > { %971 = vmatmul.mubr.bf16.vlgmr.msra.gmra.mrb[48].mxu1 %v439_v41  ;;  %v6615_v41 = vld [vmem:[%s6903_s10 + $0x48] sm:$0xff]  }
 0x135   : > { %978 = vmatprep.mubr.bf16.mxu1 %v442_v57  ;;  %1044 = vmatpush1.bf16.msra.mxu1 %v7090_v40  ;;  %v6622_v57 = vld [vmem:[%s8482_s2 + $0x150] sm:$0xff]  }
 0x136   : > { %1045 = vmatprep.subr.bf16.mxu1 %v7096_v42 }
 0x137   : > { %5315 = vmatmul.mubr.msk.bf16.gmra.mrb[12].mxu0 %vm305_vm0, %v6641_v44 }
 0x138   : > { %2188 = vmatprep.mubr.bf16.mxu0 %v6838_v2 }
 0x139   : > { %1046 = vmatpush1.bf16.msra.mxu1 %v7102_v38 }
 0x13a   : > { %5873 = vmatprep.subr.bf16.mxu1 %v6618_v53 }
 0x13c   : > { %979 = vmatmul.mubr.bf16.gmra.mrb[52].mxu1 %v441_v56  ;;  %v6621_v56 = vld [vmem:[%s8482_s2 + $0x108] sm:$0xff]  }
 0x13d   : > { %986 = vmatprep.mubr.bf16.mxu1 %v444_v8  ;;  %v6628_v8 = vld [vmem:[%s8482_s2 + $0x168] sm:$0xff]  }
 0x13f   : > { %5368 = vmatmul.mubr.msk.bf16.vlgmr.msra.gmra.mrb[16].mxu0 %vm305_vm0, %v6642_v51 }
 0x140   : > { %2528 = vmatpush1.bf16.msra.mxu0 %v7090_v40  ;;  %2198 = vmatprep.mubr.bf16.mxu0 %v6838_v2 }
 0x141   : > { %2529 = vmatprep.subr.bf16.mxu0 %v7096_v42 }
 0x144   : > { %987 = vmatmul.mubr.bf16.gmra.mrb[56].mxu1 %v443_v7  ;;  %v6627_v7 = vld [vmem:[%s8482_s2 + $0x120] sm:$0xff]   ;;  %2530 = vmatpush1.bf16.msra.mxu0 %v7102_v38 }
 0x145   : > { %994 = vmatprep.mubr.bf16.mxu1 %v446_v22  ;;  %2898 = vmatprep.subr.bf16.mxu0 %v7078_v10 }
 0x147   : > { %5369 = vmatmul.mubr.msk.bf16.gmra.mrb[20].mxu0 %vm305_vm0, %v6643_v9 }
 0x148   : > { %2208 = vmatprep.mubr.bf16.mxu0 %v6838_v2 }
 0x14c   : > { %995 = vmatmul.mubr.bf16.gmra.mrb[60].mxu1 %v445_v21  ;;  %v6633_v21 = vld [vmem:[%s8482_s2 + $0x138] sm:$0xff]  }
 0x14d   : > { %1075 = vmatprep.mubr.bf16.mxu1 %v6838_v2 }
 0x154   : > { %5200 = vmatmul.mubr.msk.bf16.vlgmr.msra.gmra.mrb[64].mxu1 %vm305_vm0, %v6614_v39 }
 0x155   : > { %1085 = vmatprep.mubr.bf16.mxu1 %v6838_v2  ;;  %5874 = vmatpush3.bf16.msra.mxu1 %v6619_v54 }
 0x156   : > { %5875 = vmatprep.subr.bf16.mxu1 %v6620_v55 }
 0x159   : > { %5876 = vmatpush3.bf16.msra.mxu1 %v6621_v56 }
 0x15a   : > { %5877 = vmatprep.subr.bf16.mxu1 %v6622_v57  ;;  %v6644_v57 = vld [vmem:[%s6903_s10 + $0xb0] sm:$0xff]  }
 0x15b   : > { %5370 = vmatmul.mubr.msk.bf16.gmra.mrb[24].mxu0 %vm305_vm0, %v6644_v57 }
 0x15c   : > { %5201 = vmatmul.mubr.msk.bf16.gmra.mrb[68].mxu1 %vm305_vm0, %v6615_v41  ;;  %2218 = vmatprep.mubr.bf16.mxu0 %v6838_v2 }
 0x15d   : > { %1095 = vmatprep.mubr.bf16.mxu1 %v6838_v2  ;;  %5878 = vmatpush3.bf16.msra.mxu1 %v6623_v3 }
 0x15e   : > { %5879 = vmatprep.subr.bf16.mxu1 %v6624_v4 }
 0x161   : > { %5880 = vmatpush3.bf16.msra.mxu1 %v6625_v5 }
 0x162   : > { %5881 = vmatprep.subr.bf16.mxu1 %v6626_v6 }
 0x164   : > { %5202 = vmatmul.mubr.msk.bf16.gmra.mrb[72].mxu1 %vm305_vm0, %v6616_v43 }
 0x165   : > { %1105 = vmatprep.mubr.bf16.mxu1 %v6838_v2  ;;  %5882 = vmatpush3.bf16.msra.mxu1 %v6627_v7 }
 0x166   : > { %5883 = vmatprep.subr.bf16.mxu1 %v6628_v8 }
 0x169   : > { %5884 = vmatpush3.bf16.msra.mxu1 %v6629_v17 }
 0x16a   : > { %5885 = vmatprep.subr.bf16.mxu1 %v6630_v18 }
 0x16c   : > { %5203 = vmatmul.mubr.msk.bf16.gmra.mrb[76].mxu1 %vm305_vm0, %v6617_v52 }
 0x16d   : > { %5886 = vmatpush3.bf16.msra.mxu1 %v6631_v19  ;;  %v6645_v19 = vld [vmem:[%s6903_s10 + $0xb8] sm:$0xff]  }
 0x16e   : > { %5887 = vmatprep.subr.bf16.mxu1 %v6632_v20  ;;  %5371 = vmatmul.mubr.msk.bf16.gmra.mrb[28].mxu0 %vm305_vm0, %v6645_v19  ;;  %v6649_v19 = vld [vmem:[%s6903_s10 + $0xd8] sm:$0xff]  }
 0x16f   : > { %2559 = vmatprep.mubr.bf16.mxu0 %v6838_v2 }
 0x171   : > { %5888 = vmatpush3.bf16.msra.mxu1 %v6633_v21 }
 0x172   : > { %1414 = vmatprep.subr.bf16.mxu1 %v7078_v10 }
 0x1e7   : > { %v5809_v22 = vpop.f32.mrb[32].mxu1 }
 0x1e8   : > { %v5810_v11 = vpop.f32.mrb[33].mxu1 }
 0x1e9   : > { %v5811_v12 = vadd.f32 %v5810_v11, %v5809_v22  ;;  %v5812_v13 = vpop.f32.mrb[34].mxu1 }
 0x1ea   : > { %v5813_v15 = vpop.f32.mrb[35].mxu1 }
 0x1eb   : > { %v5814_v16 = vadd.f32 %v5813_v15, %v5812_v13 }
 0x1ef   : > { %v5815_v23 = vpop.f32.mrb[36].mxu1 }
 0x1f0   : > { %v5816_v25 = vpop.f32.mrb[37].mxu1 }
 0x1f1   : > { %v5817_v26 = vadd.f32 %v5816_v25, %v5815_v23  ;;  %v5818_v27 = vpop.f32.mrb[38].mxu1 }
 0x1f2   : > { %v5819_v28 = vpop.f32.mrb[39].mxu1 }
 0x1f3   : > { %v5820_v29 = vadd.f32 %v5819_v28, %v5818_v27 }
 0x1f7   : > { %v5821_v30 = vpop.f32.mrb[40].mxu1 }
 0x1f8   : > { %v5822_v32 = vpop.f32.mrb[41].mxu1 }
 0x1f9   : > { %v5823_v33 = vadd.f32 %v5822_v32, %v5821_v30  ;;  %v5824_v34 = vpop.f32.mrb[42].mxu1 }
 0x1fa   : > { %v5825_v35 = vpop.f32.mrb[43].mxu1 }
 0x1fb   : > { %v5826_v36 = vadd.f32 %v5825_v35, %v5824_v34 }
 0x1ff   : > { %v5827_v37 = vpop.f32.mrb[44].mxu1 }
 0x200   : > { %v5828_v45 = vpop.f32.mrb[45].mxu1 }
 0x201   : > { %v5829_v46 = vadd.f32 %v5828_v45, %v5827_v37  ;;  %v5830_v47 = vpop.f32.mrb[46].mxu1  ;;  %v6647_v37 = vld [vmem:[%s6903_s10 + $0xc8] sm:$0xff]  }
 0x202   : > { %v5831_v48 = vpop.f32.mrb[47].mxu1 }
 0x203   : > { %v5832_v49 = vadd.f32 %v5831_v48, %v5830_v47 }
 0x207   : > { %v5849_v50 = vpop.f32.mrb[48].mxu1 }
 0x208   : > { %v5850_v58 = vpop.f32.mrb[49].mxu1 }
 0x209   : > { %v5851_v59 = vadd.f32 %v5850_v58, %v5849_v50  ;;  %v5852_v60 = vpop.f32.mrb[50].mxu1 }
 0x20a   : > { %v5853_v61 = vpop.f32.mrb[51].mxu1 }
 0x20b   : > { %v7198_v62 = vadd.f32 %v5851_v59, %v5811_v12  ;;  %v5854_v63 = vadd.f32 %v5853_v61, %v5852_v60 }
 0x20d   : > { %v7203_v0 = vadd.f32 %v5854_v63, %v5814_v16  ;;  %v6646_v16 = vld [vmem:[%s6903_s10 + $0xc0] sm:$0xff]  }
 0x20e   : > { %5424 = vmatmul.mubr.msk.bf16.vlgmr.msra.gmra.mrb[32].mxu0 %vm305_vm0, %v6646_v16 }
 0x20f   : > { %v5855_v1 = vpop.f32.mrb[52].mxu1  ;;  %2899 = vmatpush1.bf16.msra.mxu0 %v7090_v40  ;;  %2569 = vmatprep.mubr.bf16.mxu0 %v6838_v2 }
 0x210   : > { %v5856_v39 = vpop.f32.mrb[53].mxu1  ;;  %2900 = vmatprep.subr.bf16.mxu0 %v7096_v42 }
 0x211   : > { %v5857_v41 = vadd.f32 %v5856_v39, %v5855_v1  ;;  %v5858_v43 = vpop.f32.mrb[54].mxu1  ;;  %v6648_v1 = vld [vmem:[%s6903_s10 + $0xd0] sm:$0xff]  }
 0x212   : > { %v5859_v52 = vpop.f32.mrb[55].mxu1 }
 0x213   : > { %v7209_v53 = vadd.f32 %v5857_v41, %v5817_v26  ;;  %v5860_v54 = vadd.f32 %v5859_v52, %v5858_v43  ;;  %2901 = vmatpush1.bf16.msra.mxu0 %v7102_v38 }
 0x214   : > { %3269 = vmatprep.subr.bf16.mxu0 %v7078_v10 }
 0x215   : > { %v7213_v55 = vadd.f32 %v5860_v54, %v5820_v29 }
 0x216   : > { %5425 = vmatmul.mubr.msk.bf16.gmra.mrb[36].mxu0 %vm305_vm0, %v6647_v37  ;;  %v6657_v37 = vld [vmem:[%s6903_s10 + $0x118] sm:$0xff]  }
 0x217   : > { %v5861_v56 = vpop.f32.mrb[56].mxu1  ;;  %2579 = vmatprep.mubr.bf16.mxu0 %v6838_v2 }
 0x218   : > { %v5862_v3 = vpop.f32.mrb[57].mxu1 }
 0x219   : > { %v5863_v4 = vadd.f32 %v5862_v3, %v5861_v56  ;;  %v5864_v5 = vpop.f32.mrb[58].mxu1 }
 0x21a   : > { %v5865_v6 = vpop.f32.mrb[59].mxu1 }
 0x21b   : > { %v7216_v7 = vadd.f32 %v5863_v4, %v5823_v33  ;;  %v5866_v8 = vadd.f32 %v5865_v6, %v5864_v5 }
 0x21d   : > { %v7220_v17 = vadd.f32 %v5866_v8, %v5826_v36 }
 0x21e   : > { %5426 = vmatmul.mubr.msk.bf16.gmra.mrb[40].mxu0 %vm305_vm0, %v6648_v1  ;;  %v6673_v1 = vld [vmem:[%s8482_s2 + $0x1b8] sm:$0xff]  }
 0x21f   : > { %v5867_v18 = vpop.f32.mrb[60].mxu1  ;;  %2589 = vmatprep.mubr.bf16.mxu0 %v6838_v2 }
 0x220   : > { %v5868_v20 = vpop.f32.mrb[61].mxu1 }
 0x221   : > { %v5869_v21 = vadd.f32 %v5868_v20, %v5867_v18  ;;  %v5870_v22 = vpop.f32.mrb[62].mxu1 }
 0x222   : > { %v5871_v11 = vpop.f32.mrb[63].mxu1 }
 0x223   : > { %v7223_v12 = vadd.f32 %v5869_v21, %v5829_v46  ;;  %v5872_v13 = vadd.f32 %v5871_v11, %v5870_v22 }
 0x225   : > { %v7227_v14 = vadd.f32 %v5872_v13, %v5832_v49 }
 0x226   : > { %5427 = vmatmul.mubr.msk.bf16.gmra.mrb[44].mxu0 %vm305_vm0, %v6649_v19 }
 0x227   : > { %v1077_v15 = vpop.f32.mrb[64].mxu1  ;;  %2930 = vmatprep.mubr.bf16.mxu0 %v6838_v2 }
 0x228   : > { %v1132_v23 = vmul.f32 0.28507218, %v1077_v15  ;;  %v1079_v24 = vpop.f32.mrb[65].mxu1  ;;  %vm1116_vm3 = vcmp.gt.f32.partialorder %v1077_v15, 0.0 }
 0x229   : > { %v1133_v25 = vmul.f32 0.28507218, %v1079_v24  ;;  %v1081_v26 = vpop.f32.mrb[66].mxu1  ;;  %vm1117_vm4 = vcmp.gt.f32.partialorder %v1079_v24, 0.0 }
 0x22a   : > { %vm1118_vm5 = vcmp.gt.f32.partialorder %v1081_v26, 0.0  ;;  %v1134_v27 = vmul.f32 0.28507218, %v1081_v26  ;;  %v1083_v28 = vpop.f32.mrb[67].mxu1  ;;  %v1148_v30 = vsel %vm1116_vm3, %v1077_v15, %v1132_v23 }
 0x22b   : > { %vm1119_vm6 = vcmp.gt.f32.partialorder %v1083_v28, 0.0  ;;  %v1135_v29 = vmul.f32 0.28507218, %v1083_v28  ;;  %v1149_v32 = vsel %vm1117_vm4, %v1079_v24, %v1133_v25 }
 0x22c   : > { %v1150_v31 = vsel %vm1118_vm5, %v1081_v26, %v1134_v27 }
 0x22d   : > { %v1164_v33 = vpack.c.bf16 %v1150_v31, %v1148_v30  ;;  %v1151_v34 = vsel %vm1119_vm6, %v1083_v28, %v1135_v29  ;;  %v6650_v29 = vld [vmem:[%s6903_s10 + $0xe0] sm:$0xff]   ;;  %v6651_v31 = vld [vmem:[%s6903_s10 + $0xe8] sm:$0xff]  }
 0x22e   : > { %v1165_v35 = vpack.c.bf16 %v1151_v34, %v1149_v32  ;;  %5480 = vmatmul.mubr.msk.bf16.vlgmr.msra.gmra.mrb[48].mxu0 %vm305_vm0, %v6650_v29  ;;  %v6634_v30 = vld [vmem:[%s6903_s10 + $0x60] sm:$0xff]   ;;  %v6652_v32 = vld [vmem:[%s6903_s10 + $0xf0] sm:$0xff]  }
 0x22f   : > { %v1087_v36 = vpop.f32.mrb[68].mxu1  ;;  %3270 = vmatpush1.bf16.msra.mxu0 %v7090_v40  ;;  %2940 = vmatprep.mubr.bf16.mxu0 %v6838_v2  ;;  %v6654_v34 = vld [vmem:[%s6903_s10 + $0x100] sm:$0xff]  }
 0x230   : > { %v1136_v44 = vmul.f32 0.28507218, %v1087_v36  ;;  %v1089_v45 = vpop.f32.mrb[69].mxu1  ;;  %1333 = vmatprep.mubr.bf16.mxu1 %v1165_v35  ;;  %vm1120_vm7 = vcmp.gt.f32.partialorder %v1087_v36, 0.0  ;;  %3271 = vmatprep.subr.bf16.mxu0 %v7096_v42  ;;  %v6655_v35 = vld [vmem:[%s6903_s10 + $0x108] sm:$0xff]  }
 0x231   : > { %v1137_v46 = vmul.f32 0.28507218, %v1089_v45  ;;  %v1091_v47 = vpop.f32.mrb[70].mxu1  ;;  %1334 = vmatmul.mubr.bf16.vlgmr.msra.gmra.mrb[80].mxu1 %v1164_v33  ;;  %vm1121_vm8 = vcmp.gt.f32.partialorder %v1089_v45, 0.0  ;;  %v6637_v33 = vld [vmem:[%s6903_s10 + $0x78] sm:$0xff]  }
 0x232   : > { %vm1122_vm9 = vcmp.gt.f32.partialorder %v1091_v47, 0.0  ;;  %v1138_v48 = vmul.f32 0.28507218, %v1091_v47  ;;  %v1093_v49 = vpop.f32.mrb[71].mxu1  ;;  %1415 = vmatpush1.bf16.msra.mxu1 %v7090_v40  ;;  %v1152_v51 = vsel %vm1120_vm7, %v1087_v36, %v1136_v44  ;;  %v6635_v40 = vld [vmem:[%s6903_s10 + $0x68] sm:$0xff]   ;;  %v6656_v36 = vld [vmem:[%s6903_s10 + $0x110] sm:$0xff]  }
 0x233   : > { %vm1123_vm10 = vcmp.gt.f32.partialorder %v1093_v49, 0.0  ;;  %v1139_v50 = vmul.f32 0.28507218, %v1093_v49  ;;  %1416 = vmatprep.subr.bf16.mxu1 %v7096_v42  ;;  %v1153_v59 = vsel %vm1121_vm8, %v1089_v45, %v1137_v46  ;;  %3272 = vmatpush1.bf16.msra.mxu0 %v7102_v38  ;;  %v6636_v42 = vld [vmem:[%s6903_s10 + $0x70] sm:$0xff]   ;;  %v6658_v44 = vld [vmem:[%s8482_s2 + $0x1c0] sm:$0xff]   ;;  %v6660_v46 = vld [vmem:[%s8482_s2 + $0x1c8] sm:$0xff]  }
 0x234   : > { %v1154_v58 = vsel %vm1122_vm9, %v1091_v47, %v1138_v48  ;;  %v6659_v45 = vld [vmem:[%s8482_s2 + $0x180] sm:$0xff]   ;;  %v6662_v47 = vld [vmem:[%s8482_s2 + $0x1d0] sm:$0xff]  }
 0x235   : > { %v1155_v60 = vsel %vm1123_vm10, %v1093_v49, %v1139_v50  ;;  %v1166_v10 = vpack.c.bf16 %v1154_v58, %v1152_v51  ;;  %v6663_v48 = vld [vmem:[%s8482_s2 + $0x190] sm:$0xff]   ;;  %v6664_v49 = vld [vmem:[%s8482_s2 + $0x1d8] sm:$0xff]   ;;  %v6666_v51 = vld [vmem:[%s8482_s2 + $0x1e0] sm:$0xff]  }
 0x236   : > { %v1167_v61 = vpack.c.bf16 %v1155_v60, %v1153_v59  ;;  %1417 = vmatpush1.bf16.msra.mxu1 %v7102_v38  ;;  %5481 = vmatmul.mubr.msk.bf16.gmra.mrb[52].mxu0 %vm305_vm0, %v6651_v31  ;;  %v6653_v38 = vld [vmem:[%s6903_s10 + $0xf8] sm:$0xff]   ;;  %v6667_v58 = vld [vmem:[%s8482_s2 + $0x1a0] sm:$0xff]   ;;  %v6668_v59 = vld [vmem:[%s8482_s2 + $0x1e8] sm:$0xff]  }
 0x237   : > { %v1097_v63 = vpop.f32.mrb[72].mxu1  ;;  %2950 = vmatprep.mubr.bf16.mxu0 %v6838_v2  ;;  %5913 = vmatprep.subr.bf16.mxu1 %v6658_v44  ;;  %v6665_v50 = vld [vmem:[%s8482_s2 + $0x198] sm:$0xff]   ;;  %v6669_v60 = vld [vmem:[%s8482_s2 + $0x1a8] sm:$0xff]  }
 0x238   : > { %v1140_v9 = vmul.f32 0.28507218, %v1097_v63  ;;  %v1099_v39 = vpop.f32.mrb[73].mxu1  ;;  %1341 = vmatprep.mubr.bf16.mxu1 %v1167_v61  ;;  %vm1124_vm11 = vcmp.gt.f32.partialorder %v1097_v63, 0.0  ;;  %v6671_v61 = vld [vmem:[%s8482_s2 + $0x1b0] sm:$0xff]  }
 0x239   : > { %v1141_v41 = vmul.f32 0.28507218, %v1099_v39  ;;  %v1101_v43 = vpop.f32.mrb[74].mxu1  ;;  %1342 = vmatmul.mubr.bf16.gmra.mrb[84].mxu1 %v1166_v10  ;;  %vm1125_vm12 = vcmp.gt.f32.partialorder %v1099_v39, 0.0  ;;  %v6670_v10 = vld [vmem:[%s8482_s2 + $0x1f0] sm:$0xff]  }
 0x23a   : > { %vm1126_vm13 = vcmp.gt.f32.partialorder %v1101_v43, 0.0  ;;  %v1142_v52 = vmul.f32 0.28507218, %v1101_v43  ;;  %v1103_v54 = vpop.f32.mrb[75].mxu1  ;;  %v1156_v57 = vsel %vm1124_vm11, %v1097_v63, %v1140_v9  ;;  %v6672_v63 = vld [vmem:[%s8482_s2 + $0x1f8] sm:$0xff]   ;;  %v6674_v9 = vld [vmem:[%s8482_s2 + $0x240] sm:$0xff]  }
 0x23b   : > { %vm1127_vm14 = vcmp.gt.f32.partialorder %v1103_v54, 0.0  ;;  %v1143_v56 = vmul.f32 0.28507218, %v1103_v54  ;;  %v1157_v4 = vsel %vm1125_vm12, %v1099_v39, %v1141_v41  ;;  %v1819_v39 = vpop.f32.mrb[0].mxu0 }
 0x23c   : > { %v1158_v3 = vsel %vm1126_vm13, %v1101_v43, %v1142_v52  ;;  %v1821_v41 = vpop.f32.mrb[1].mxu0  ;;  %v1874_v52 = vmul.f32 0.28507218, %v1819_v39 }
 0x23d   : > { %v1159_v5 = vsel %vm1127_vm14, %v1103_v54, %v1143_v56  ;;  %v1168_v6 = vpack.c.bf16 %v1158_v3, %v1156_v57  ;;  %v1823_v43 = vpop.f32.mrb[2].mxu0  ;;  %vm1859_vm4 = vcmp.gt.f32.partialorder %v1821_v41, 0.0  ;;  %v1875_v54 = vmul.f32 0.28507218, %v1821_v41 }
 0x23e   : > { %v1169_v8 = vpack.c.bf16 %v1159_v5, %v1157_v4  ;;  %5482 = vmatmul.mubr.msk.bf16.gmra.mrb[56].mxu0 %vm305_vm0, %v6652_v32  ;;  %vm1860_vm5 = vcmp.gt.f32.partialorder %v1823_v43, 0.0  ;;  %v1876_v56 = vmul.f32 0.28507218, %v1823_v43  ;;  %v1825_v57 = vpop.f32.mrb[3].mxu0 }
 0x23f   : > { %v1107_v18 = vpop.f32.mrb[76].mxu1  ;;  %2960 = vmatprep.mubr.bf16.mxu0 %v6838_v2  ;;  %v7339_v4 = vsel %vm1859_vm4, %v1821_v41, %v1875_v54  ;;  %vm1861_vm6 = vcmp.gt.f32.partialorder %v1825_v57, 0.0  ;;  %v1877_v5 = vmul.f32 0.28507218, %v1825_v57  ;;  %v1829_v19 = vpop.f32.mrb[4].mxu0 }
 0x240   : > { %v1144_v20 = vmul.f32 0.28507218, %v1107_v18  ;;  %v1109_v21 = vpop.f32.mrb[77].mxu1  ;;  %1349 = vmatprep.mubr.bf16.mxu1 %v1169_v8  ;;  %vm1128_vm15 = vcmp.gt.f32.partialorder %v1107_v18, 0.0  ;;  %vm1862_vm7 = vcmp.gt.f32.partialorder %v1829_v19, 0.0 }
 0x241   : > { %v1145_v22 = vmul.f32 0.28507218, %v1109_v21  ;;  %v1111_v11 = vpop.f32.mrb[78].mxu1  ;;  %1350 = vmatmul.mubr.bf16.gmra.mrb[88].mxu1 %v1168_v6  ;;  %vm1129_vm1 = vcmp.gt.f32.partialorder %v1109_v21, 0.0  ;;  %v7341_v6 = vsel %vm1860_vm5, %v1823_v43, %v1876_v56 }
 0x242   : > { %vm1130_vm2 = vcmp.gt.f32.partialorder %v1111_v11, 0.0  ;;  %v1146_v13 = vmul.f32 0.28507218, %v1111_v11  ;;  %v1113_v15 = vpop.f32.mrb[79].mxu1  ;;  %v1160_v23 = vsel %vm1128_vm15, %v1107_v18, %v1144_v20  ;;  %v7345_v18 = vsel %vm1861_vm6, %v1825_v57, %v1877_v5 }
 0x243   : > { %vm1131_vm3 = vcmp.gt.f32.partialorder %v1113_v15, 0.0  ;;  %v1147_v16 = vmul.f32 0.28507218, %v1113_v15  ;;  %v1161_v25 = vsel %vm1129_vm1, %v1109_v21, %v1145_v22  ;;  %v1878_v21 = vmul.f32 0.28507218, %v1829_v19  ;;  %v1831_v22 = vpop.f32.mrb[5].mxu0 }
 0x244   : > { %v1162_v24 = vsel %vm1130_vm2, %v1111_v11, %v1146_v13  ;;  %vm1863_vm8 = vcmp.gt.f32.partialorder %v1831_v22, 0.0  ;;  %v1879_v11 = vmul.f32 0.28507218, %v1831_v22  ;;  %v1833_v13 = vpop.f32.mrb[6].mxu0 }
 0x245   : > { %v1163_v26 = vsel %vm1131_vm3, %v1113_v15, %v1147_v16  ;;  %v1170_v27 = vpack.c.bf16 %v1162_v24, %v1160_v23  ;;  %vm1864_vm9 = vcmp.gt.f32.partialorder %v1833_v13, 0.0  ;;  %v1880_v15 = vmul.f32 0.28507218, %v1833_v13  ;;  %v1835_v16 = vpop.f32.mrb[7].mxu0 }
 0x246   : > { %v1171_v28 = vpack.c.bf16 %v1163_v26, %v1161_v25  ;;  %5483 = vmatmul.mubr.msk.bf16.gmra.mrb[60].mxu0 %vm305_vm0, %v6653_v38  ;;  %v7349_v23 = vsel %vm1862_vm7, %v1829_v19, %v1878_v21  ;;  %v7351_v24 = vsel %vm1863_vm8, %v1831_v22, %v1879_v11  ;;  %vm1865_vm10 = vcmp.gt.f32.partialorder %v1835_v16, 0.0 }
 0x247   : > { %3301 = vmatprep.mubr.bf16.mxu0 %v6838_v2  ;;  %v1881_v25 = vmul.f32 0.28507218, %v1835_v16  ;;  %v7353_v26 = vsel %vm1864_vm9, %v1833_v13, %v1880_v15 }
 0x248   : > { %1357 = vmatprep.mubr.bf16.mxu1 %v1171_v28 }
 0x249   : > { %1358 = vmatmul.mubr.bf16.gmra.mrb[92].mxu1 %v1170_v27  ;;  %v7355_v27 = vsel %vm1865_vm10, %v1835_v16, %v1881_v25 }
 0x24a   : > { %1446 = vmatprep.mubr.bf16.mxu1 %v6838_v2 }
 0x24e   : > { %5536 = vmatmul.mubr.msk.bf16.vlgmr.msra.gmra.mrb[64].mxu0 %vm305_vm0, %v6654_v34 }
 0x24f   : > { %3311 = vmatprep.mubr.bf16.mxu0 %v6838_v2 }
 0x251   : > { %5256 = vmatmul.mubr.msk.bf16.vlgmr.msra.gmra.mrb[96].mxu1 %vm305_vm0, %v6634_v30  ;;  %v1839_v30 = vpop.f32.mrb[8].mxu0 }
 0x252   : > { %1456 = vmatprep.mubr.bf16.mxu1 %v6838_v2  ;;  %5914 = vmatpush3.bf16.msra.mxu1 %v6659_v45  ;;  %vm1866_vm11 = vcmp.gt.f32.partialorder %v1839_v30, 0.0  ;;  %v1882_v31 = vmul.f32 0.28507218, %v1839_v30 }
 0x253   : > { %5915 = vmatprep.subr.bf16.mxu1 %v6660_v46 }
 0x254   : > { %v7361_v34 = vsel %vm1866_vm11, %v1839_v30, %v1882_v31 }
 0x256   : > { %5537 = vmatmul.mubr.msk.bf16.gmra.mrb[68].mxu0 %vm305_vm0, %v6655_v35 }
 0x257   : > { %3321 = vmatprep.mubr.bf16.mxu0 %v6838_v2 }
 0x259   : > { %5257 = vmatmul.mubr.msk.bf16.gmra.mrb[100].mxu1 %vm305_vm0, %v6635_v40  ;;  %v1841_v40 = vpop.f32.mrb[9].mxu0 }
 0x25a   : > { %1466 = vmatprep.mubr.bf16.mxu1 %v6838_v2  ;;  %vm1867_vm12 = vcmp.gt.f32.partialorder %v1841_v40, 0.0  ;;  %v1883_v32 = vmul.f32 0.28507218, %v1841_v40 }
 0x25c   : > { %v7363_v35 = vsel %vm1867_vm12, %v1841_v40, %v1883_v32 }
 0x25e   : > { %5538 = vmatmul.mubr.msk.bf16.gmra.mrb[72].mxu0 %vm305_vm0, %v6656_v36 }
 0x25f   : > { %3331 = vmatprep.mubr.bf16.mxu0 %v6838_v2 }
 0x261   : > { %5258 = vmatmul.mubr.msk.bf16.gmra.mrb[104].mxu1 %vm305_vm0, %v6636_v42  ;;  %v1843_v42 = vpop.f32.mrb[10].mxu0 }
 0x262   : > { %1476 = vmatprep.mubr.bf16.mxu1 %v6838_v2  ;;  %v6661_v2 = vld [vmem:[%s8482_s2 + $0x188] sm:$0xff]   ;;  %vm1868_vm13 = vcmp.gt.f32.partialorder %v1843_v42, 0.0  ;;  %v1884_v38 = vmul.f32 0.28507218, %v1843_v42 }
 0x263   : > { %5916 = vmatpush3.bf16.msra.mxu1 %v6661_v2 }
 0x264   : > { %5917 = vmatprep.subr.bf16.mxu1 %v6662_v47 }
 0x266   : > { %5539 = vmatmul.mubr.msk.bf16.gmra.mrb[76].mxu0 %vm305_vm0, %v6657_v37  ;;  %v7365_v37 = vsel %vm1868_vm13, %v1843_v42, %v1884_v38 }
 0x267   : > { %5918 = vmatpush3.bf16.msra.mxu1 %v6663_v48 }
 0x268   : > { %5919 = vmatprep.subr.bf16.mxu1 %v6664_v49 }
 0x269   : > { %5259 = vmatmul.mubr.msk.bf16.gmra.mrb[108].mxu1 %vm305_vm0, %v6637_v33  ;;  %vm1858_vm0 = vcmp.gt.f32.partialorder %v1819_v39, 0.0  ;;  %v1845_v33 = vpop.f32.mrb[11].mxu0 }
 0x26a   : > { %v7337_v3 = vsel %vm1858_vm0, %v1819_v39, %v1874_v52  ;;  %vm1869_vm14 = vcmp.gt.f32.partialorder %v1845_v33, 0.0  ;;  %v1885_v36 = vmul.f32 0.28507218, %v1845_v33  ;;  %v1849_v2 = vpop.f32.mrb[12].mxu0 }
 0x26b   : > { %5920 = vmatpush3.bf16.msra.mxu1 %v6665_v50  ;;  %vm1870_vm15 = vcmp.gt.f32.partialorder %v1849_v2, 0.0  ;;  %v1886_v47 = vmul.f32 0.28507218, %v1849_v2  ;;  %v1851_v48 = vpop.f32.mrb[13].mxu0 }
 0x26c   : > { %5921 = vmatprep.subr.bf16.mxu1 %v6666_v51  ;;  %v7367_v44 = vsel %vm1869_vm14, %v1845_v33, %v1885_v36  ;;  %vm1871_vm1 = vcmp.gt.f32.partialorder %v1851_v48, 0.0  ;;  %v1887_v49 = vmul.f32 0.28507218, %v1851_v48  ;;  %v1853_v50 = vpop.f32.mrb[14].mxu0 }
 0x26d   : > { %vm1872_vm2 = vcmp.gt.f32.partialorder %v1853_v50, 0.0  ;;  %v1888_v51 = vmul.f32 0.28507218, %v1853_v50 }
 0x26f   : > { %5922 = vmatpush3.bf16.msra.mxu1 %v6667_v58  ;;  %v1855_v58 = vpop.f32.mrb[15].mxu0 }
 0x270   : > { %5923 = vmatprep.subr.bf16.mxu1 %v6668_v59  ;;  %v7373_v59 = vsel %vm1870_vm15, %v1849_v2, %v1886_v47  ;;  %vm1873_vm3 = vcmp.gt.f32.partialorder %v1855_v58, 0.0  ;;  %v2190_v39 = vpop.f32.mrb[16].mxu0 }
 0x271   : > { %vm2229_vm0 = vcmp.gt.f32.partialorder %v2190_v39, 0.0  ;;  %v2245_v41 = vmul.f32 0.28507218, %v2190_v39  ;;  %v2192_v43 = vpop.f32.mrb[17].mxu0 }
 0x272   : > { %vm2230_vm4 = vcmp.gt.f32.partialorder %v2192_v43, 0.0  ;;  %v2246_v52 = vmul.f32 0.28507218, %v2192_v43  ;;  %v2194_v54 = vpop.f32.mrb[18].mxu0 }
 0x273   : > { %5924 = vmatpush3.bf16.msra.mxu1 %v6669_v60  ;;  %v7375_v60 = vsel %vm1871_vm1, %v1851_v48, %v1887_v49  ;;  %v7385_v56 = vsel %vm2229_vm0, %v2190_v39, %v2245_v41  ;;  %vm2231_vm5 = vcmp.gt.f32.partialorder %v2194_v54, 0.0  ;;  %v2247_v57 = vmul.f32 0.28507218, %v2194_v54  ;;  %v2196_v5 = vpop.f32.mrb[19].mxu0 }
 0x274   : > { %5925 = vmatprep.subr.bf16.mxu1 %v6670_v10  ;;  %v1889_v10 = vmul.f32 0.28507218, %v1855_v58  ;;  %v7387_v19 = vsel %vm2230_vm4, %v2192_v43, %v2246_v52  ;;  %vm2232_vm6 = vcmp.gt.f32.partialorder %v2196_v5, 0.0  ;;  %v2248_v21 = vmul.f32 0.28507218, %v2196_v5  ;;  %v2200_v16 = vpop.f32.mrb[20].mxu0 }
 0x275   : > { %v7389_v22 = vsel %vm2231_vm5, %v2194_v54, %v2247_v57  ;;  %vm2233_vm7 = vcmp.gt.f32.partialorder %v2200_v16, 0.0  ;;  %v2249_v25 = vmul.f32 0.28507218, %v2200_v16  ;;  %v2202_v30 = vpop.f32.mrb[21].mxu0 }
 0x276   : > { %v7393_v13 = vsel %vm2232_vm6, %v2196_v5, %v2248_v21  ;;  %vm2234_vm8 = vcmp.gt.f32.partialorder %v2202_v30, 0.0  ;;  %v2250_v31 = vmul.f32 0.28507218, %v2202_v30  ;;  %v2204_v40 = vpop.f32.mrb[22].mxu0 }
 0x277   : > { %5926 = vmatpush3.bf16.msra.mxu1 %v6671_v61  ;;  %v7377_v61 = vsel %vm1872_vm2, %v1853_v50, %v1888_v51  ;;  %vm2235_vm9 = vcmp.gt.f32.partialorder %v2204_v40, 0.0  ;;  %v2251_v32 = vmul.f32 0.28507218, %v2204_v40  ;;  %v2206_v42 = vpop.f32.mrb[23].mxu0  ;;  %v7397_v38 = vsel %vm2233_vm7, %v2200_v16, %v2249_v25 }
 0x278   : > { %5927 = vmatprep.subr.bf16.mxu1 %v6672_v63  ;;  %v7379_v63 = vsel %vm1873_vm3, %v1855_v58, %v1889_v10  ;;  %v7399_v33 = vsel %vm2234_vm8, %v2202_v30, %v2250_v31  ;;  %vm2236_vm10 = vcmp.gt.f32.partialorder %v2206_v42, 0.0  ;;  %v2252_v36 = vmul.f32 0.28507218, %v2206_v42  ;;  %v2210_v50 = vpop.f32.mrb[24].mxu0 }
 0x279   : > { %v7401_v2 = vsel %vm2235_vm9, %v2204_v40, %v2251_v32  ;;  %vm2237_vm11 = vcmp.gt.f32.partialorder %v2210_v50, 0.0  ;;  %v2253_v51 = vmul.f32 0.28507218, %v2210_v50  ;;  %v2212_v58 = vpop.f32.mrb[25].mxu0 }
 0x27a   : > { %v7403_v47 = vsel %vm2236_vm10, %v2206_v42, %v2252_v36  ;;  %vm2238_vm12 = vcmp.gt.f32.partialorder %v2212_v58, 0.0  ;;  %v2254_v10 = vmul.f32 0.28507218, %v2212_v58  ;;  %v2214_v39 = vpop.f32.mrb[26].mxu0 }
 0x27b   : > { %5928 = vmatpush3.bf16.msra.mxu1 %v6673_v1  ;;  %vm2239_vm13 = vcmp.gt.f32.partialorder %v2214_v39, 0.0  ;;  %v2255_v41 = vmul.f32 0.28507218, %v2214_v39  ;;  %v2216_v43 = vpop.f32.mrb[27].mxu0  ;;  %v7409_v52 = vsel %vm2237_vm11, %v2210_v50, %v2253_v51 }
 0x27c   : > { %5953 = vmatprep.subr.bf16.mxu1 %v6674_v9  ;;  %v7411_v54 = vsel %vm2238_vm12, %v2212_v58, %v2254_v10  ;;  %vm2240_vm14 = vcmp.gt.f32.partialorder %v2216_v43, 0.0  ;;  %v2256_v57 = vmul.f32 0.28507218, %v2216_v43  ;;  %v2220_v30 = vpop.f32.mrb[28].mxu0 }
 0x27d   : > { %v7413_v5 = vsel %vm2239_vm13, %v2214_v39, %v2255_v41  ;;  %vm2241_vm15 = vcmp.gt.f32.partialorder %v2220_v30, 0.0  ;;  %v2257_v31 = vmul.f32 0.28507218, %v2220_v30  ;;  %v2222_v40 = vpop.f32.mrb[29].mxu0 }
 0x27e   : > { %v7415_v21 = vsel %vm2240_vm14, %v2216_v43, %v2256_v57  ;;  %vm2242_vm1 = vcmp.gt.f32.partialorder %v2222_v40, 0.0  ;;  %v2258_v32 = vmul.f32 0.28507218, %v2222_v40  ;;  %v2224_v42 = vpop.f32.mrb[30].mxu0 }
 0x27f   : > { %vm2243_vm2 = vcmp.gt.f32.partialorder %v2224_v42, 0.0  ;;  %v2259_v36 = vmul.f32 0.28507218, %v2224_v42  ;;  %v2226_v50 = vpop.f32.mrb[31].mxu0  ;;  %v7421_v51 = vsel %vm2241_vm15, %v2220_v30, %v2257_v31 }
 0x280   : > { %v7423_v58 = vsel %vm2242_vm1, %v2222_v40, %v2258_v32  ;;  %vm2244_vm3 = vcmp.gt.f32.partialorder %v2226_v50, 0.0  ;;  %v2260_v10 = vmul.f32 0.28507218, %v2226_v50 }
 0x281   : > { %v7425_v39 = vsel %vm2243_vm2, %v2224_v42, %v2259_v36 }
 0x282   : > { %v7427_v41 = vsel %vm2244_vm3, %v2226_v50, %v2260_v10 }
 0x2e1   : > { %v2561_v25 = vpop.f32.mrb[32].mxu0 }
 0x2e2   : > { %vm2600_vm0 = vcmp.gt.f32.partialorder %v2561_v25, 0.0  ;;  %v2616_v16 = vmul.f32 0.28507218, %v2561_v25  ;;  %v2563_v49 = vpop.f32.mrb[33].mxu0 }
 0x2e3   : > { %vm2601_vm4 = vcmp.gt.f32.partialorder %v2563_v49, 0.0  ;;  %v2617_v30 = vmul.f32 0.28507218, %v2563_v49  ;;  %v2565_v31 = vpop.f32.mrb[34].mxu0 }
 0x2e4   : > { %v7433_v40 = vsel %vm2600_vm0, %v2561_v25, %v2616_v16  ;;  %vm2602_vm5 = vcmp.gt.f32.partialorder %v2565_v31, 0.0  ;;  %v2618_v32 = vmul.f32 0.28507218, %v2565_v31  ;;  %v2567_v42 = vpop.f32.mrb[35].mxu0 }
 0x2e5   : > { %v7435_v36 = vsel %vm2601_vm4, %v2563_v49, %v2617_v30  ;;  %vm2603_vm6 = vcmp.gt.f32.partialorder %v2567_v42, 0.0  ;;  %v2619_v50 = vmul.f32 0.28507218, %v2567_v42 }
 0x2e6   : > { %v7437_v43 = vsel %vm2602_vm5, %v2565_v31, %v2618_v32 }
 0x2e7   : > { %v7441_v11 = vsel %vm2603_vm6, %v2567_v42, %v2619_v50 }
 0x2e9   : > { %v2571_v1 = vpop.f32.mrb[36].mxu0 }
 0x2ea   : > { %vm2604_vm7 = vcmp.gt.f32.partialorder %v2571_v1, 0.0  ;;  %v2620_v31 = vmul.f32 0.28507218, %v2571_v1  ;;  %v2573_v32 = vpop.f32.mrb[37].mxu0 }
 0x2eb   : > { %vm2605_vm8 = vcmp.gt.f32.partialorder %v2573_v32, 0.0  ;;  %v2621_v46 = vmul.f32 0.28507218, %v2573_v32  ;;  %v2575_v45 = vpop.f32.mrb[38].mxu0 }
 0x2ec   : > { %vm2606_vm9 = vcmp.gt.f32.partialorder %v2575_v45, 0.0  ;;  %v2577_v50 = vpop.f32.mrb[39].mxu0 }
 0x2ed   : > { %v7453_v48 = vsel %vm2605_vm8, %v2573_v32, %v2621_v46  ;;  %vm2607_vm10 = vcmp.gt.f32.partialorder %v2577_v50, 0.0 }
 0x304   : > { %v5889_v10 = vpop.f32.mrb[80].mxu1 }
 0x305   : > { %v5890_v57 = vpop.f32.mrb[81].mxu1 }
 0x306   : > { %v5891_v15 = vadd.f32 %v5890_v57, %v5889_v10  ;;  %v5892_v9 = vpop.f32.mrb[82].mxu1  ;;  %v2622_v57 = vmul.f32 0.28507218, %v2575_v45  ;;  %v7451_v10 = vsel %vm2604_vm7, %v2571_v1, %v2620_v31  ;;  %v2581_v31 = vpop.f32.mrb[40].mxu0 }
 0x307   : > { %v5893_v25 = vpop.f32.mrb[83].mxu1  ;;  %vm2608_vm11 = vcmp.gt.f32.partialorder %v2581_v31, 0.0 }
 0x308   : > { %v7446_v49 = vadd.f32 %v5891_v15, %v7198_v62  ;;  %v5894_v30 = vadd.f32 %v5893_v25, %v5892_v9  ;;  %v2623_v62 = vmul.f32 0.28507218, %v2577_v50  ;;  %v7455_v9 = vsel %vm2606_vm9, %v2575_v45, %v2622_v57  ;;  %v2583_v57 = vpop.f32.mrb[41].mxu0 }
 0x309   : > { %v2624_v45 = vmul.f32 0.28507218, %v2581_v31  ;;  %vm2609_vm12 = vcmp.gt.f32.partialorder %v2583_v57, 0.0 }
 0x30a   : > { %8508 = vst [vmem:[#allocation3_spill] sm:$0xff] %v7446_v49  ;;  %v7449_v42 = vadd.f32 %v5894_v30, %v7203_v0  ;;  %v7457_v16 = vsel %vm2607_vm10, %v2577_v50, %v2623_v62  ;;  %v2625_v50 = vmul.f32 0.28507218, %v2583_v57  ;;  %v2585_v62 = vpop.f32.mrb[42].mxu0 }
 0x30b   : > { %vm2610_vm13 = vcmp.gt.f32.partialorder %v2585_v62, 0.0  ;;  %v2587_v0 = vpop.f32.mrb[43].mxu0  ;;  %v7469_v8 = vsel %vm2608_vm11, %v2581_v31, %v2624_v45 }
 0x30c   : > { %8509 = vst [vmem:[#allocation4_spill] sm:$0xff] %v7449_v42  ;;  %v5895_v15 = vpop.f32.mrb[84].mxu1  ;;  %8512 = vst [vmem:[#allocation7_spill] sm:$0xff] %v7469_v8  ;;  %v7471_v30 = vsel %vm2609_vm12, %v2583_v57, %v2625_v50  ;;  %vm2611_vm14 = vcmp.gt.f32.partialorder %v2587_v0, 0.0  ;;  %v2591_v45 = vpop.f32.mrb[44].mxu0 }
 0x30d   : > { %v5896_v25 = vpop.f32.mrb[85].mxu1  ;;  %8513 = vst [vmem:[#allocation8_spill] sm:$0xff] %v7471_v30  ;;  %vm2612_vm15 = vcmp.gt.f32.partialorder %v2591_v45, 0.0 }
 0x30e   : > { %v5897_v29 = vadd.f32 %v5896_v25, %v5895_v15  ;;  %v5898_v28 = vpop.f32.mrb[86].mxu1  ;;  %v2626_v25 = vmul.f32 0.28507218, %v2585_v62 }
 0x30f   : > { %v5899_v1 = vpop.f32.mrb[87].mxu1 }
 0x310   : > { %v7464_v46 = vadd.f32 %v5897_v29, %v7209_v53  ;;  %v5900_v32 = vadd.f32 %v5899_v1, %v5898_v28  ;;  %v2627_v53 = vmul.f32 0.28507218, %v2587_v0  ;;  %v7473_v28 = vsel %vm2610_vm13, %v2585_v62, %v2626_v25  ;;  %v2593_v25 = vpop.f32.mrb[45].mxu0 }
 0x311   : > { %8514 = vst [vmem:[#allocation9_spill] sm:$0xff] %v7473_v28  ;;  %v2628_v62 = vmul.f32 0.28507218, %v2591_v45  ;;  %vm2613_vm1 = vcmp.gt.f32.partialorder %v2593_v25, 0.0 }
 0x312   : > { %8510 = vst [vmem:[#allocation5_spill] sm:$0xff] %v7464_v46  ;;  %v7467_v15 = vadd.f32 %v5900_v32, %v7213_v55  ;;  %v7475_v20 = vsel %vm2611_vm14, %v2587_v0, %v2627_v53  ;;  %v2629_v0 = vmul.f32 0.28507218, %v2593_v25  ;;  %v2595_v53 = vpop.f32.mrb[46].mxu0 }
 0x313   : > { %vm2614_vm2 = vcmp.gt.f32.partialorder %v2595_v53, 0.0  ;;  %v2597_v55 = vpop.f32.mrb[47].mxu0 }
 0x314   : > { %8511 = vst [vmem:[#allocation6_spill] sm:$0xff] %v7467_v15  ;;  %v5901_v29 = vpop.f32.mrb[88].mxu1  ;;  %v7487_v15 = vsel %vm2612_vm15, %v2591_v45, %v2628_v62  ;;  %v7489_v32 = vsel %vm2613_vm1, %v2593_v25, %v2629_v0  ;;  %vm2615_vm3 = vcmp.gt.f32.partialorder %v2597_v55, 0.0  ;;  %v2932_v62 = vpop.f32.mrb[48].mxu0 }
 0x315   : > { %v5902_v1 = vpop.f32.mrb[89].mxu1  ;;  %8517 = vst [vmem:[#allocation12_spill] sm:$0xff] %v7487_v15  ;;  %8518 = vst [vmem:[#allocation13_spill] sm:$0xff] %v7489_v32  ;;  %vm2971_vm0 = vcmp.gt.f32.partialorder %v2932_v62, 0.0 }
 0x316   : > { %v5903_v46 = vadd.f32 %v5902_v1, %v5901_v29  ;;  %v5904_v42 = vpop.f32.mrb[90].mxu1  ;;  %v2630_v1 = vmul.f32 0.28507218, %v2595_v53 }
 0x317   : > { %v5905_v31 = vpop.f32.mrb[91].mxu1 }
 0x318   : > { %v7482_v57 = vadd.f32 %v5903_v46, %v7216_v7  ;;  %v5906_v50 = vadd.f32 %v5905_v31, %v5904_v42  ;;  %v2631_v7 = vmul.f32 0.28507218, %v2597_v55  ;;  %v7491_v42 = vsel %vm2614_vm2, %v2595_v53, %v2630_v1  ;;  %v2934_v1 = vpop.f32.mrb[49].mxu0 }
 0x319   : > { %8519 = vst [vmem:[#allocation14_spill] sm:$0xff] %v7491_v42  ;;  %v2987_v53 = vmul.f32 0.28507218, %v2932_v62  ;;  %vm2972_vm4 = vcmp.gt.f32.partialorder %v2934_v1, 0.0 }
 0x31a   : > { %8515 = vst [vmem:[#allocation10_spill] sm:$0xff] %v7482_v57  ;;  %v7485_v29 = vadd.f32 %v5906_v50, %v7220_v17  ;;  %v7493_v57 = vsel %vm2615_vm3, %v2597_v55, %v2631_v7  ;;  %v2988_v55 = vmul.f32 0.28507218, %v2934_v1  ;;  %v2936_v7 = vpop.f32.mrb[50].mxu0 }
 0x31b   : > { %8520 = vst [vmem:[#allocation15_spill] sm:$0xff] %v7493_v57  ;;  %vm2973_vm5 = vcmp.gt.f32.partialorder %v2936_v7, 0.0  ;;  %v2989_v17 = vmul.f32 0.28507218, %v2936_v7  ;;  %v2938_v50 = vpop.f32.mrb[51].mxu0 }
 0x31c   : > { %8516 = vst [vmem:[#allocation11_spill] sm:$0xff] %v7485_v29  ;;  %v5907_v46 = vpop.f32.mrb[92].mxu1  ;;  %v7507_v29 = vsel %vm2972_vm4, %v2934_v1, %v2988_v55  ;;  %vm2974_vm6 = vcmp.gt.f32.partialorder %v2938_v50, 0.0 }
 0x31d   : > { %v5908_v31 = vpop.f32.mrb[93].mxu1  ;;  %8524 = vst [vmem:[#allocation19_spill] sm:$0xff] %v7507_v29 }
 0x31e   : > { %v5909_v49 = vadd.f32 %v5908_v31, %v5907_v46  ;;  %v5910_v8 = vpop.f32.mrb[94].mxu1  ;;  %v7505_v31 = vsel %vm2971_vm0, %v2932_v62, %v2987_v53 }
 0x31f   : > { %v5911_v45 = vpop.f32.mrb[95].mxu1  ;;  %8523 = vst [vmem:[#allocation18_spill] sm:$0xff] %v7505_v31 }
 0x320   : > { %v7500_v25 = vadd.f32 %v5909_v49, %v7223_v12  ;;  %v5912_v0 = vadd.f32 %v5911_v45, %v5910_v8  ;;  %v2990_v12 = vmul.f32 0.28507218, %v2938_v50  ;;  %v7509_v8 = vsel %vm2973_vm5, %v2936_v7, %v2989_v17  ;;  %v2942_v17 = vpop.f32.mrb[52].mxu0 }
 0x321   : > { %8525 = vst [vmem:[#allocation20_spill] sm:$0xff] %v7509_v8  ;;  %vm2975_vm11 = vcmp.gt.f32.partialorder %v2942_v17, 0.0  ;;  %v2944_v32 = vpop.f32.mrb[53].mxu0  ;;  %v2991_v15 = vmul.f32 0.28507218, %v2942_v17 }
 0x322   : > { %8521 = vst [vmem:[#allocation16_spill] sm:$0xff] %v7500_v25  ;;  %v7503_v46 = vadd.f32 %v5912_v0, %v7227_v14  ;;  %v7513_v14 = vsel %vm2974_vm6, %v2938_v50, %v2990_v12  ;;  %vm2976_vm12 = vcmp.gt.f32.partialorder %v2944_v32, 0.0  ;;  %v2992_v50 = vmul.f32 0.28507218, %v2944_v32  ;;  %v2946_v12 = vpop.f32.mrb[54].mxu0 }
 0x323   : > { %8526 = vst [vmem:[#allocation21_spill] sm:$0xff] %v7513_v14  ;;  %vm2977_vm13 = vcmp.gt.f32.partialorder %v2946_v12, 0.0  ;;  %v2993_v28 = vmul.f32 0.28507218, %v2946_v12  ;;  %v2948_v53 = vpop.f32.mrb[55].mxu0 }
 0x324   : > { %8522 = vst [vmem:[#allocation17_spill] sm:$0xff] %v7503_v46  ;;  %v1448_v49 = vpop.f32.mrb[96].mxu1  ;;  %vm2978_vm14 = vcmp.gt.f32.partialorder %v2948_v53, 0.0 }
 0x325   : > { %vm1487_vm7 = vcmp.gt.f32.partialorder %v1448_v49, 0.0  ;;  %v1503_v45 = vmul.f32 0.28507218, %v1448_v49  ;;  %v1450_v25 = vpop.f32.mrb[97].mxu1 }
 0x326   : > { %vm1488_vm8 = vcmp.gt.f32.partialorder %v1450_v25, 0.0  ;;  %v1504_v62 = vmul.f32 0.28507218, %v1450_v25  ;;  %v1452_v0 = vpop.f32.mrb[98].mxu1 }
 0x327   : > { %v1519_v1 = vsel %vm1487_vm7, %v1448_v49, %v1503_v45  ;;  %vm1489_vm9 = vcmp.gt.f32.partialorder %v1452_v0, 0.0  ;;  %v1505_v55 = vmul.f32 0.28507218, %v1452_v0  ;;  %v1454_v46 = vpop.f32.mrb[99].mxu1  ;;  %v6675_v45 = vld [vmem:[%s8482_s2 + $0x200] sm:$0xff]  }
 0x328   : > { %v1520_v7 = vsel %vm1488_vm8, %v1450_v25, %v1504_v62  ;;  %vm1490_vm10 = vcmp.gt.f32.partialorder %v1454_v46, 0.0  ;;  %v1506_v42 = vmul.f32 0.28507218, %v1454_v46  ;;  %v7520_v25 = vsel %vm2975_vm11, %v2942_v17, %v2991_v15 }
 0x329   : > { %v1521_v57 = vsel %vm1489_vm9, %v1452_v0, %v1505_v55  ;;  %8527 = vst [vmem:[#allocation22_spill] sm:$0xff] %v7520_v25  ;;  %v6676_v0 = vld [vmem:[%s8482_s2 + $0x248] sm:$0xff]   ;;  %v7525_v55 = vsel %vm2976_vm12, %v2944_v32, %v2992_v50 }
 0x32a   : > { %v1535_v31 = vpack.c.bf16 %v1521_v57, %v1519_v1  ;;  %v1522_v8 = vsel %vm1490_vm10, %v1454_v46, %v1506_v42  ;;  %8528 = vst [vmem:[#allocation23_spill] sm:$0xff] %v7525_v55  ;;  %v7527_v57 = vsel %vm2977_vm13, %v2946_v12, %v2993_v28  ;;  %v2994_v42 = vmul.f32 0.28507218, %v2948_v53  ;;  %v6677_v28 = vld [vmem:[%s8482_s2 + $0x208] sm:$0xff]   ;;  %v2952_v12 = vpop.f32.mrb[56].mxu0 }
 0x32b   : > { %v1536_v49 = vpack.c.bf16 %v1522_v8, %v1520_v7  ;;  %8529 = vst [vmem:[#allocation24_spill] sm:$0xff] %v7527_v57  ;;  %vm2979_vm0 = vcmp.gt.f32.partialorder %v2952_v12, 0.0 }
 0x32c   : > { %v1458_v62 = vpop.f32.mrb[100].mxu1  ;;  %v7529_v15 = vsel %vm2978_vm14, %v2948_v53, %v2994_v42  ;;  %v6678_v53 = vld [vmem:[%s8482_s2 + $0x250] sm:$0xff]  }
 0x32d   : > { %vm1491_vm15 = vcmp.gt.f32.partialorder %v1458_v62, 0.0  ;;  %v1507_v46 = vmul.f32 0.28507218, %v1458_v62  ;;  %v1460_v8 = vpop.f32.mrb[101].mxu1  ;;  %1704 = vmatprep.mubr.bf16.mxu1 %v1536_v49  ;;  %8530 = vst [vmem:[#allocation25_spill] sm:$0xff] %v7529_v15 }
 0x32e   : > { %vm1492_vm1 = vcmp.gt.f32.partialorder %v1460_v8, 0.0  ;;  %v1508_v1 = vmul.f32 0.28507218, %v1460_v8  ;;  %v1462_v7 = vpop.f32.mrb[102].mxu1  ;;  %1705 = vmatmul.mubr.bf16.vlgmr.msra.gmra.mrb[112].mxu1 %v1535_v31 }
 0x32f   : > { %v1523_v29 = vsel %vm1491_vm15, %v1458_v62, %v1507_v46  ;;  %vm1493_vm2 = vcmp.gt.f32.partialorder %v1462_v7, 0.0  ;;  %v1509_v32 = vmul.f32 0.28507218, %v1462_v7  ;;  %v1464_v50 = vpop.f32.mrb[103].mxu1  ;;  %5954 = vmatpush3.bf16.msra.mxu1 %v6675_v45  ;;  %v2954_v62 = vpop.f32.mrb[57].mxu0 }
 0x330   : > { %v1524_v14 = vsel %vm1492_vm1, %v1460_v8, %v1508_v1  ;;  %vm1494_vm3 = vcmp.gt.f32.partialorder %v1464_v50, 0.0  ;;  %v1510_v31 = vmul.f32 0.28507218, %v1464_v50  ;;  %5955 = vmatprep.subr.bf16.mxu1 %v6676_v0  ;;  %v2995_v45 = vmul.f32 0.28507218, %v2952_v12  ;;  %v2956_v17 = vpop.f32.mrb[58].mxu0 }
 0x331   : > { %v1525_v42 = vsel %vm1493_vm2, %v1462_v7, %v1509_v32  ;;  %vm2980_vm4 = vcmp.gt.f32.partialorder %v2954_v62, 0.0  ;;  %v2996_v46 = vmul.f32 0.28507218, %v2954_v62  ;;  %vm2981_vm5 = vcmp.gt.f32.partialorder %v2956_v17, 0.0  ;;  %v2958_v49 = vpop.f32.mrb[59].mxu0  ;;  %v6679_v0 = vld [vmem:[%s8482_s2 + $0x210] sm:$0xff]  }
 0x332   : > { %v1526_v25 = vsel %vm1494_vm3, %v1464_v50, %v1510_v31  ;;  %v1537_v57 = vpack.c.bf16 %v1525_v42, %v1523_v29  ;;  %v2997_v30 = vmul.f32 0.28507218, %v2956_v17  ;;  %v7544_v1 = vsel %vm2979_vm0, %v2952_v12, %v2995_v45  ;;  %v6680_v7 = vld [vmem:[%s8482_s2 + $0x258] sm:$0xff]  }
 0x333   : > { %5956 = vmatpush3.bf16.msra.mxu1 %v6677_v28  ;;  %v1538_v8 = vpack.c.bf16 %v1526_v25, %v1524_v14  ;;  %8531 = vst [vmem:[#allocation26_spill] sm:$0xff] %v7544_v1  ;;  %vm2982_vm6 = vcmp.gt.f32.partialorder %v2958_v49, 0.0  ;;  %v7550_v29 = vsel %vm2980_vm4, %v2954_v62, %v2996_v46  ;;  %v2998_v50 = vmul.f32 0.28507218, %v2958_v49 }
 0x334   : > { %v1468_v55 = vpop.f32.mrb[104].mxu1  ;;  %5957 = vmatprep.subr.bf16.mxu1 %v6678_v53  ;;  %8532 = vst [vmem:[#allocation27_spill] sm:$0xff] %v7550_v29  ;;  %v7552_v32 = vsel %vm2981_vm5, %v2956_v17, %v2997_v30  ;;  %v6681_v30 = vld [vmem:[%s8482_s2 + $0x218] sm:$0xff]   ;;  %v2962_v17 = vpop.f32.mrb[60].mxu0 }
 0x335   : > { %8533 = vst [vmem:[#allocation28_spill] sm:$0xff] %v7552_v32  ;;  %vm1495_vm7 = vcmp.gt.f32.partialorder %v1468_v55, 0.0  ;;  %v1511_v14 = vmul.f32 0.28507218, %v1468_v55  ;;  %v1470_v25 = vpop.f32.mrb[105].mxu1  ;;  %1712 = vmatprep.mubr.bf16.mxu1 %v1538_v8  ;;  %v7554_v31 = vsel %vm2982_vm6, %v2958_v49, %v2998_v50  ;;  %vm2983_vm11 = vcmp.gt.f32.partialorder %v2962_v17, 0.0 }
 0x336   : > { %vm1496_vm8 = vcmp.gt.f32.partialorder %v1470_v25, 0.0  ;;  %v1512_v28 = vmul.f32 0.28507218, %v1470_v25  ;;  %v1472_v12 = vpop.f32.mrb[106].mxu1  ;;  %1713 = vmatmul.mubr.bf16.gmra.mrb[116].mxu1 %v1537_v57  ;;  %8534 = vst [vmem:[#allocation29_spill] sm:$0xff] %v7554_v31  ;;  %v2964_v49 = vpop.f32.mrb[61].mxu0 }
 0x337   : > { %v1527_v42 = vsel %vm1495_vm7, %v1468_v55, %v1511_v14  ;;  %vm1497_vm9 = vcmp.gt.f32.partialorder %v1472_v12, 0.0  ;;  %v1513_v62 = vmul.f32 0.28507218, %v1472_v12  ;;  %v1474_v45 = vpop.f32.mrb[107].mxu1  ;;  %5958 = vmatpush3.bf16.msra.mxu1 %v6679_v0  ;;  %v6682_v55 = vld [vmem:[%s8482_s2 + $0x260] sm:$0xff]   ;;  %vm2984_vm12 = vcmp.gt.f32.partialorder %v2964_v49, 0.0 }
 0x338   : > { %v1528_v8 = vsel %vm1496_vm8, %v1470_v25, %v1512_v28  ;;  %vm1498_vm10 = vcmp.gt.f32.partialorder %v1474_v45, 0.0  ;;  %v1514_v57 = vmul.f32 0.28507218, %v1474_v45  ;;  %5959 = vmatprep.subr.bf16.mxu1 %v6680_v7  ;;  %v2999_v0 = vmul.f32 0.28507218, %v2962_v17  ;;  %v2966_v53 = vpop.f32.mrb[62].mxu0 }
 0x339   : > { %v1529_v50 = vsel %vm1497_vm9, %v1472_v12, %v1513_v62  ;;  %v3000_v14 = vmul.f32 0.28507218, %v2964_v49  ;;  %vm2985_vm13 = vcmp.gt.f32.partialorder %v2966_v53, 0.0  ;;  %v3001_v15 = vmul.f32 0.28507218, %v2966_v53  ;;  %v2968_v46 = vpop.f32.mrb[63].mxu0 }
 0x33a   : > { %v1530_v1 = vsel %vm1498_vm10, %v1474_v45, %v1514_v57  ;;  %v1539_v32 = vpack.c.bf16 %v1529_v50, %v1527_v42  ;;  %v6683_v7 = vld [vmem:[%s8482_s2 + $0x220] sm:$0xff]   ;;  %v7569_v28 = vsel %vm2983_vm11, %v2962_v17, %v2999_v0  ;;  %vm2986_vm14 = vcmp.gt.f32.partialorder %v2968_v46, 0.0  ;;  %v6684_v12 = vld [vmem:[%s8482_s2 + $0x268] sm:$0xff]  }
 0x33b   : > { %5960 = vmatpush3.bf16.msra.mxu1 %v6681_v30  ;;  %v1540_v25 = vpack.c.bf16 %v1530_v1, %v1528_v8  ;;  %8535 = vst [vmem:[#allocation30_spill] sm:$0xff] %v7569_v28  ;;  %v7575_v42 = vsel %vm2984_vm12, %v2964_v49, %v3000_v14  ;;  %v7577_v62 = vsel %vm2985_vm13, %v2966_v53, %v3001_v15  ;;  %v3002_v45 = vmul.f32 0.28507218, %v2968_v46  ;;  %v6685_v15 = vld [vmem:[%s8482_s2 + $0x228] sm:$0xff]   ;;  %v3303_v53 = vpop.f32.mrb[64].mxu0 }
 0x33c   : > { %v1478_v29 = vpop.f32.mrb[108].mxu1  ;;  %5961 = vmatprep.subr.bf16.mxu1 %v6682_v55  ;;  %8536 = vst [vmem:[#allocation31_spill] sm:$0xff] %v7577_v62  ;;  %vm3342_vm0 = vcmp.gt.f32.partialorder %v3303_v53, 0.0 }
 0x33d   : > { %vm1499_vm15 = vcmp.gt.f32.partialorder %v1478_v29, 0.0  ;;  %v1515_v1 = vmul.f32 0.28507218, %v1478_v29  ;;  %v1480_v30 = vpop.f32.mrb[109].mxu1  ;;  %1720 = vmatprep.mubr.bf16.mxu1 %v1540_v25  ;;  %v7579_v57 = vsel %vm2986_vm14, %v2968_v46, %v3002_v45  ;;  %v3305_v46 = vpop.f32.mrb[65].mxu0 }
 0x33e   : > { %vm1500_vm1 = vcmp.gt.f32.partialorder %v1480_v30, 0.0  ;;  %v1516_v17 = vmul.f32 0.28507218, %v1480_v30  ;;  %v1482_v8 = vpop.f32.mrb[110].mxu1  ;;  %1721 = vmatmul.mubr.bf16.gmra.mrb[120].mxu1 %v1539_v32  ;;  %vm3343_vm4 = vcmp.gt.f32.partialorder %v3305_v46, 0.0  ;;  %v3307_v55 = vpop.f32.mrb[66].mxu0 }
 0x33f   : > { %v1531_v50 = vsel %vm1499_vm15, %v1478_v29, %v1515_v1  ;;  %vm1501_vm2 = vcmp.gt.f32.partialorder %v1482_v8, 0.0  ;;  %v1517_v49 = vmul.f32 0.28507218, %v1482_v8  ;;  %v1484_v0 = vpop.f32.mrb[111].mxu1  ;;  %5962 = vmatpush3.bf16.msra.mxu1 %v6683_v7  ;;  %v6686_v29 = vld [vmem:[%s8482_s2 + $0x270] sm:$0xff]   ;;  %vm3344_vm5 = vcmp.gt.f32.partialorder %v3307_v55, 0.0 }
 0x340   : > { %v1532_v25 = vsel %vm1500_vm1, %v1480_v30, %v1516_v17  ;;  %vm1502_vm3 = vcmp.gt.f32.partialorder %v1484_v0, 0.0  ;;  %v1518_v32 = vmul.f32 0.28507218, %v1484_v0  ;;  %5963 = vmatprep.subr.bf16.mxu1 %v6684_v12  ;;  %v3358_v7 = vmul.f32 0.28507218, %v3303_v53  ;;  %v3309_v14 = vpop.f32.mrb[67].mxu0 }
 0x341   : > { %v1533_v45 = vsel %vm1501_vm2, %v1482_v8, %v1517_v49  ;;  %v3359_v1 = vmul.f32 0.28507218, %v3305_v46  ;;  %v3360_v31 = vmul.f32 0.28507218, %v3307_v55  ;;  %v6687_v12 = vld [vmem:[%s8482_s2 + $0x230] sm:$0xff]   ;;  %vm3345_vm6 = vcmp.gt.f32.partialorder %v3309_v14, 0.0 }
 0x342   : > { %v1534_v28 = vsel %vm1502_vm3, %v1484_v0, %v1518_v32  ;;  %v1541_v62 = vpack.c.bf16 %v1533_v45, %v1531_v50  ;;  %v7594_v17 = vsel %vm3342_vm0, %v3303_v53, %v3358_v7  ;;  %v6688_v8 = vld [vmem:[%s8482_s2 + $0x278] sm:$0xff]   ;;  %v3361_v0 = vmul.f32 0.28507218, %v3309_v14  ;;  %v3313_v32 = vpop.f32.mrb[68].mxu0  ;;  %v6691_v45 = vld [vmem:[%s8482_s2 + $0x280] sm:$0xff]  }
 0x343   : > { %5964 = vmatpush3.bf16.msra.mxu1 %v6685_v15  ;;  %v1542_v30 = vpack.c.bf16 %v1534_v28, %v1532_v25  ;;  %v7599_v49 = vsel %vm3343_vm4, %v3305_v46, %v3359_v1  ;;  %v7601_v50 = vsel %vm3344_vm5, %v3307_v55, %v3360_v31  ;;  %v8537_v53 = vpack.c.bf16 %v7345_v18, %v7339_v4  ;;  %v6689_v25 = vld [vmem:[%s8482_s2 + $0x238] sm:$0xff]  }
 0x344   : > { %5965 = vmatprep.subr.bf16.mxu1 %v6686_v29  ;;  %v3390_v28 = vpack.c.bf16 %v7601_v50, %v7594_v17  ;;  %v7605_v15 = vsel %vm3345_vm6, %v3309_v14, %v3361_v0  ;;  %vm3346_vm7 = vcmp.gt.f32.partialorder %v3313_v32, 0.0  ;;  %v3362_v55 = vmul.f32 0.28507218, %v3313_v32  ;;  %v3315_v14 = vpop.f32.mrb[69].mxu0 }
 0x345   : > { %1728 = vmatprep.mubr.bf16.mxu1 %v1542_v30  ;;  %v3391_v31 = vpack.c.bf16 %v7605_v15, %v7599_v49  ;;  %vm3347_vm8 = vcmp.gt.f32.partialorder %v3315_v14, 0.0  ;;  %v3363_v29 = vmul.f32 0.28507218, %v3315_v14  ;;  %v3317_v4 = vpop.f32.mrb[70].mxu0 }
 0x346   : > { %1729 = vmatmul.mubr.bf16.gmra.mrb[124].mxu1 %v1541_v62  ;;  %v6690_v62 = vld [vmem:[%s8482_s2 + $0x2c0] sm:$0xff]   ;;  %vm3348_vm9 = vcmp.gt.f32.partialorder %v3317_v4, 0.0  ;;  %v3364_v18 = vmul.f32 0.28507218, %v3317_v4  ;;  %v3319_v46 = vpop.f32.mrb[71].mxu0  ;;  %v7621_v7 = vsel %vm3346_vm7, %v3313_v32, %v3362_v55  ;;  %v6693_v55 = vld [vmem:[%s8482_s2 + $0x288] sm:$0xff]  }
 0x347   : > { %5966 = vmatpush3.bf16.msra.mxu1 %v6687_v12  ;;  %2075 = vmatprep.mubr.bf16.mxu1 %v8537_v53  ;;  %v7623_v1 = vsel %vm3347_vm8, %v3315_v14, %v3363_v29  ;;  %vm3349_vm10 = vcmp.gt.f32.partialorder %v3319_v46, 0.0  ;;  %v3365_v30 = vmul.f32 0.28507218, %v3319_v46  ;;  %v6692_v12 = vld [vmem:[%s8482_s2 + $0x2c8] sm:$0xff]   ;;  %v8538_v53 = vpack.c.bf16 %v7341_v6, %v7337_v3  ;;  %v3323_v14 = vpop.f32.mrb[72].mxu0  ;;  %v6694_v3 = vld [vmem:[%s8482_s2 + $0x2d0] sm:$0xff]  }
 0x348   : > { %5967 = vmatprep.subr.bf16.mxu1 %v6688_v8  ;;  %v7628_v8 = vsel %vm3348_vm9, %v3317_v4, %v3364_v18  ;;  %v3366_v6 = vmul.f32 0.28507218, %v3323_v14  ;;  %v3325_v29 = vpop.f32.mrb[73].mxu0  ;;  %vm3350_vm11 = vcmp.gt.f32.partialorder %v3323_v14, 0.0 }
 0x349   : > { %v7630_v0 = vsel %vm3349_vm10, %v3319_v46, %v3365_v30  ;;  %v3392_v32 = vpack.c.bf16 %v7628_v8, %v7621_v7  ;;  %v3327_v4 = vpop.f32.mrb[74].mxu0  ;;  %v6696_v46 = vld [vmem:[%s8482_s2 + $0x2d8] sm:$0xff]   ;;  %vm3351_vm13 = vcmp.gt.f32.partialorder %v3325_v29, 0.0  ;;  %v8591_v8 = vld [vmem:[#allocation4_spill] sm:$0xff] }
 0x34a   : > { %vm3352_vm12 = vcmp.gt.f32.partialorder %v3327_v4, 0.0  ;;  %v3368_v18 = vmul.f32 0.28507218, %v3327_v4 }
 0x34b   : > { %5968 = vmatpush3.bf16.msra.mxu1 %v6689_v25  ;;  %v3393_v25 = vpack.c.bf16 %v7630_v0, %v7623_v1 }
 0x34c   : > { %5993 = vmatprep.subr.bf16.mxu1 %v6690_v62  ;;  %v8539_v62 = vpack.c.bf16 %v7355_v27, %v7351_v24  ;;  %v6695_v24 = vld [vmem:[%s8482_s2 + $0x290] sm:$0xff]   ;;  %v3367_v27 = vmul.f32 0.28507218, %v3325_v29  ;;  %v7656_v30 = vsel %vm3352_vm12, %v3327_v4, %v3368_v18 }
 0x34e   : > { %2076 = vmatmul.mubr.bf16.vlgmr.msra.gmra.mrb[128].mxu1 %v8538_v53  ;;  %v3329_v53 = vpop.f32.mrb[75].mxu0 }
 0x34f   : > { %5994 = vmatpush3.bf16.msra.mxu1 %v6691_v45  ;;  %2083 = vmatprep.mubr.bf16.mxu1 %v8539_v62  ;;  %v7654_v45 = vsel %vm3350_vm11, %v3323_v14, %v3366_v6  ;;  %v8541_v62 = vpack.c.bf16 %v7367_v44, %v7363_v35  ;;  %vm3353_vm14 = vcmp.gt.f32.partialorder %v3329_v53, 0.0  ;;  %v3369_v14 = vmul.f32 0.28507218, %v3329_v53  ;;  %v6699_v44 = vld [vmem:[%s8482_s2 + $0x2a0] sm:$0xff]   ;;  %v3333_v4 = vpop.f32.mrb[76].mxu0 }
 0x350   : > { %5995 = vmatprep.subr.bf16.mxu1 %v6692_v12  ;;  %v8540_v12 = vpack.c.bf16 %v7353_v26, %v7349_v23  ;;  %v3394_v6 = vpack.c.bf16 %v7656_v30, %v7654_v45  ;;  %v6698_v23 = vld [vmem:[%s8482_s2 + $0x2e0] sm:$0xff]   ;;  %vm3354_vm15 = vcmp.gt.f32.partialorder %v3333_v4, 0.0  ;;  %v3370_v18 = vmul.f32 0.28507218, %v3333_v4 }
 0x351   : > { %v7674_v26 = vsel %vm3353_vm14, %v3329_v53, %v3369_v14  ;;  %v8543_v53 = vpack.c.bf16 %v7379_v63, %v7375_v60 }
 0x353   : > { %5996 = vmatpush3.bf16.msra.mxu1 %v6693_v55  ;;  %v6697_v55 = vld [vmem:[%s8482_s2 + $0x298] sm:$0xff]  }
 0x354   : > { %5997 = vmatprep.subr.bf16.mxu1 %v6694_v3  ;;  %v7667_v3 = vsel %vm3351_vm13, %v3325_v29, %v3367_v27  ;;  %v6700_v29 = vld [vmem:[%s8482_s2 + $0x2e8] sm:$0xff]   ;;  %v8542_v27 = vpack.c.bf16 %v7365_v37, %v7361_v34  ;;  %v6702_v34 = vld [vmem:[%s8482_s2 + $0x2f0] sm:$0xff]  }
 0x355   : > { %v3395_v35 = vpack.c.bf16 %v7674_v26, %v7667_v3 }
 0x356   : > { %2084 = vmatmul.mubr.bf16.gmra.mrb[132].mxu1 %v8540_v12 }
 0x357   : > { %5998 = vmatpush3.bf16.msra.mxu1 %v6695_v24  ;;  %2091 = vmatprep.mubr.bf16.mxu1 %v8541_v62  ;;  %v3335_v24 = vpop.f32.mrb[77].mxu0  ;;  %v6701_v62 = vld [vmem:[%s8482_s2 + $0x2a8] sm:$0xff]  }
 0x358   : > { %5999 = vmatprep.subr.bf16.mxu1 %v6696_v46  ;;  %vm3355_vm1 = vcmp.gt.f32.partialorder %v3335_v24, 0.0  ;;  %v3371_v46 = vmul.f32 0.28507218, %v3335_v24  ;;  %v3337_v12 = vpop.f32.mrb[78].mxu0 }
 0x359   : > { %vm3356_vm2 = vcmp.gt.f32.partialorder %v3337_v12, 0.0  ;;  %v3372_v14 = vmul.f32 0.28507218, %v3337_v12 }
 0x35a   : > { %v7698_v37 = vsel %vm3355_vm1, %v3335_v24, %v3371_v46  ;;  %v6704_v24 = vld [vmem:[%s8482_s2 + $0x2f8] sm:$0xff]   ;;  %v8545_v46 = vpack.c.bf16 %v7393_v13, %v7387_v19  ;;  %v8546_v19 = vpack.c.bf16 %v7389_v22, %v7385_v56  ;;  %v8547_v13 = vpack.c.bf16 %v7403_v47, %v7399_v33  ;;  %v6711_v56 = vld [vmem:[%s8482_s2 + $0x310] sm:$0xff]  }
 0x35b   : > { %6000 = vmatpush3.bf16.msra.mxu1 %v6697_v55  ;;  %v7693_v55 = vsel %vm3354_vm15, %v3333_v4, %v3370_v18  ;;  %v7700_v60 = vsel %vm3356_vm2, %v3337_v12, %v3372_v14  ;;  %v6705_v12 = vld [vmem:[%s8482_s2 + $0x2b8] sm:$0xff]   ;;  %v6710_v14 = vld [vmem:[%s8482_s2 + $0x350] sm:$0xff]   ;;  %v8548_v33 = vpack.c.bf16 %v7401_v2, %v7397_v38  ;;  %v8549_v47 = vpack.c.bf16 %v7415_v21, %v7411_v54  ;;  %v6715_v38 = vld [vmem:[%s8482_s2 + $0x320] sm:$0xff]  }
 0x35c   : > { %6001 = vmatprep.subr.bf16.mxu1 %v6698_v23  ;;  %v3339_v23 = vpop.f32.mrb[79].mxu0  ;;  %v3396_v4 = vpack.c.bf16 %v7700_v60, %v7693_v55  ;;  %v6712_v22 = vld [vmem:[%s8482_s2 + $0x358] sm:$0xff]   ;;  %v6716_v2 = vld [vmem:[%s8482_s2 + $0x368] sm:$0xff]   ;;  %v8550_v54 = vpack.c.bf16 %v7413_v5, %v7409_v52  ;;  %v8551_v21 = vpack.c.bf16 %v7427_v41, %v7423_v58  ;;  %v6719_v52 = vld [vmem:[%s8482_s2 + $0x330] sm:$0xff]   ;;  %v8552_v58 = vpack.c.bf16 %v7425_v39, %v7421_v51 }
 0x35d   : > { %vm3357_vm3 = vcmp.gt.f32.partialorder %v3339_v23, 0.0  ;;  %v6720_v5 = vld [vmem:[%s8482_s2 + $0x378] sm:$0xff]   ;;  %v8553_v41 = vpack.c.bf16 %v7441_v11, %v7435_v36  ;;  %v6723_v51 = vld [vmem:[%s8482_s2 + $0x380] sm:$0xff]   ;;  %v6724_v11 = vld [vmem:[%s8482_s2 + $0x3c8] sm:$0xff]   ;;  %v8554_v39 = vpack.c.bf16 %v7437_v43, %v7433_v40  ;;  %v8555_v36 = vpack.c.bf16 %v7457_v16, %v7453_v48 }
 0x35e   : > { %2092 = vmatmul.mubr.bf16.gmra.mrb[136].mxu1 %v8542_v27  ;;  %v8544_v27 = vpack.c.bf16 %v7377_v61, %v7373_v59  ;;  %v6707_v59 = vld [vmem:[%s8482_s2 + $0x300] sm:$0xff]   ;;  %v6708_v61 = vld [vmem:[%s8482_s2 + $0x348] sm:$0xff]   ;;  %v6727_v43 = vld [vmem:[%s8482_s2 + $0x390] sm:$0xff]   ;;  %v8556_v40 = vpack.c.bf16 %v7455_v9, %v7451_v10 }
 0x35f   : > { %6002 = vmatpush3.bf16.msra.mxu1 %v6699_v44  ;;  %2099 = vmatprep.mubr.bf16.mxu1 %v8543_v53  ;;  %v3373_v44 = vmul.f32 0.28507218, %v3339_v23  ;;  %v6706_v53 = vld [vmem:[%s8482_s2 + $0x340] sm:$0xff]   ;;  %v6728_v48 = vld [vmem:[%s8482_s2 + $0x3d8] sm:$0xff]   ;;  %v8557_v16 = vld [vmem:[#allocation8_spill] sm:$0xff] }
 0x360   : > { %6003 = vmatprep.subr.bf16.mxu1 %v6700_v29  ;;  %v6703_v29 = vld [vmem:[%s8482_s2 + $0x2b0] sm:$0xff]   ;;  %v6731_v10 = vld [vmem:[%s8482_s2 + $0x3a0] sm:$0xff]   ;;  %v8593_v55 = vld [vmem:[#allocation6_spill] sm:$0xff] }
 0x361   : > { %v7702_v63 = vsel %vm3357_vm3, %v3339_v23, %v3373_v44  ;;  %v6713_v23 = vld [vmem:[%s8482_s2 + $0x318] sm:$0xff]   ;;  %v6717_v44 = vld [vmem:[%s8482_s2 + $0x328] sm:$0xff]   ;;  %v8559_v9 = vld [vmem:[#allocation9_spill] sm:$0xff] }
 0x362   : > { %v3397_v18 = vpack.c.bf16 %v7702_v63, %v7698_v37 }
 0x363   : > { %6004 = vmatpush3.bf16.msra.mxu1 %v6701_v62  ;;  %v6709_v62 = vld [vmem:[%s8482_s2 + $0x308] sm:$0xff]  }
 0x364   : > { %6005 = vmatprep.subr.bf16.mxu1 %v6702_v34  ;;  %v6714_v34 = vld [vmem:[%s8482_s2 + $0x360] sm:$0xff]  }
 0x366   : > { %2100 = vmatmul.mubr.bf16.gmra.mrb[140].mxu1 %v8544_v27  ;;  %v6722_v27 = vld [vmem:[%s8482_s2 + $0x3c0] sm:$0xff]  }
 0x367   : > { %6006 = vmatpush3.bf16.msra.mxu1 %v6703_v29  ;;  %2446 = vmatprep.mubr.bf16.mxu1 %v8545_v46  ;;  %v6718_v29 = vld [vmem:[%s8482_s2 + $0x370] sm:$0xff]   ;;  %v6725_v46 = vld [vmem:[%s8482_s2 + $0x388] sm:$0xff]  }
 0x368   : > { %6007 = vmatprep.subr.bf16.mxu1 %v6704_v24  ;;  %v6721_v24 = vld [vmem:[%s8482_s2 + $0x338] sm:$0xff]  }
 0x36b   : > { %6008 = vmatpush3.bf16.msra.mxu1 %v6705_v12  ;;  %v6726_v12 = vld [vmem:[%s8482_s2 + $0x3d0] sm:$0xff]  }
 0x36c   : > { %6033 = vmatprep.subr.bf16.mxu1 %v6706_v53  ;;  %v8558_v53 = vpack.c.bf16 %v7475_v20, %v8557_v16  ;;  %v6732_v20 = vld [vmem:[%s8482_s2 + $0x3e8] sm:$0xff]  }
 0x36e   : > { %2447 = vmatmul.mubr.bf16.vlgmr.msra.gmra.mrb[144].mxu1 %v8546_v19  ;;  %v8560_v19 = vld [vmem:[#allocation7_spill] sm:$0xff] }
 0x36f   : > { %6034 = vmatpush3.bf16.msra.mxu1 %v6707_v59  ;;  %2454 = vmatprep.mubr.bf16.mxu1 %v8547_v13  ;;  %v6729_v59 = vld [vmem:[%s8482_s2 + $0x398] sm:$0xff]   ;;  %v8561_v13 = vpack.c.bf16 %v8559_v9, %v8560_v19  ;;  %v6747_v9 = vld [vmem:[%s8482_s2 + $0x420] sm:$0xff]   ;;  %v6748_v19 = vld [vmem:[%s8482_s2 + $0x468] sm:$0xff]  }
 0x370   : > { %6035 = vmatprep.subr.bf16.mxu1 %v6708_v61  ;;  %v6730_v61 = vld [vmem:[%s8482_s2 + $0x3e0] sm:$0xff]  }
 0x373   : > { %6036 = vmatpush3.bf16.msra.mxu1 %v6709_v62  ;;  %v8562_v62 = vld [vmem:[#allocation15_spill] sm:$0xff] }
 0x374   : > { %6037 = vmatprep.subr.bf16.mxu1 %v6710_v14  ;;  %v8563_v14 = vld [vmem:[#allocation13_spill] sm:$0xff] }
 0x376   : > { %2455 = vmatmul.mubr.bf16.gmra.mrb[148].mxu1 %v8548_v33  ;;  %v6734_v33 = vld [vmem:[%s8482_s2 + $0x3f0] sm:$0xff]  }
 0x377   : > { %6038 = vmatpush3.bf16.msra.mxu1 %v6711_v56  ;;  %2462 = vmatprep.mubr.bf16.mxu1 %v8549_v47  ;;  %v8564_v56 = vpack.c.bf16 %v8562_v62, %v8563_v14  ;;  %v6735_v47 = vld [vmem:[%s8482_s2 + $0x3b0] sm:$0xff]   ;;  %v8584_v62 = vld [vmem:[#allocation26_spill] sm:$0xff] }
 0x378   : > { %6039 = vmatprep.subr.bf16.mxu1 %v6712_v22  ;;  %v6733_v22 = vld [vmem:[%s8482_s2 + $0x3a8] sm:$0xff]  }
 0x37b   : > { %6040 = vmatpush3.bf16.msra.mxu1 %v6713_v23  ;;  %v6736_v23 = vld [vmem:[%s8482_s2 + $0x3f8] sm:$0xff]  }
 0x37c   : > { %6041 = vmatprep.subr.bf16.mxu1 %v6714_v34  ;;  %v8565_v34 = vld [vmem:[#allocation14_spill] sm:$0xff] }
 0x37e   : > { %2463 = vmatmul.mubr.bf16.gmra.mrb[152].mxu1 %v8550_v54  ;;  %v8568_v54 = vld [vmem:[#allocation21_spill] sm:$0xff] }
 0x37f   : > { %6042 = vmatpush3.bf16.msra.mxu1 %v6715_v38  ;;  %2470 = vmatprep.mubr.bf16.mxu1 %v8551_v21  ;;  %v8566_v38 = vld [vmem:[#allocation12_spill] sm:$0xff]  ;;  %v8569_v21 = vld [vmem:[#allocation19_spill] sm:$0xff] }
 0x380   : > { %6043 = vmatprep.subr.bf16.mxu1 %v6716_v2  ;;  %v8567_v2 = vpack.c.bf16 %v8565_v34, %v8566_v38  ;;  %v6753_v38 = vld [vmem:[%s8482_s2 + $0x438] sm:$0xff]  }
 0x383   : > { %6044 = vmatpush3.bf16.msra.mxu1 %v6717_v44  ;;  %v8570_v44 = vpack.c.bf16 %v8568_v54, %v8569_v21  ;;  %v8594_v21 = vld [vmem:[#allocation10_spill] sm:$0xff] }
 0x384   : > { %6045 = vmatprep.subr.bf16.mxu1 %v6718_v29  ;;  %v6737_v29 = vld [vmem:[%s8482_s2 + $0x3b8] sm:$0xff]  }
 0x386   : > { %2471 = vmatmul.mubr.bf16.gmra.mrb[156].mxu1 %v8552_v58  ;;  %v6740_v58 = vld [vmem:[%s8482_s2 + $0x448] sm:$0xff]  }
 0x387   : > { %6046 = vmatpush3.bf16.msra.mxu1 %v6719_v52  ;;  %2817 = vmatprep.mubr.bf16.mxu1 %v8553_v41  ;;  %v6738_v52 = vld [vmem:[%s8482_s2 + $0x440] sm:$0xff]   ;;  %v8571_v41 = vld [vmem:[#allocation20_spill] sm:$0xff] }
 0x388   : > { %6047 = vmatprep.subr.bf16.mxu1 %v6720_v5  ;;  %v6739_v5 = vld [vmem:[%s8482_s2 + $0x400] sm:$0xff]  }
 0x38b   : > { %6048 = vmatpush3.bf16.msra.mxu1 %v6721_v24  ;;  %v8572_v24 = vld [vmem:[#allocation18_spill] sm:$0xff] }
 0x38c   : > { %6073 = vmatprep.subr.bf16.mxu1 %v6722_v27  ;;  %v8573_v27 = vpack.c.bf16 %v8571_v41, %v8572_v24 }
 0x38e   : > { %2818 = vmatmul.mubr.bf16.vlgmr.msra.gmra.mrb[160].mxu1 %v8554_v39 }
 0x38f   : > { %6074 = vmatpush3.bf16.msra.mxu1 %v6723_v51  ;;  %2825 = vmatprep.mubr.bf16.mxu1 %v8555_v36  ;;  %v8574_v51 = vld [vmem:[#allocation25_spill] sm:$0xff]  ;;  %v6741_v36 = vld [vmem:[%s8482_s2 + $0x408] sm:$0xff]  }
 0x390   : > { %6075 = vmatprep.subr.bf16.mxu1 %v6724_v11  ;;  %v8575_v11 = vld [vmem:[#allocation23_spill] sm:$0xff] }
 0x391   : > { %v8576_v39 = vpack.c.bf16 %v8574_v51, %v8575_v11  ;;  %v6756_v11 = vld [vmem:[%s8484_s4 + $0x50] sm:$0xff]  }
 0x393   : > { %6076 = vmatpush3.bf16.msra.mxu1 %v6725_v46  ;;  %v6742_v46 = vld [vmem:[%s8482_s2 + $0x450] sm:$0xff]  }
 0x394   : > { %6077 = vmatprep.subr.bf16.mxu1 %v6726_v12  ;;  %v6743_v12 = vld [vmem:[%s8482_s2 + $0x410] sm:$0xff]  }
 0x396   : > { %2826 = vmatmul.mubr.bf16.gmra.mrb[164].mxu1 %v8556_v40  ;;  %v8578_v40 = vld [vmem:[#allocation22_spill] sm:$0xff] }
 0x397   : > { %6078 = vmatpush3.bf16.msra.mxu1 %v6727_v43  ;;  %2833 = vmatprep.mubr.bf16.mxu1 %v8558_v53  ;;  %v6744_v43 = vld [vmem:[%s8482_s2 + $0x458] sm:$0xff]   ;;  %v8580_v53 = vld [vmem:[#allocation29_spill] sm:$0xff] }
 0x398   : > { %6079 = vmatprep.subr.bf16.mxu1 %v6728_v48  ;;  %v8577_v48 = vld [vmem:[#allocation24_spill] sm:$0xff] }
 0x399   : > { %v8579_v16 = vpack.c.bf16 %v8577_v48, %v8578_v40  ;;  %v6757_v40 = vld [vmem:[%s8484_s4 + $0x58] sm:$0xff]  }
 0x39b   : > { %6080 = vmatpush3.bf16.msra.mxu1 %v6729_v59  ;;  %v8581_v59 = vld [vmem:[#allocation27_spill] sm:$0xff] }
 0x39c   : > { %6081 = vmatprep.subr.bf16.mxu1 %v6730_v61  ;;  %v8582_v61 = vpack.c.bf16 %v8580_v53, %v8581_v59 }
 0x39e   : > { %2834 = vmatmul.mubr.bf16.gmra.mrb[168].mxu1 %v8561_v13  ;;  %v8583_v13 = vld [vmem:[#allocation28_spill] sm:$0xff] }
 0x39f   : > { %6082 = vmatpush3.bf16.msra.mxu1 %v6731_v10  ;;  %2841 = vmatprep.mubr.bf16.mxu1 %v8564_v56  ;;  %v6745_v10 = vld [vmem:[%s8482_s2 + $0x418] sm:$0xff]   ;;  %v8585_v14 = vpack.c.bf16 %v8583_v13, %v8584_v62  ;;  %v8586_v56 = vpack.c.bf16 %v7579_v57, %v7575_v42  ;;  %v8587_v57 = vld [vmem:[#allocation31_spill] sm:$0xff] }
 0x3a0   : > { %6083 = vmatprep.subr.bf16.mxu1 %v6732_v20  ;;  %v6746_v20 = vld [vmem:[%s8482_s2 + $0x460] sm:$0xff]   ;;  %v6752_v42 = vld [vmem:[%s8482_s2 + $0x478] sm:$0xff]  }
 0x3a3   : > { %6084 = vmatpush3.bf16.msra.mxu1 %v6733_v22  ;;  %v6749_v22 = vld [vmem:[%s8482_s2 + $0x428] sm:$0xff]  }
 0x3a4   : > { %6085 = vmatprep.subr.bf16.mxu1 %v6734_v33  ;;  %v6750_v33 = vld [vmem:[%s8482_s2 + $0x470] sm:$0xff]  }
 0x3a6   : > { %2842 = vmatmul.mubr.bf16.gmra.mrb[172].mxu1 %v8567_v2  ;;  %v6754_v2 = vld [vmem:[%s8484_s4 + $0x40] sm:$0xff]  }
 0x3a7   : > { %6086 = vmatpush3.bf16.msra.mxu1 %v6735_v47  ;;  %3188 = vmatprep.mubr.bf16.mxu1 %v8570_v44  ;;  %v6751_v47 = vld [vmem:[%s8482_s2 + $0x430] sm:$0xff]  }
 0x3a8   : > { %6087 = vmatprep.subr.bf16.mxu1 %v6736_v23  ;;  %v8588_v23 = vld [vmem:[#allocation30_spill] sm:$0xff]  ;;  %6261 = vmatprep.subr.bf16.mxu0 %v6754_v2 }
 0x3a9   : > { %v8589_v34 = vpack.c.bf16 %v8587_v57, %v8588_v23  ;;  %6262 = vmatpush3.bf16.msra.mxu0 %v6754_v2 }
 0x3ab   : > { %6088 = vmatpush3.bf16.msra.mxu1 %v6737_v29 }
 0x3ac   : > { %6113 = vmatprep.subr.bf16.mxu1 %v6738_v52  ;;  %v8595_v52 = vld [vmem:[#allocation11_spill] sm:$0xff] }
 0x3ae   : > { %3189 = vmatmul.mubr.bf16.vlgmr.msra.gmra.mrb[176].mxu1 %v8573_v27 }
 0x3af   : > { %6114 = vmatpush3.bf16.msra.mxu1 %v6739_v5  ;;  %3196 = vmatprep.mubr.bf16.mxu1 %v8576_v39 }
 0x3b0   : > { %6115 = vmatprep.subr.bf16.mxu1 %v6740_v58  ;;  %v6755_v58 = vld [vmem:[%s8484_s4 + $0x48] sm:$0xff]  }
 0x3b1   : > { %6263 = vmatprep.subr.bf16.mxu0 %v6755_v58 }
 0x3b2   : > { %6264 = vmatpush3.bf16.msra.mxu0 %v6755_v58  ;;  %v8087_v58 = vld [vmem:[%s8484_s4 + $0x230] sm:$0xff]  }
 0x3b3   : > { %6116 = vmatpush3.bf16.msra.mxu1 %v6741_v36  ;;  %v8596_v36 = vld [vmem:[#allocation16_spill] sm:$0xff]  ;;  %6265 = vmatprep.subr.bf16.mxu0 %v6756_v11 }
 0x3b4   : > { %6117 = vmatprep.subr.bf16.mxu1 %v6742_v46 }
 0x3b6   : > { %3197 = vmatmul.mubr.bf16.gmra.mrb[180].mxu1 %v8579_v16  ;;  %6266 = vmatpush3.bf16.msra.mxu0 %v6756_v11 }
 0x3b7   : > { %6118 = vmatpush3.bf16.msra.mxu1 %v6743_v12  ;;  %3204 = vmatprep.mubr.bf16.mxu1 %v8582_v61 }
 0x3b8   : > { %6119 = vmatprep.subr.bf16.mxu1 %v6744_v43  ;;  %v8597_v43 = vld [vmem:[#allocation17_spill] sm:$0xff]  ;;  %6267 = vmatprep.subr.bf16.mxu0 %v6757_v40 }
 0x3ba   : > { %6268 = vmatpush3.bf16.msra.mxu0 %v6757_v40 }
 0x3bb   : > { %6120 = vmatpush3.bf16.msra.mxu1 %v6745_v10  ;;  %v6758_v10 = vld [vmem:[%s8484_s4 + $0x60] sm:$0xff]  }
 0x3bc   : > { %6121 = vmatprep.subr.bf16.mxu1 %v6746_v20  ;;  %6269 = vmatprep.subr.bf16.mxu0 %v6758_v10 }
 0x3be   : > { %3205 = vmatmul.mubr.bf16.gmra.mrb[184].mxu1 %v8585_v14  ;;  %6270 = vmatpush3.bf16.msra.mxu0 %v6758_v10  ;;  %v6760_v14 = vld [vmem:[%s8484_s4 + $0x68] sm:$0xff]  }
 0x3bf   : > { %6122 = vmatpush3.bf16.msra.mxu1 %v6747_v9  ;;  %3212 = vmatprep.mubr.bf16.mxu1 %v8586_v56  ;;  %v6839_v9 = vmov 0.0  }
 0x3c0   : > { %6123 = vmatprep.subr.bf16.mxu1 %v6748_v19  ;;  %3641 = vst [vmem:[#allocation2 + $0x10] sm:$0xff] %v6839_v9  ;;  %3642 = vst [vmem:[#allocation2 + $0x18] sm:$0xff] %v6839_v9  ;;  %6271 = vmatprep.subr.bf16.mxu0 %v6760_v14 }
 0x3c1   : > { %3639 = vst [vmem:[#allocation2] sm:$0xff] %v6839_v9  ;;  %3640 = vst [vmem:[#allocation2 + $0x8] sm:$0xff] %v6839_v9 }
 0x3c2   : > { %3643 = vst [vmem:[#allocation2 + $0x20] sm:$0xff] %v6839_v9  ;;  %3644 = vst [vmem:[#allocation2 + $0x28] sm:$0xff] %v6839_v9  ;;  %6272 = vmatpush3.bf16.msra.mxu0 %v6760_v14 }
 0x3c3   : > { %6124 = vmatpush3.bf16.msra.mxu1 %v6749_v22  ;;  %3645 = vst [vmem:[#allocation2 + $0x30] sm:$0xff] %v6839_v9  ;;  %3646 = vst [vmem:[#allocation2 + $0x38] sm:$0xff] %v6839_v9 }
 0x3c4   : > { %6125 = vmatprep.subr.bf16.mxu1 %v6750_v33  ;;  %3647 = vst [vmem:[#allocation2 + $0x40] sm:$0xff] %v6839_v9  ;;  %3648 = vst [vmem:[#allocation2 + $0x48] sm:$0xff] %v6839_v9 }
 0x3c5   : > { %3649 = vst [vmem:[#allocation2 + $0x50] sm:$0xff] %v6839_v9  ;;  %3650 = vst [vmem:[#allocation2 + $0x58] sm:$0xff] %v6839_v9 }
 0x3c6   : > { %3213 = vmatmul.mubr.bf16.gmra.mrb[188].mxu1 %v8589_v34  ;;  %3651 = vst [vmem:[#allocation2 + $0x60] sm:$0xff] %v6839_v9  ;;  %3652 = vst [vmem:[#allocation2 + $0x68] sm:$0xff] %v6839_v9 }
 0x3c7   : > { %6126 = vmatpush3.bf16.msra.mxu1 %v6751_v47  ;;  %3559 = vmatprep.mubr.bf16.mxu1 %v3391_v31  ;;  %v8590_v31 = vld [vmem:[#allocation3_spill] sm:$0xff]  ;;  %3653 = vst [vmem:[#allocation2 + $0x70] sm:$0xff] %v6839_v9  ;;  %3654 = vst [vmem:[#allocation2 + $0x78] sm:$0xff] %v6839_v9 }
 0x3c8   : > { %6127 = vmatprep.subr.bf16.mxu1 %v6752_v42  ;;  %3655 = vst [vmem:[#allocation2 + $0x80] sm:$0xff] %v6839_v9  ;;  %3656 = vst [vmem:[#allocation2 + $0x88] sm:$0xff] %v6839_v9  ;;  %v6762_v42 = vld [vmem:[%s8484_s4 + $0x70] sm:$0xff]  }
 0x3c9   : > { %3657 = vst [vmem:[#allocation2 + $0x90] sm:$0xff] %v6839_v9  ;;  %3658 = vst [vmem:[#allocation2 + $0x98] sm:$0xff] %v6839_v9  ;;  %6273 = vmatprep.subr.bf16.mxu0 %v6762_v42 }
 0x3ca   : > { %6274 = vmatpush3.bf16.msra.mxu0 %v6762_v42 }
 0x3cb   : > { %6128 = vmatpush3.bf16.msra.mxu1 %v6753_v38  ;;  %v8031_v38 = vld [vmem:[%s8484_s4 + $0x200] sm:$0xff]  }
 0x3cc   : > { %6477 = vmatprep.subr.bf16.mxu1 %v8031_v38 }
 0x3ce   : > { %3560 = vmatmul.mubr.bf16.vlgmr.msra.gmra.mrb[192].mxu1 %v3390_v28 }
 0x3cf   : > { %3567 = vmatprep.mubr.bf16.mxu1 %v3393_v25  ;;  %6485 = vmatpush3.bf16.msra.mxu1 %v8031_v38 }
 0x3d6   : > { %3568 = vmatmul.mubr.bf16.gmra.mrb[196].mxu1 %v3392_v32 }
 0x3d7   : > { %3575 = vmatprep.mubr.bf16.mxu1 %v3395_v35 }
 0x3de   : > { %3576 = vmatmul.mubr.bf16.gmra.mrb[200].mxu1 %v3394_v6  ;;  %v8592_v6 = vld [vmem:[#allocation5_spill] sm:$0xff] }
 0x3df   : > { %3583 = vmatprep.mubr.bf16.mxu1 %v3397_v18 }
 0x3e6   : > { %3584 = vmatmul.mubr.bf16.gmra.mrb[204].mxu1 %v3396_v4 }
 0x401   : > { %v5929_v17 = vpop.f32.mrb[112].mxu1 }
 0x402   : > { %v5930_v49 = vpop.f32.mrb[113].mxu1 }
 0x403   : > { %v5931_v50 = vadd.f32 %v5930_v49, %v5929_v17  ;;  %v5932_v28 = vpop.f32.mrb[114].mxu1  ;;  %v6764_v49 = vld [vmem:[%s8484_s4 + $0x78] sm:$0xff]  }
 0x404   : > { %v5933_v15 = vpop.f32.mrb[115].mxu1  ;;  %6275 = vmatprep.subr.bf16.mxu0 %v6764_v49 }
 0x405   : > { %v7961_v7 = vadd.f32 %v5931_v50, %v8590_v31  ;;  %v5934_v1 = vadd.f32 %v5933_v15, %v5932_v28  ;;  %v8042_v15 = vld [vmem:[%s8484_s4 + $0x208] sm:$0xff]   ;;  %6276 = vmatpush3.bf16.msra.mxu0 %v6764_v49 }
 0x406   : > { %6478 = vmatprep.subr.bf16.mxu1 %v8042_v15 }
 0x407   : > { %v7964_v0 = vadd.f32 %v5934_v1, %v8591_v8  ;;  %v8047_v1 = vld [vmem:[%s8484_s4] sm:$0xff]   ;;  %6486 = vmatpush3.bf16.msra.mxu1 %v8042_v15 }
 0x408   : > { %6285 = vmatprep.subr.bf16.mxu0 %v8047_v1 }
 0x409   : > { %v5935_v25 = vpop.f32.mrb[116].mxu1 }
 0x40a   : > { %v5936_v32 = vpop.f32.mrb[117].mxu1 }
 0x40b   : > { %v5937_v45 = vadd.f32 %v5936_v32, %v5935_v25  ;;  %v5938_v30 = vpop.f32.mrb[118].mxu1  ;;  %v8056_v32 = vld [vmem:[%s8484_s4 + $0x210] sm:$0xff]  }
 0x40c   : > { %v5939_v3 = vpop.f32.mrb[119].mxu1  ;;  %6479 = vmatprep.subr.bf16.mxu1 %v8056_v32 }
 0x40d   : > { %v7967_v26 = vadd.f32 %v5937_v45, %v8592_v6  ;;  %v5940_v35 = vadd.f32 %v5939_v3, %v5938_v30  ;;  %6487 = vmatpush3.bf16.msra.mxu1 %v8056_v32  ;;  %v8064_v6 = vld [vmem:[%s8484_s4 + $0x218] sm:$0xff]  }
 0x40e   : > { %6480 = vmatprep.subr.bf16.mxu1 %v8064_v6 }
 0x40f   : > { %v7970_v37 = vadd.f32 %v5940_v35, %v8593_v55 }
 0x411   : > { %v5941_v60 = vpop.f32.mrb[120].mxu1  ;;  %6488 = vmatpush3.bf16.msra.mxu1 %v8064_v6 }
 0x412   : > { %v5942_v63 = vpop.f32.mrb[121].mxu1 }
 0x413   : > { %v5943_v4 = vadd.f32 %v5942_v63, %v5941_v60  ;;  %v5944_v18 = vpop.f32.mrb[122].mxu1 }
 0x414   : > { %v5945_v54 = vpop.f32.mrb[123].mxu1 }
 0x415   : > { %v7976_v44 = vadd.f32 %v5943_v4, %v8594_v21  ;;  %v5946_v29 = vadd.f32 %v5945_v54, %v5944_v18  ;;  %v8073_v4 = vld [vmem:[%s8484_s4 + $0x220] sm:$0xff]  }
 0x416   : > { %6481 = vmatprep.subr.bf16.mxu1 %v8073_v4 }
 0x417   : > { %v7979_v5 = vadd.f32 %v5946_v29, %v8595_v52  ;;  %6489 = vmatpush3.bf16.msra.mxu1 %v8073_v4 }
 0x419   : > { %v5947_v41 = vpop.f32.mrb[124].mxu1 }
 0x41a   : > { %v5948_v24 = vpop.f32.mrb[125].mxu1 }
 0x41b   : > { %v5949_v27 = vadd.f32 %v5948_v24, %v5947_v41  ;;  %v5950_v51 = vpop.f32.mrb[126].mxu1  ;;  %v8092_v24 = vld [vmem:[%s8484_s4 + $0x238] sm:$0xff]  }
 0x41c   : > { %v5951_v39 = vpop.f32.mrb[127].mxu1 }
 0x41d   : > { %v7988_v46 = vadd.f32 %v5949_v27, %v8596_v36  ;;  %v5952_v12 = vadd.f32 %v5951_v39, %v5950_v51 }
 0x41f   : > { %v7991_v48 = vadd.f32 %v5952_v12, %v8597_v43 }
 0x421   : > { %v5969_v16 = vpop.f32.mrb[128].mxu1 }
 0x422   : > { %v5970_v53 = vpop.f32.mrb[129].mxu1 }
 0x423   : > { %v5971_v59 = vadd.f32 %v5970_v53, %v5969_v16  ;;  %v5972_v61 = vpop.f32.mrb[130].mxu1 }
 0x424   : > { %v5973_v20 = vpop.f32.mrb[131].mxu1 }
 0x425   : > { %v2108_v19 = vadd.f32 %v5971_v59, %v7961_v7  ;;  %v5974_v13 = vadd.f32 %v5973_v20, %v5972_v61 }
 0x427   : > { %v2109_v62 = vadd.f32 %v5974_v13, %v7964_v0 }
 0x429   : > { %v5975_v56 = vpop.f32.mrb[132].mxu1 }
 0x42a   : > { %v5976_v22 = vpop.f32.mrb[133].mxu1 }
 0x42b   : > { %v5977_v33 = vadd.f32 %v5976_v22, %v5975_v56  ;;  %v5978_v47 = vpop.f32.mrb[134].mxu1 }
 0x42c   : > { %v5979_v57 = vpop.f32.mrb[135].mxu1 }
 0x42d   : > { %v2110_v23 = vadd.f32 %v5977_v33, %v7967_v26  ;;  %v5980_v34 = vadd.f32 %v5979_v57, %v5978_v47 }
 0x42f   : > { %v2111_v17 = vadd.f32 %v5980_v34, %v7970_v37 }
 0x431   : > { %v5981_v50 = vpop.f32.mrb[136].mxu1 }
 0x432   : > { %v5982_v28 = vpop.f32.mrb[137].mxu1 }
 0x433   : > { %v5983_v31 = vadd.f32 %v5982_v28, %v5981_v50  ;;  %v5984_v7 = vpop.f32.mrb[138].mxu1 }
 0x434   : > { %v5985_v8 = vpop.f32.mrb[139].mxu1 }
 0x435   : > { %v2112_v0 = vadd.f32 %v5983_v31, %v7976_v44  ;;  %v5986_v25 = vadd.f32 %v5985_v8, %v5984_v7  ;;  %v8080_v44 = vld [vmem:[%s8484_s4 + $0x228] sm:$0xff]  }
 0x436   : > { %6482 = vmatprep.subr.bf16.mxu1 %v8080_v44 }
 0x437   : > { %v2113_v45 = vadd.f32 %v5986_v25, %v7979_v5  ;;  %6490 = vmatpush3.bf16.msra.mxu1 %v8080_v44 }
 0x438   : > { %6483 = vmatprep.subr.bf16.mxu1 %v8087_v58 }
 0x439   : > { %v5987_v30 = vpop.f32.mrb[140].mxu1 }
 0x43a   : > { %v5988_v3 = vpop.f32.mrb[141].mxu1 }
 0x43b   : > { %v5989_v26 = vadd.f32 %v5988_v3, %v5987_v30  ;;  %v5990_v35 = vpop.f32.mrb[142].mxu1  ;;  %6491 = vmatpush3.bf16.msra.mxu1 %v8087_v58 }
 0x43c   : > { %v5991_v55 = vpop.f32.mrb[143].mxu1  ;;  %6484 = vmatprep.subr.bf16.mxu1 %v8092_v24 }
 0x43d   : > { %v2114_v37 = vadd.f32 %v5989_v26, %v7988_v46  ;;  %v5992_v60 = vadd.f32 %v5991_v55, %v5990_v35 }
 0x43f   : > { %v2115_v63 = vadd.f32 %v5992_v60, %v7991_v48  ;;  %6492 = vmatpush3.bf16.msra.mxu1 %v8092_v24 }
 0x441   : > { %v6009_v18 = vpop.f32.mrb[144].mxu1 }
 0x442   : > { %v6010_v2 = vpop.f32.mrb[145].mxu1 }
 0x443   : > { %v6011_v54 = vadd.f32 %v6010_v2, %v6009_v18  ;;  %v6012_v21 = vpop.f32.mrb[146].mxu1 }
 0x444   : > { %v6013_v29 = vpop.f32.mrb[147].mxu1 }
 0x445   : > { %v2479_v52 = vadd.f32 %v6011_v54, %v2108_v19  ;;  %v6014_v5 = vadd.f32 %v6013_v29, %v6012_v21 }
 0x447   : > { %v2480_v41 = vadd.f32 %v6014_v5, %v2109_v62 }
 0x449   : > { %v6015_v27 = vpop.f32.mrb[148].mxu1 }
 0x44a   : > { %v6016_v51 = vpop.f32.mrb[149].mxu1 }
 0x44b   : > { %v6017_v11 = vadd.f32 %v6016_v51, %v6015_v27  ;;  %v6018_v39 = vpop.f32.mrb[150].mxu1 }
 0x44c   : > { %v6019_v36 = vpop.f32.mrb[151].mxu1 }
 0x44d   : > { %v2481_v46 = vadd.f32 %v6017_v11, %v2110_v23  ;;  %v6020_v12 = vadd.f32 %v6019_v36, %v6018_v39 }
 0x44f   : > { %v2482_v43 = vadd.f32 %v6020_v12, %v2111_v17 }
 0x451   : > { %v6021_v48 = vpop.f32.mrb[152].mxu1 }
 0x452   : > { %v6022_v40 = vpop.f32.mrb[153].mxu1 }
 0x453   : > { %v6023_v16 = vadd.f32 %v6022_v40, %v6021_v48  ;;  %v6024_v53 = vpop.f32.mrb[154].mxu1 }
 0x454   : > { %v6025_v59 = vpop.f32.mrb[155].mxu1 }
 0x455   : > { %v2483_v61 = vadd.f32 %v6023_v16, %v2112_v0  ;;  %v6026_v10 = vadd.f32 %v6025_v59, %v6024_v53 }
 0x457   : > { %v2484_v20 = vadd.f32 %v6026_v10, %v2113_v45 }
 0x459   : > { %v6027_v19 = vpop.f32.mrb[156].mxu1 }
 0x45a   : > { %v6028_v13 = vpop.f32.mrb[157].mxu1 }
 0x45b   : > { %v6029_v62 = vadd.f32 %v6028_v13, %v6027_v19  ;;  %v6030_v14 = vpop.f32.mrb[158].mxu1 }
 0x45c   : > { %v6031_v56 = vpop.f32.mrb[159].mxu1 }
 0x45d   : > { %v2485_v22 = vadd.f32 %v6029_v62, %v2114_v37  ;;  %v6032_v33 = vadd.f32 %v6031_v56, %v6030_v14 }
 0x45f   : > { %v2486_v47 = vadd.f32 %v6032_v33, %v2115_v63 }
 0x461   : > { %v6049_v42 = vpop.f32.mrb[160].mxu1 }
 0x462   : > { %v6050_v57 = vpop.f32.mrb[161].mxu1 }
 0x463   : > { %v6051_v23 = vadd.f32 %v6050_v57, %v6049_v42  ;;  %v6052_v34 = vpop.f32.mrb[162].mxu1 }
 0x464   : > { %v6053_v17 = vpop.f32.mrb[163].mxu1 }
 0x465   : > { %v2850_v49 = vadd.f32 %v6051_v23, %v2479_v52  ;;  %v6054_v50 = vadd.f32 %v6053_v17, %v6052_v34 }
 0x467   : > { %v2851_v28 = vadd.f32 %v6054_v50, %v2480_v41 }
 0x469   : > { %v6055_v31 = vpop.f32.mrb[164].mxu1 }
 0x46a   : > { %v6056_v7 = vpop.f32.mrb[165].mxu1 }
 0x46b   : > { %v6057_v8 = vadd.f32 %v6056_v7, %v6055_v31  ;;  %v6058_v0 = vpop.f32.mrb[166].mxu1 }
 0x46c   : > { %v6059_v25 = vpop.f32.mrb[167].mxu1 }
 0x46d   : > { %v2852_v45 = vadd.f32 %v6057_v8, %v2481_v46  ;;  %v6060_v30 = vadd.f32 %v6059_v25, %v6058_v0 }
 0x46f   : > { %v2853_v3 = vadd.f32 %v6060_v30, %v2482_v43  ;;  %v8107_v30 = vld [vmem:[%s8483_s3] ss:$0 sm:$0xff] }
 0x471   : > { %v6061_v26 = vpop.f32.mrb[168].mxu1 }
 0x472   : > { %v6062_v35 = vpop.f32.mrb[169].mxu1 }
 0x473   : > { %v6063_v55 = vadd.f32 %v6062_v35, %v6061_v26  ;;  %v6064_v37 = vpop.f32.mrb[170].mxu1 }
 0x474   : > { %v6065_v60 = vpop.f32.mrb[171].mxu1 }
 0x475   : > { %v2854_v63 = vadd.f32 %v6063_v55, %v2483_v61  ;;  %v6066_v18 = vadd.f32 %v6065_v60, %v6064_v37 }
 0x477   : > { %v2855_v2 = vadd.f32 %v6066_v18, %v2484_v20 }
 0x479   : > { %v6067_v54 = vpop.f32.mrb[172].mxu1 }
 0x47a   : > { %v6068_v21 = vpop.f32.mrb[173].mxu1 }
 0x47b   : > { %v6069_v29 = vadd.f32 %v6068_v21, %v6067_v54  ;;  %v6070_v52 = vpop.f32.mrb[174].mxu1 }
 0x47c   : > { %v6071_v5 = vpop.f32.mrb[175].mxu1 }
 0x47d   : > { %v2856_v41 = vadd.f32 %v6069_v29, %v2485_v22  ;;  %v6072_v27 = vadd.f32 %v6071_v5, %v6070_v52 }
 0x47f   : > { %v2857_v51 = vadd.f32 %v6072_v27, %v2486_v47 }
 0x481   : > { %v6089_v11 = vpop.f32.mrb[176].mxu1 }
 0x482   : > { %v6090_v39 = vpop.f32.mrb[177].mxu1 }
 0x483   : > { %v6091_v36 = vadd.f32 %v6090_v39, %v6089_v11  ;;  %v6092_v46 = vpop.f32.mrb[178].mxu1 }
 0x484   : > { %v6093_v12 = vpop.f32.mrb[179].mxu1 }
 0x485   : > { %v3221_v43 = vadd.f32 %v6091_v36, %v2850_v49  ;;  %v6094_v48 = vadd.f32 %v6093_v12, %v6092_v46 }
 0x487   : > { %v3222_v40 = vadd.f32 %v6094_v48, %v2851_v28 }
 0x489   : > { %v6095_v16 = vpop.f32.mrb[180].mxu1 }
 0x48a   : > { %v6096_v53 = vpop.f32.mrb[181].mxu1 }
 0x48b   : > { %v6097_v59 = vadd.f32 %v6096_v53, %v6095_v16  ;;  %v6098_v61 = vpop.f32.mrb[182].mxu1 }
 0x48c   : > { %v6099_v10 = vpop.f32.mrb[183].mxu1 }
 0x48d   : > { %v3223_v20 = vadd.f32 %v6097_v59, %v2852_v45  ;;  %v6100_v19 = vadd.f32 %v6099_v10, %v6098_v61 }
 0x48f   : > { %v3224_v13 = vadd.f32 %v6100_v19, %v2853_v3 }
 0x491   : > { %v6101_v62 = vpop.f32.mrb[184].mxu1 }
 0x492   : > { %v6102_v14 = vpop.f32.mrb[185].mxu1 }
 0x493   : > { %v6103_v56 = vadd.f32 %v6102_v14, %v6101_v62  ;;  %v6104_v22 = vpop.f32.mrb[186].mxu1 }
 0x494   : > { %v6105_v33 = vpop.f32.mrb[187].mxu1 }
 0x495   : > { %v3225_v47 = vadd.f32 %v6103_v56, %v2854_v63  ;;  %v6106_v42 = vadd.f32 %v6105_v33, %v6104_v22 }
 0x497   : > { %v8098_v57 = vadd.f32 %v6106_v42, %v2855_v2  ;;  %v3696_v2 = vld [vmem:[#allocation2 + $0x1] sm:$0xff] }
 0x499   : > { %v6107_v23 = vpop.f32.mrb[188].mxu1 }
 0x49a   : > { %v6108_v34 = vpop.f32.mrb[189].mxu1 }
 0x49b   : > { %v6109_v17 = vadd.f32 %v6108_v34, %v6107_v23  ;;  %v6110_v49 = vpop.f32.mrb[190].mxu1 }
 0x49c   : > { %v6111_v50 = vpop.f32.mrb[191].mxu1 }
 0x49d   : > { %v8100_v28 = vadd.f32 %v6109_v17, %v2856_v41  ;;  %v6112_v31 = vadd.f32 %v6111_v50, %v6110_v49 }
 0x49f   : > { %v8102_v7 = vadd.f32 %v6112_v31, %v2857_v51 }
 0x4a1   : > { %v6129_v8 = vpop.f32.mrb[192].mxu1 }
 0x4a2   : > { %v6130_v0 = vpop.f32.mrb[193].mxu1 }
 0x4a3   : > { %v6131_v25 = vadd.f32 %v6130_v0, %v6129_v8  ;;  %v6132_v45 = vpop.f32.mrb[194].mxu1 }
 0x4a4   : > { %v6133_v3 = vpop.f32.mrb[195].mxu1 }
 0x4a5   : > { %v3592_v26 = vadd.f32 %v6131_v25, %v3221_v43  ;;  %v6134_v35 = vadd.f32 %v6133_v3, %v6132_v45 }
 0x4a7   : > { %v3607_v55 = vadd.f32 %v8107_v30, %v3592_v26  ;;  %v3593_v37 = vadd.f32 %v6134_v35, %v3222_v40  ;;  %v6772_v26 = vld [vmem:[%s8484_s4 + $0x18] sm:$0xff]  }
 0x4a9   : > { %vm3615_vm0 = vcmp.gt.f32.partialorder %v3607_v55, 0.0  ;;  %v3623_v60 = vmul.f32 0.28507218, %v3607_v55  ;;  %v3608_v63 = vadd.f32 %v8107_v30, %v3593_v37  ;;  %v6135_v18 = vpop.f32.mrb[196].mxu1 }
 0x4aa   : > { %v6136_v54 = vpop.f32.mrb[197].mxu1 }
 0x4ab   : > { %v8111_v21 = vsel %vm3615_vm0, %v3607_v55, %v3623_v60  ;;  %vm3616_vm4 = vcmp.gt.f32.partialorder %v3608_v63, 0.0  ;;  %v3624_v29 = vmul.f32 0.28507218, %v3608_v63  ;;  %v6137_v52 = vadd.f32 %v6136_v54, %v6135_v18  ;;  %v6138_v5 = vpop.f32.mrb[198].mxu1 }
 0x4ac   : > { %3660 = vst [vmem:[#allocation2 + $0x11] sm:$0xff] %v8111_v21  ;;  %v6139_v41 = vpop.f32.mrb[199].mxu1  ;;  %v3704_v27 = vpack.c.bf16 %v8111_v21, %v3696_v2 }
 0x4ad   : > { %v8115_v51 = vsel %vm3616_vm4, %v3608_v63, %v3624_v29  ;;  %v3594_v11 = vadd.f32 %v6137_v52, %v3223_v20  ;;  %v6140_v39 = vadd.f32 %v6139_v41, %v6138_v5 }
 0x4ae   : > { %3661 = vst [vmem:[#allocation2 + $0x21] sm:$0xff] %v8115_v51  ;;  %6277 = vmatprep.mubr.bf16.mxu0 %v3704_v27  ;;  %v4259_v36 = vpack.c.bf16 %v8115_v51, %v8111_v21  ;;  %v6801_v21 = vld [vmem:[%s8484_s4 + $0x138] sm:$0xff]  }
 0x4af   : > { %v3609_v46 = vadd.f32 %v8107_v30, %v3594_v11  ;;  %v3595_v12 = vadd.f32 %v6140_v39, %v3224_v13  ;;  %v6768_v13 = vld [vmem:[%s8484_s4 + $0x8] sm:$0xff]  }
 0x4b0   : > { %v6775_v39 = vld [vmem:[%s8484_s4 + $0x28] sm:$0xff]  }
 0x4b1   : > { %vm3617_vm5 = vcmp.gt.f32.partialorder %v3609_v46, 0.0  ;;  %v3625_v43 = vmul.f32 0.28507218, %v3609_v46  ;;  %v3610_v48 = vadd.f32 %v8107_v30, %v3595_v12  ;;  %v6141_v40 = vpop.f32.mrb[200].mxu1 }
 0x4b2   : > { %v6142_v16 = vpop.f32.mrb[201].mxu1 }
 0x4b3   : > { %v8122_v53 = vsel %vm3617_vm5, %v3609_v46, %v3625_v43  ;;  %vm3618_vm6 = vcmp.gt.f32.partialorder %v3610_v48, 0.0  ;;  %v3626_v59 = vmul.f32 0.28507218, %v3610_v48  ;;  %v6143_v61 = vadd.f32 %v6142_v16, %v6141_v40  ;;  %v6144_v10 = vpop.f32.mrb[202].mxu1  ;;  %v8134_v22 = vld [vmem:[#allocation2 + $0x12] sm:$0xff] }
 0x4b4   : > { %3662 = vst [vmem:[#allocation2 + $0x31] sm:$0xff] %v8122_v53  ;;  %v6145_v20 = vpop.f32.mrb[203].mxu1  ;;  %v8127_v19 = vpack.c.bf16 %v8122_v53, %v8115_v51  ;;  %v8180_v41 = vld [vmem:[#allocation2 + $0x10] sm:$0xff]  ;;  %v6802_v51 = vld [vmem:[%s8484_s4 + $0x140] sm:$0xff]  }
 0x4b5   : > { %v8132_v62 = vsel %vm3618_vm6, %v3610_v48, %v3626_v59  ;;  %v3596_v14 = vadd.f32 %v6143_v61, %v3225_v47  ;;  %v6146_v56 = vadd.f32 %v6145_v20, %v6144_v10  ;;  %v8136_v33 = vld [vmem:[#allocation2 + $0x22] sm:$0xff]  ;;  %v6770_v47 = vld [vmem:[%s8484_s4 + $0x10] sm:$0xff]   ;;  %v3676_v12 = vpack.c.bf16 %v8180_v41, %v6839_v9  ;;  %v6777_v20 = vld [vmem:[%s8484_s4 + $0x38] sm:$0xff]  }
 0x4b6   : > { %3663 = vst [vmem:[#allocation2 + $0x41] sm:$0xff] %v8132_v62  ;;  %6278 = vmatmul.mubr.bf16.vlgmr.msra.gmra.mrb[80].mxu0 %v8127_v19  ;;  %v4260_v42 = vpack.c.bf16 %v8132_v62, %v8122_v53  ;;  %v4409_v23 = vpack.c.bf16 %v8136_v33, %v8134_v22  ;;  %v6776_v16 = vld [vmem:[%s8484_s4 + $0x30] sm:$0xff]   ;;  %v6806_v53 = vld [vmem:[%s8484_s4 + $0x160] sm:$0xff]  }
 0x4b7   : > { %v3611_v34 = vadd.f32 %v8107_v30, %v3596_v14  ;;  %v3597_v17 = vadd.f32 %v6146_v56, %v8098_v57  ;;  %6286 = vmatpush3.bf16.msra.mxu0 %v8047_v1  ;;  %v4859_v61 = vld [vmem:[#allocation2 + $0x92] sm:$0xff] }
 0x4b8   : > { %6287 = vmatprep.subr.bf16.mxu0 %v6768_v13 }
 0x4b9   : > { %vm3619_vm7 = vcmp.gt.f32.partialorder %v3611_v34, 0.0  ;;  %v3627_v49 = vmul.f32 0.28507218, %v3611_v34  ;;  %v3612_v50 = vadd.f32 %v8107_v30, %v3597_v17  ;;  %v6147_v31 = vpop.f32.mrb[204].mxu1 }
 0x4ba   : > { %v6148_v8 = vpop.f32.mrb[205].mxu1 }
 0x4bb   : > { %v8151_v0 = vsel %vm3619_vm7, %v3611_v34, %v3627_v49  ;;  %vm3620_vm8 = vcmp.gt.f32.partialorder %v3612_v50, 0.0  ;;  %v3628_v25 = vmul.f32 0.28507218, %v3612_v50  ;;  %v6149_v45 = vadd.f32 %v6148_v8, %v6147_v31  ;;  %v6150_v3 = vpop.f32.mrb[206].mxu1  ;;  %6288 = vmatpush3.bf16.msra.mxu0 %v6768_v13  ;;  %v8164_v60 = vld [vmem:[#allocation2 + $0x32] sm:$0xff]  ;;  %v6778_v34 = vld [vmem:[%s8484_s4 + $0x80] sm:$0xff]  }
 0x4bc   : > { %3664 = vst [vmem:[#allocation2 + $0x51] sm:$0xff] %v8151_v0  ;;  %v6151_v1 = vpop.f32.mrb[207].mxu1  ;;  %6289 = vmatprep.subr.bf16.mxu0 %v6770_v47  ;;  %v8156_v57 = vpack.c.bf16 %v8151_v0, %v8132_v62  ;;  %v8227_v17 = vld [vmem:[#allocation2 + $0x30] sm:$0xff]  ;;  %v3670_v49 = vld [vmem:[#allocation2 + $0x20] sm:$0xff]  ;;  %v6779_v8 = vld [vmem:[%s8484_s4 + $0x88] sm:$0xff]  }
 0x4bd   : > { %v8161_v35 = vsel %vm3620_vm8, %v3612_v50, %v3628_v25  ;;  %v3598_v55 = vadd.f32 %v6149_v45, %v8100_v28  ;;  %v6152_v37 = vadd.f32 %v6151_v1, %v6150_v3  ;;  %v8166_v63 = vld [vmem:[#allocation2 + $0x42] sm:$0xff]  ;;  %v8232_v50 = vpack.c.bf16 %v8227_v17, %v3670_v49  ;;  %v6780_v45 = vld [vmem:[%s8484_s4 + $0x90] sm:$0xff]  }
 0x4be   : > { %3665 = vst [vmem:[#allocation2 + $0x61] sm:$0xff] %v8161_v35  ;;  %6281 = vmatprep.mubr.bf16.mxu0 %v8156_v57  ;;  %v4261_v18 = vpack.c.bf16 %v8161_v35, %v8151_v0  ;;  %v4410_v2 = vpack.c.bf16 %v8166_v63, %v8164_v60  ;;  %v6774_v28 = vld [vmem:[%s8484_s4 + $0x20] sm:$0xff]   ;;  %v6807_v62 = vld [vmem:[%s8484_s4 + $0x168] sm:$0xff]   ;;  %v6812_v0 = vld [vmem:[%s8484_s4 + $0x190] sm:$0xff]  }
 0x4bf   : > { %v3613_v54 = vadd.f32 %v8107_v30, %v3598_v55  ;;  %v3599_v29 = vadd.f32 %v6152_v37, %v8102_v7  ;;  %6290 = vmatpush3.bf16.msra.mxu0 %v6770_v47  ;;  %v8234_v31 = vld [vmem:[#allocation2 + $0x40] sm:$0xff]  ;;  %v6781_v37 = vld [vmem:[%s8484_s4 + $0x98] sm:$0xff]  }
 0x4c0   : > { %6291 = vmatprep.subr.bf16.mxu0 %v6772_v26  ;;  %v3951_v1 = vld [vmem:[#allocation2 + $0x2] sm:$0xff] }
 0x4c1   : > { %vm3621_vm9 = vcmp.gt.f32.partialorder %v3613_v54, 0.0  ;;  %v3629_v52 = vmul.f32 0.28507218, %v3613_v54  ;;  %v3614_v5 = vadd.f32 %v8107_v30, %v3599_v29  ;;  %v6782_v29 = vld [vmem:[%s8484_s4 + $0xa0] sm:$0xff]  }
 0x4c3   : > { %v8182_v27 = vsel %vm3621_vm9, %v3613_v54, %v3629_v52  ;;  %vm3622_vm10 = vcmp.gt.f32.partialorder %v3614_v5, 0.0  ;;  %v3630_v11 = vmul.f32 0.28507218, %v3614_v5  ;;  %6292 = vmatpush3.bf16.msra.mxu0 %v6772_v26  ;;  %v8198_v43 = vld [vmem:[#allocation2 + $0x52] sm:$0xff]  ;;  %v3959_v54 = vpack.c.bf16 %v8134_v22, %v3951_v1  ;;  %v6795_v1 = vld [vmem:[%s8484_s4 + $0x108] sm:$0xff]  }
 0x4c4   : > { %3666 = vst [vmem:[#allocation2 + $0x71] sm:$0xff] %v8182_v27  ;;  %6293 = vmatprep.subr.bf16.mxu0 %v6774_v28  ;;  %v8187_v7 = vpack.c.bf16 %v8182_v27, %v8161_v35  ;;  %v8229_v47 = vld [vmem:[#allocation2 + $0x50] sm:$0xff]  ;;  %v6809_v22 = vld [vmem:[%s8484_s4 + $0x178] sm:$0xff]  }
 0x4c5   : > { %v8192_v46 = vsel %vm3622_vm10, %v3614_v5, %v3630_v11  ;;  %v8194_v30 = vld [vmem:[#allocation2 + $0x62] sm:$0xff]  ;;  %v8241_v25 = vpack.c.bf16 %v8229_v47, %v8234_v31  ;;  %v6784_v52 = vld [vmem:[%s8484_s4 + $0xb0] sm:$0xff]   ;;  %v6785_v5 = vld [vmem:[%s8484_s4 + $0xb8] sm:$0xff]  }
 0x4c6   : > { %3667 = vst [vmem:[#allocation2 + $0x81] sm:$0xff] %v8192_v46  ;;  %6282 = vmatmul.mubr.bf16.gmra.mrb[84].mxu0 %v8187_v7  ;;  %v4262_v48 = vpack.c.bf16 %v8192_v46, %v8182_v27  ;;  %v4411_v40 = vpack.c.bf16 %v8194_v30, %v8198_v43  ;;  %v3674_v26 = vld [vmem:[#allocation2 + $0x60] sm:$0xff]  ;;  %v6813_v35 = vld [vmem:[%s8484_s4 + $0x198] sm:$0xff]  }
 0x4c7   : > { %6294 = vmatpush3.bf16.msra.mxu0 %v6774_v28  ;;  %6301 = vmatprep.mubr.bf16.mxu0 %v3676_v12  ;;  %v6783_v28 = vld [vmem:[%s8484_s4 + $0xa8] sm:$0xff]   ;;  %v6786_v11 = vld [vmem:[%s8484_s4 + $0xc0] sm:$0xff]  }
 0x4c8   : > { %6295 = vmatprep.subr.bf16.mxu0 %v6775_v39  ;;  %v6787_v12 = vld [vmem:[%s8484_s4 + $0xc8] sm:$0xff]   ;;  %v6818_v27 = vld [vmem:[%s8484_s4 + $0x1c0] sm:$0xff]  }
 0x4cb   : > { %v8209_v59 = vld [vmem:[#allocation2 + $0x72] sm:$0xff]  ;;  %6296 = vmatpush3.bf16.msra.mxu0 %v6775_v39  ;;  %v8275_v39 = vpack.c.bf16 %v8164_v60, %v8136_v33  ;;  %v6810_v33 = vld [vmem:[%s8484_s4 + $0x180] sm:$0xff]  }
 0x4cc   : > { %v8213_v10 = vpack.c.bf16 %v8209_v59, %v8194_v30  ;;  %6297 = vmatprep.subr.bf16.mxu0 %v6776_v16  ;;  %v8248_v3 = vld [vmem:[#allocation2 + $0x70] sm:$0xff]  ;;  %v6814_v60 = vld [vmem:[%s8484_s4 + $0x1a0] sm:$0xff]   ;;  %v6819_v30 = vld [vmem:[%s8484_s4 + $0x1c8] sm:$0xff]  }
 0x4cd   : > { %v8218_v13 = vld [vmem:[#allocation2 + $0x82] sm:$0xff]  ;;  %v8251_v55 = vpack.c.bf16 %v8248_v3, %v3674_v26 }
 0x4ce   : > { %6473 = vmatprep.mubr.bf16.mxu1 %v8213_v10  ;;  %v4863_v14 = vpack.c.bf16 %v4859_v61, %v8218_v13  ;;  %v4412_v56 = vpack.c.bf16 %v8218_v13, %v8209_v59  ;;  %v6788_v61 = vld [vmem:[%s8484_s4 + $0xd0] sm:$0xff]   ;;  %v6822_v59 = vld [vmem:[%s8484_s4 + $0x1e0] sm:$0xff]  }
 0x4cf   : > { %6298 = vmatpush3.bf16.msra.mxu0 %v6776_v16  ;;  %v8282_v16 = vpack.c.bf16 %v8198_v43, %v8166_v63  ;;  %v6815_v63 = vld [vmem:[%s8484_s4 + $0x1a8] sm:$0xff]   ;;  %v6820_v43 = vld [vmem:[%s8484_s4 + $0x1d0] sm:$0xff]  }
 0x4d0   : > { %6474 = vmatmul.mubr.bf16.vlgmr.msra.gmra.mrb[208].mxu1 %v4863_v14  ;;  %6299 = vmatprep.subr.bf16.mxu0 %v6777_v20  ;;  %v4109_v14 = vpack.c.bf16 %v3670_v49, %v8180_v41  ;;  %v6792_v41 = vld [vmem:[%s8484_s4 + $0xf0] sm:$0xff]   ;;  %v6794_v49 = vld [vmem:[%s8484_s4 + $0x100] sm:$0xff]  }
 0x4d1   : > { %v6824_v13 = vld [vmem:[%s8484_s4 + $0x1f0] sm:$0xff]  }
 0x4d3   : > { %6300 = vmatpush3.bf16.msra.mxu0 %v6777_v20  ;;  %v6789_v20 = vld [vmem:[%s8484_s4 + $0xd8] sm:$0xff]  }
 0x4d4   : > { %6309 = vmatprep.subr.bf16.mxu0 %v6778_v34 }
 0x4d6   : > { %6302 = vmatmul.mubr.bf16.vlgmr.msra.gmra.mrb[80].mxu0 %v8232_v50 }
 0x4d7   : > { %6305 = vmatprep.mubr.bf16.mxu0 %v8241_v25  ;;  %6310 = vmatpush3.bf16.msra.mxu0 %v6778_v34  ;;  %v6790_v34 = vld [vmem:[%s8484_s4 + $0xe0] sm:$0xff]  }
 0x4d8   : > { %6311 = vmatprep.subr.bf16.mxu0 %v6779_v8 }
 0x4db   : > { %6312 = vmatpush3.bf16.msra.mxu0 %v6779_v8  ;;  %v6791_v8 = vld [vmem:[%s8484_s4 + $0xe8] sm:$0xff]  }
 0x4dc   : > { %6313 = vmatprep.subr.bf16.mxu0 %v6780_v45 }
 0x4de   : > { %6306 = vmatmul.mubr.bf16.gmra.mrb[84].mxu0 %v8251_v55 }
 0x4df   : > { %6314 = vmatpush3.bf16.msra.mxu0 %v6780_v45  ;;  %6325 = vmatprep.mubr.bf16.mxu0 %v3959_v54  ;;  %v4110_v45 = vpack.c.bf16 %v8234_v31, %v8227_v17  ;;  %v6796_v54 = vld [vmem:[%s8484_s4 + $0x110] sm:$0xff]   ;;  %v6797_v31 = vld [vmem:[%s8484_s4 + $0x118] sm:$0xff]  }
 0x4e0   : > { %6315 = vmatprep.subr.bf16.mxu0 %v6781_v37 }
 0x4e3   : > { %6316 = vmatpush3.bf16.msra.mxu0 %v6781_v37  ;;  %v4111_v37 = vpack.c.bf16 %v3674_v26, %v8229_v47  ;;  %v6798_v47 = vld [vmem:[%s8484_s4 + $0x120] sm:$0xff]   ;;  %v6800_v26 = vld [vmem:[%s8484_s4 + $0x130] sm:$0xff]  }
 0x4e4   : > { %6317 = vmatprep.subr.bf16.mxu0 %v6782_v29 }
 0x4e7   : > { %6318 = vmatpush3.bf16.msra.mxu0 %v6782_v29  ;;  %v8318_v29 = vld [vmem:[#allocation2 + $0x80] sm:$0xff] }
 0x4e8   : > { %6319 = vmatprep.subr.bf16.mxu0 %v6783_v28  ;;  %v4112_v17 = vpack.c.bf16 %v8318_v29, %v8248_v3  ;;  %v6799_v3 = vld [vmem:[%s8484_s4 + $0x128] sm:$0xff]  }
 0x4eb   : > { %6320 = vmatpush3.bf16.msra.mxu0 %v6783_v28  ;;  %v6804_v28 = vld [vmem:[%s8484_s4 + $0x150] sm:$0xff]  }
 0x4ec   : > { %6321 = vmatprep.subr.bf16.mxu0 %v6784_v52 }
 0x4ef   : > { %6322 = vmatpush3.bf16.msra.mxu0 %v6784_v52  ;;  %v6805_v52 = vld [vmem:[%s8484_s4 + $0x158] sm:$0xff]  }
 0x4f0   : > { %6323 = vmatprep.subr.bf16.mxu0 %v6785_v5 }
 0x4f3   : > { %6324 = vmatpush3.bf16.msra.mxu0 %v6785_v5 }
 0x4f4   : > { %6333 = vmatprep.subr.bf16.mxu0 %v6786_v11 }
 0x4f6   : > { %6326 = vmatmul.mubr.bf16.vlgmr.msra.gmra.mrb[80].mxu0 %v8275_v39 }
 0x4f7   : > { %6329 = vmatprep.mubr.bf16.mxu0 %v8282_v16  ;;  %6334 = vmatpush3.bf16.msra.mxu0 %v6786_v11 }
 0x4f8   : > { %6335 = vmatprep.subr.bf16.mxu0 %v6787_v12 }
 0x4fb   : > { %6336 = vmatpush3.bf16.msra.mxu0 %v6787_v12 }
 0x4fc   : > { %6337 = vmatprep.subr.bf16.mxu0 %v6788_v61 }
 0x4fe   : > { %6330 = vmatmul.mubr.bf16.gmra.mrb[84].mxu0 %v8213_v10  ;;  %v6793_v10 = vld [vmem:[%s8484_s4 + $0xf8] sm:$0xff]  }
 0x4ff   : > { %6338 = vmatpush3.bf16.msra.mxu0 %v6788_v61  ;;  %6349 = vmatprep.mubr.bf16.mxu0 %v4109_v14 }
 0x500   : > { %6339 = vmatprep.subr.bf16.mxu0 %v6789_v20 }
 0x503   : > { %6340 = vmatpush3.bf16.msra.mxu0 %v6789_v20 }
 0x504   : > { %6341 = vmatprep.subr.bf16.mxu0 %v6790_v34 }
 0x507   : > { %6342 = vmatpush3.bf16.msra.mxu0 %v6790_v34 }
 0x508   : > { %6343 = vmatprep.subr.bf16.mxu0 %v6791_v8 }
 0x50b   : > { %6344 = vmatpush3.bf16.msra.mxu0 %v6791_v8 }
 0x50c   : > { %6345 = vmatprep.subr.bf16.mxu0 %v6792_v41 }
 0x50f   : > { %6346 = vmatpush3.bf16.msra.mxu0 %v6792_v41 }
 0x510   : > { %6347 = vmatprep.subr.bf16.mxu0 %v6793_v10 }
 0x513   : > { %6348 = vmatpush3.bf16.msra.mxu0 %v6793_v10 }
 0x514   : > { %6357 = vmatprep.subr.bf16.mxu0 %v6794_v49 }
 0x516   : > { %6350 = vmatmul.mubr.bf16.vlgmr.msra.gmra.mrb[80].mxu0 %v4110_v45 }
 0x517   : > { %6353 = vmatprep.mubr.bf16.mxu0 %v4111_v37  ;;  %6358 = vmatpush3.bf16.msra.mxu0 %v6794_v49 }
 0x518   : > { %6359 = vmatprep.subr.bf16.mxu0 %v6795_v1 }
 0x51b   : > { %6360 = vmatpush3.bf16.msra.mxu0 %v6795_v1 }
 0x51c   : > { %6361 = vmatprep.subr.bf16.mxu0 %v6796_v54 }
 0x51e   : > { %6354 = vmatmul.mubr.bf16.gmra.mrb[84].mxu0 %v4112_v17 }
 0x51f   : > { %6362 = vmatpush3.bf16.msra.mxu0 %v6796_v54  ;;  %6373 = vmatprep.mubr.bf16.mxu0 %v4259_v36  ;;  %v6803_v36 = vld [vmem:[%s8484_s4 + $0x148] sm:$0xff]  }
 0x520   : > { %6363 = vmatprep.subr.bf16.mxu0 %v6797_v31 }
 0x523   : > { %6364 = vmatpush3.bf16.msra.mxu0 %v6797_v31 }
 0x524   : > { %6365 = vmatprep.subr.bf16.mxu0 %v6798_v47 }
 0x527   : > { %6366 = vmatpush3.bf16.msra.mxu0 %v6798_v47 }
 0x528   : > { %6367 = vmatprep.subr.bf16.mxu0 %v6799_v3 }
 0x52b   : > { %6368 = vmatpush3.bf16.msra.mxu0 %v6799_v3 }
 0x52c   : > { %6369 = vmatprep.subr.bf16.mxu0 %v6800_v26 }
 0x52f   : > { %6370 = vmatpush3.bf16.msra.mxu0 %v6800_v26 }
 0x530   : > { %6371 = vmatprep.subr.bf16.mxu0 %v6801_v21 }
 0x533   : > { %6372 = vmatpush3.bf16.msra.mxu0 %v6801_v21 }
 0x534   : > { %6381 = vmatprep.subr.bf16.mxu0 %v6802_v51 }
 0x536   : > { %6374 = vmatmul.mubr.bf16.vlgmr.msra.gmra.mrb[80].mxu0 %v4260_v42  ;;  %v6808_v42 = vld [vmem:[%s8484_s4 + $0x170] sm:$0xff]  }
 0x537   : > { %6377 = vmatprep.mubr.bf16.mxu0 %v4261_v18  ;;  %6382 = vmatpush3.bf16.msra.mxu0 %v6802_v51  ;;  %v6816_v18 = vld [vmem:[%s8484_s4 + $0x1b0] sm:$0xff]  }
 0x538   : > { %6383 = vmatprep.subr.bf16.mxu0 %v6803_v36 }
 0x53b   : > { %6384 = vmatpush3.bf16.msra.mxu0 %v6803_v36 }
 0x53c   : > { %6385 = vmatprep.subr.bf16.mxu0 %v6804_v28 }
 0x53e   : > { %6378 = vmatmul.mubr.bf16.gmra.mrb[84].mxu0 %v4262_v48  ;;  %v4563_v48 = vpack.c.bf16 %v6839_v9, %v8318_v29  ;;  %v6823_v9 = vld [vmem:[%s8484_s4 + $0x1e8] sm:$0xff]  }
 0x53f   : > { %6386 = vmatpush3.bf16.msra.mxu0 %v6804_v28  ;;  %6397 = vmatprep.mubr.bf16.mxu0 %v4409_v23  ;;  %v6811_v23 = vld [vmem:[%s8484_s4 + $0x188] sm:$0xff]  }
 0x540   : > { %6387 = vmatprep.subr.bf16.mxu0 %v6805_v52 }
 0x543   : > { %6388 = vmatpush3.bf16.msra.mxu0 %v6805_v52 }
 0x544   : > { %6389 = vmatprep.subr.bf16.mxu0 %v6806_v53 }
 0x547   : > { %6390 = vmatpush3.bf16.msra.mxu0 %v6806_v53 }
 0x548   : > { %6391 = vmatprep.subr.bf16.mxu0 %v6807_v62 }
 0x54b   : > { %6392 = vmatpush3.bf16.msra.mxu0 %v6807_v62 }
 0x54c   : > { %6393 = vmatprep.subr.bf16.mxu0 %v6808_v42 }
 0x54f   : > { %6394 = vmatpush3.bf16.msra.mxu0 %v6808_v42 }
 0x550   : > { %6395 = vmatprep.subr.bf16.mxu0 %v6809_v22 }
 0x553   : > { %6396 = vmatpush3.bf16.msra.mxu0 %v6809_v22 }
 0x554   : > { %6405 = vmatprep.subr.bf16.mxu0 %v6810_v33 }
 0x556   : > { %6398 = vmatmul.mubr.bf16.vlgmr.msra.gmra.mrb[80].mxu0 %v4410_v2  ;;  %v6817_v2 = vld [vmem:[%s8484_s4 + $0x1b8] sm:$0xff]  }
 0x557   : > { %6401 = vmatprep.mubr.bf16.mxu0 %v4411_v40  ;;  %6406 = vmatpush3.bf16.msra.mxu0 %v6810_v33  ;;  %v6821_v40 = vld [vmem:[%s8484_s4 + $0x1d8] sm:$0xff]  }
 0x558   : > { %6407 = vmatprep.subr.bf16.mxu0 %v6811_v23 }
 0x55b   : > { %6408 = vmatpush3.bf16.msra.mxu0 %v6811_v23 }
 0x55c   : > { %6409 = vmatprep.subr.bf16.mxu0 %v6812_v0 }
 0x55e   : > { %6402 = vmatmul.mubr.bf16.gmra.mrb[84].mxu0 %v4412_v56  ;;  %v4709_v56 = vld [vmem:[#allocation2 + $0x91] sm:$0xff] }
 0x55f   : > { %6410 = vmatpush3.bf16.msra.mxu0 %v6812_v0  ;;  %6421 = vmatprep.mubr.bf16.mxu0 %v8232_v50  ;;  %v4713_v50 = vpack.c.bf16 %v4709_v56, %v8192_v46 }
 0x560   : > { %6411 = vmatprep.subr.bf16.mxu0 %v6813_v35 }
 0x563   : > { %6412 = vmatpush3.bf16.msra.mxu0 %v6813_v35 }
 0x564   : > { %6413 = vmatprep.subr.bf16.mxu0 %v6814_v60 }
 0x567   : > { %6414 = vmatpush3.bf16.msra.mxu0 %v6814_v60 }
 0x568   : > { %6415 = vmatprep.subr.bf16.mxu0 %v6815_v63 }
 0x56b   : > { %6416 = vmatpush3.bf16.msra.mxu0 %v6815_v63 }
 0x56c   : > { %6417 = vmatprep.subr.bf16.mxu0 %v6816_v18 }
 0x56f   : > { %6418 = vmatpush3.bf16.msra.mxu0 %v6816_v18 }
 0x570   : > { %6419 = vmatprep.subr.bf16.mxu0 %v6817_v2 }
 0x573   : > { %6420 = vmatpush3.bf16.msra.mxu0 %v6817_v2 }
 0x574   : > { %6429 = vmatprep.subr.bf16.mxu0 %v6818_v27 }
 0x576   : > { %6422 = vmatmul.mubr.bf16.vlgmr.msra.gmra.mrb[80].mxu0 %v8241_v25 }
 0x577   : > { %6425 = vmatprep.mubr.bf16.mxu0 %v8251_v55  ;;  %6430 = vmatpush3.bf16.msra.mxu0 %v6818_v27 }
 0x578   : > { %6431 = vmatprep.subr.bf16.mxu0 %v6819_v30 }
 0x57b   : > { %6432 = vmatpush3.bf16.msra.mxu0 %v6819_v30 }
 0x57c   : > { %6433 = vmatprep.subr.bf16.mxu0 %v6820_v43 }
 0x57e   : > { %6426 = vmatmul.mubr.bf16.gmra.mrb[84].mxu0 %v4563_v48 }
 0x57f   : > { %6434 = vmatpush3.bf16.msra.mxu0 %v6820_v43  ;;  %6445 = vmatprep.mubr.bf16.mxu0 %v8127_v19  ;;  %v6825_v19 = vld [vmem:[%s8484_s4 + $0x1f8] sm:$0xff]  }
 0x580   : > { %6435 = vmatprep.subr.bf16.mxu0 %v6821_v40 }
 0x583   : > { %6436 = vmatpush3.bf16.msra.mxu0 %v6821_v40 }
 0x584   : > { %6437 = vmatprep.subr.bf16.mxu0 %v6822_v59 }
 0x587   : > { %6438 = vmatpush3.bf16.msra.mxu0 %v6822_v59 }
 0x588   : > { %6439 = vmatprep.subr.bf16.mxu0 %v6823_v9 }
 0x58b   : > { %6440 = vmatpush3.bf16.msra.mxu0 %v6823_v9 }
 0x58c   : > { %6441 = vmatprep.subr.bf16.mxu0 %v6824_v13 }
 0x58f   : > { %6442 = vmatpush3.bf16.msra.mxu0 %v6824_v13 }
 0x590   : > { %6443 = vmatprep.subr.bf16.mxu0 %v6825_v19 }
 0x593   : > { %6444 = vmatpush3.bf16.msra.mxu0 %v6825_v19 }
 0x594   : > { %6453 = vmatprep.subr.bf16.mxu0 %v8031_v38 }
 0x596   : > { %6446 = vmatmul.mubr.bf16.vlgmr.msra.gmra.mrb[80].mxu0 %v8156_v57 }
 0x597   : > { %6449 = vmatprep.mubr.bf16.mxu0 %v8187_v7  ;;  %6454 = vmatpush3.bf16.msra.mxu0 %v8031_v38 }
 0x598   : > { %6455 = vmatprep.subr.bf16.mxu0 %v8042_v15 }
 0x59b   : > { %6456 = vmatpush3.bf16.msra.mxu0 %v8042_v15 }
 0x59c   : > { %6457 = vmatprep.subr.bf16.mxu0 %v8056_v32 }
 0x59e   : > { %6450 = vmatmul.mubr.bf16.gmra.mrb[84].mxu0 %v4713_v50 }
 0x59f   : > { %6458 = vmatpush3.bf16.msra.mxu0 %v8056_v32  ;;  %6469 = vmatprep.mubr.bf16.mxu0 %v8275_v39 }
 0x5a0   : > { %6459 = vmatprep.subr.bf16.mxu0 %v8064_v6 }
 0x5a3   : > { %v6475_v57 = vpop.f32.mrb[208].mxu1  ;;  %6460 = vmatpush3.bf16.msra.mxu0 %v8064_v6  ;;  %v5789_v6 = vld [vmem:[%s8485_s5] ss:$0 sm:$0xff] }
 0x5a4   : > { %v4979_v38 = vpop.f32.mrb[209].mxu1  ;;  %6461 = vmatprep.subr.bf16.mxu0 %v8073_v4 }
 0x5a5   : > { %v6476_v7 = vpop.f32.mrb[210].mxu1 }
 0x5a6   : > { %v4982_v15 = vpop.f32.mrb[211].mxu1 }
 0x5a7   : > { %6462 = vmatpush3.bf16.msra.mxu0 %v8073_v4 }
 0x5a8   : > { %6463 = vmatprep.subr.bf16.mxu0 %v8080_v44 }
 0x5ab   : > { %6464 = vmatpush3.bf16.msra.mxu0 %v8080_v44 }
 0x5ac   : > { %6465 = vmatprep.subr.bf16.mxu0 %v8087_v58 }
 0x5af   : > { %6466 = vmatpush3.bf16.msra.mxu0 %v8087_v58 }
 0x5b0   : > { %6467 = vmatprep.subr.bf16.mxu0 %v8092_v24 }
 0x5b3   : > { %6468 = vmatpush3.bf16.msra.mxu0 %v8092_v24 }
 0x5b6   : > { %6470 = vmatmul.mubr.bf16.vlgmr.msra.gmra.mrb[80].mxu0 %v8282_v16 }
 0x671   : > { %v6451_v32 = vpop.f32.mrb[84].mxu0 }
 0x672   : > { %v6493_v4 = vadd.f32 %v6475_v57, %v6451_v32  ;;  %v4829_v46 = vpop.f32.mrb[85].mxu0 }
 0x673   : > { %v6494_v25 = vadd.f32 %v4979_v38, %v4829_v46  ;;  %v6452_v44 = vpop.f32.mrb[86].mxu0 }
 0x674   : > { %v5015_v55 = vadd.f32 %v6493_v4, %v5789_v6  ;;  %v6495_v5 = vadd.f32 %v6476_v7, %v6452_v44  ;;  %v4832_v11 = vpop.f32.mrb[87].mxu0 }
 0x675   : > { %v5013_v58 = vadd.f32 %v6494_v25, %v5789_v6  ;;  %v6496_v39 = vadd.f32 %v4982_v15, %v4832_v11 }
 0x676   : > { %vm5023_vm11 = vcmp.gt.f32.partialorder %v5015_v55, 0.0  ;;  %v5031_v24 = vmul.f32 0.28507218, %v5015_v55  ;;  %v5016_v12 = vadd.f32 %v6495_v5, %v5789_v6 }
 0x677   : > { %vm5021_vm12 = vcmp.gt.f32.partialorder %v5013_v58, 0.0  ;;  %v5029_v16 = vmul.f32 0.28507218, %v5013_v58  ;;  %v5014_v61 = vadd.f32 %v6496_v39, %v5789_v6 }
 0x678   : > { %v5039_v20 = vsel %vm5023_vm11, %v5015_v55, %v5031_v24  ;;  %vm5024_vm13 = vcmp.gt.f32.partialorder %v5016_v12, 0.0  ;;  %v5032_v14 = vmul.f32 0.28507218, %v5016_v12 }
 0x679   : > { %5047 = vst [vmem:[%s8467_s24 + $0x30] sm:$0xff] %v5039_v20  ;;  %v5037_v34 = vsel %vm5021_vm12, %v5013_v58, %v5029_v16  ;;  %vm5022_vm14 = vcmp.gt.f32.partialorder %v5014_v61, 0.0  ;;  %v5030_v8 = vmul.f32 0.28507218, %v5014_v61 }
 0x67a   : > { %5045 = vst [vmem:[%s8467_s24 + $0x20] sm:$0xff] %v5037_v34  ;;  %v5040_v41 = vsel %vm5024_vm13, %v5016_v12, %v5032_v14 }
 0x67b   : > { %5048 = vst [vmem:[%s8467_s24 + $0x38] sm:$0xff] %v5040_v41  ;;  %v5038_v10 = vsel %vm5022_vm14, %v5014_v61, %v5030_v8 }
 0x67c   : > { %5046 = vst [vmem:[%s8467_s24 + $0x28] sm:$0xff] %v5038_v10 }
 0x689   : > { %v6471_v49 = vpop.f32.mrb[80].mxu0 }
 0x68a   : > { %v5011_v45 = vadd.f32 %v6471_v49, %v5789_v6  ;;  %v4963_v1 = vpop.f32.mrb[81].mxu0 }
 0x68b   : > { %v5009_v37 = vadd.f32 %v5789_v6, %v4963_v1  ;;  %v6472_v54 = vpop.f32.mrb[82].mxu0 }
 0x68c   : > { %vm5019_vm15 = vcmp.gt.f32.partialorder %v5011_v45, 0.0  ;;  %v5027_v29 = vmul.f32 0.28507218, %v5011_v45  ;;  %v5012_v17 = vadd.f32 %v6472_v54, %v5789_v6  ;;  %v4966_v31 = vpop.f32.mrb[83].mxu0 }
 0x68d   : > { %vm5017_vm1 = vcmp.gt.f32.partialorder %v5009_v37, 0.0  ;;  %v5025_v47 = vmul.f32 0.28507218, %v5009_v37  ;;  %v5010_v3 = vadd.f32 %v5789_v6, %v4966_v31 }
 0x68e   : > { %v5035_v26 = vsel %vm5019_vm15, %v5011_v45, %v5027_v29  ;;  %vm5020_vm2 = vcmp.gt.f32.partialorder %v5012_v17, 0.0  ;;  %v5028_v21 = vmul.f32 0.28507218, %v5012_v17 }
 0x68f   : > { %5043 = vst [vmem:[%s8467_s24 + $0x10] sm:$0xff] %v5035_v26  ;;  %v5033_v51 = vsel %vm5017_vm1, %v5009_v37, %v5025_v47  ;;  %vm5018_vm3 = vcmp.gt.f32.partialorder %v5010_v3, 0.0  ;;  %v5026_v36 = vmul.f32 0.28507218, %v5010_v3 }
 0x690   : > { %5041 = vst [vmem:[%s8467_s24] sm:$0xff] %v5033_v51  ;;  %v5036_v28 = vsel %vm5020_vm2, %v5012_v17, %v5028_v21 }
 0x691   : > { %5044 = vst [vmem:[%s8467_s24 + $0x18] sm:$0xff] %v5036_v28  ;;  %v5034_v52 = vsel %vm5018_vm3, %v5010_v3, %v5026_v36 }
 0x692   : > { %5042 = vst [vmem:[%s8467_s24 + $0x8] sm:$0xff] %v5034_v52 }
 0x693 PF: > { %s16_s21 = sadd.s32 1, %s6836_s21  }
 0x694   : > { %p13_p4 = scmp.ge.s32.totalorder %s16_s21, 4  }
 0x696   :  { %15 = sbr.rel (!%p13_p4) target bundleno = 1 (0x1), region = 92 }

</bundles_post_ra>
